<compile_context>
chip_gen: v5e
topology: v5e:2x2
jax: 0.10.0
libtpu: 0.0.40
codegen_flags: <defaults>
</compile_context>

<pallas_src>
import functools

import jax
import jax.numpy as jnp
from jax.experimental import pallas as pl
from jax.experimental.pallas import tpu as pltpu

_PAD = 8  # halo band width; interior columns start at a sublane-aligned offset


def _fused_body_kernel(x_ref, w_ref, b_ref, a_ref, o_ref, buf_ref):
    """One grid step == the full L-layer body of ONE image.

    x_ref  : (H, W, C)           bf16  network input, channels zero-padded to C
    w_ref  : (L, 9*C, C)         bf16  pre-mixed im2col conv weights (all layers, resident)
    b_ref  : (L, 1, C)           f32   pre-mixed conv bias per layer
    a_ref  : (L, 1, C)           f32   pre-mixed PReLU alpha per layer (1.0 == identity)
    o_ref  : (H, W, C)           bf16  final body activation
    buf_ref: (H+2, W+2*_PAD, C)  bf16  halo-padded activation, resident across layers
    """
    H, W, C = o_ref.shape
    L = w_ref.shape[0]
    K = w_ref.shape[1]            # 9 * C
    Wp = W + 2 * _PAD

    # --- per-image init: zero only the halo strips the conv reads, then place
    #     the input into the sublane-aligned interior [1:H+1, _PAD:_PAD+W]. ---
    zrow = jnp.zeros((1, Wp, C), buf_ref.dtype)
    buf_ref[0:1, :, :] = zrow
    buf_ref[H + 1:H + 2, :, :] = zrow
    zcol = jnp.zeros((H + 2, _PAD, C), buf_ref.dtype)
    buf_ref[:, 0:_PAD, :] = zcol
    buf_ref[:, _PAD + W:Wp, :] = zcol
    buf_ref[1:H + 1, _PAD:_PAD + W, :] = x_ref[...]

    # --- all L pre-mixed (3x3 conv + PReLU) layers, weights resident in VMEM ---
    @pl.loop(0, L)
    def _(l):
        # im2col: 9 shifted views concatenated along channels -> one K=9*C dot.
        cols = []
        for dy in range(3):
            for dx in range(3):
                cols.append(buf_ref[dy:dy + H, _PAD - 1 + dx:_PAD - 1 + dx + W, :])
        patch = jnp.concatenate(cols, axis=-1).reshape(H * W, K)

        acc = jnp.dot(patch, w_ref[l], preferred_element_type=jnp.float32)

        # f32 epilogue: bias + pre-mixed PReLU (alpha == 1.0 encodes "no activation").
        y = acc + b_ref[l]
        out = jnp.maximum(y, 0.0) + a_ref[l] * jnp.minimum(y, 0.0)

        # Sublane-aligned interior writeback (offset 8 -> unmasked stores).
        buf_ref[1:H + 1, _PAD:_PAD + W, :] = out.reshape(H, W, C).astype(buf_ref.dtype)

    o_ref[...] = buf_ref[1:H + 1, _PAD:_PAD + W, :]


def _fused_body(x_pad, w_all, b_all, a_all):
    """x_pad: (N,H,W,C) bf16; w_all: (L,9C,C) bf16; b/a: (L,1,C) f32 -> (N,H,W,C) bf16."""
    N, H, W, C = x_pad.shape
    L, K, _ = w_all.shape
    return pl.pallas_call(
        _fused_body_kernel,
        out_shape=jax.ShapeDtypeStruct((N, H, W, C), jnp.bfloat16),
        grid=(N,),
        in_specs=[
            # Input image: one block per grid step.
            pl.BlockSpec((None, H, W, C), lambda n: (n, 0, 0, 0)),
            # Whole pre-mixed weight / bias / alpha stacks: constant block index
            # -> DMA'd into VMEM once and kept resident for the whole grid.
            pl.BlockSpec((L, K, C), lambda n: (0, 0, 0)),
            pl.BlockSpec((L, 1, C), lambda n: (0, 0, 0)),
            pl.BlockSpec((L, 1, C), lambda n: (0, 0, 0)),
        ],
        out_specs=pl.BlockSpec((None, H, W, C), lambda n: (n, 0, 0, 0)),
        scratch_shapes=[pltpu.VMEM((H + 2, W + 2 * _PAD, C), jnp.bfloat16)],
        compiler_params=pltpu.CompilerParams(
            dimension_semantics=("parallel",)),
    )(x_pad, w_all, b_all, a_all)


def make_params(key, num_in_ch=3, num_out_ch=3, num_feat=64, num_conv=32,
                upscale=4):
    """Deterministic synthetic parameters for one SRVGGNetCompact body.

    Returns a list of (weight(3,3,Cin,Cout), bias(Cout,), prelu_alpha(Cout,)) per
    conv layer.  The final conv has no activation in the PyTorch body; we encode
    that with alpha == 1.0 (PReLU with alpha 1 is the identity).
    """
    chans = ([(num_in_ch, num_feat)]
             + [(num_feat, num_feat)] * num_conv
             + [(num_feat, num_out_ch * upscale * upscale)])
    layers = []
    for i, (cin, cout) in enumerate(chans):
        key, kw, kb, ka = jax.random.split(key, 4)
        w = jax.random.normal(kw, (3, 3, cin, cout), jnp.float32) * 0.05
        b = jax.random.normal(kb, (cout,), jnp.float32) * 0.05
        if i < len(chans) - 1:
            a = (jnp.full((cout,), 0.25, jnp.float32)
                 + 0.01 * jax.random.normal(ka, (cout,), jnp.float32))
        else:
            a = jnp.ones((cout,), jnp.float32)   # identity: last conv has no act
        layers.append((w, b, a))
    return layers


def _mix_and_stack(params1, params2, s, feat):
    """Pre-mix the two models with noise_strength s, zero-pad every layer to a
    uniform (3,3,feat,feat) conv, and flatten the 9 taps into the contraction
    dim (im2col weight layout (9*feat, feat), tap-major / channel-minor, matching
    the in-kernel concatenation order).  Zero-padded input/output channels
    contribute exactly zero (bias padded with 0, alpha padded with 1)."""
    ws, bs, als = [], [], []
    for (w1, b1, a1), (w2, b2, a2) in zip(params1, params2):
        w = s * w1 + (1.0 - s) * w2
        b = s * b1 + (1.0 - s) * b2
        a = s * a1 + (1.0 - s) * a2
        cin, cout = w.shape[2], w.shape[3]
        w = jnp.pad(w, ((0, 0), (0, 0), (0, feat - cin), (0, feat - cout)))
        b = jnp.pad(b, ((0, feat - cout),))
        a = jnp.pad(a, ((0, feat - cout),), constant_values=1.0)
        ws.append(w.reshape(9 * feat, feat))      # (dy,dx,cin) flattened -> K
        bs.append(b)
        als.append(a)
    w_all = jnp.stack(ws).astype(jnp.bfloat16)                       # (L,9*feat,feat)
    b_all = jnp.stack(bs).reshape(-1, 1, feat).astype(jnp.float32)   # (L,1,feat)
    a_all = jnp.stack(als).reshape(-1, 1, feat).astype(jnp.float32)  # (L,1,feat)
    return w_all, b_all, a_all


@functools.partial(jax.jit, static_argnames=("upscale",))
def srvgg_denoise_forward(x_nchw, params1, params2, noise_strength, upscale=4):
    """SRVGGNetDenoise.forward.  x_nchw: (N, C, H, W) f32, NCHW like PyTorch."""
    N, C_in, H, W = x_nchw.shape
    r = upscale
    s = jnp.asarray(noise_strength, jnp.float32)

    feat = params1[0][0].shape[3]                       # num_feat (64)
    num_out_ch = params1[-1][0].shape[3] // (r * r)     # 3
    w_all, b_all, a_all = _mix_and_stack(params1, params2, s, feat)

    # NCHW -> NHWC, zero-pad input channels to the uniform feature width, cast bf16.
    x_nhwc = jnp.transpose(x_nchw, (0, 2, 3, 1)).astype(jnp.float32)
    x_pad = jnp.pad(x_nhwc, ((0, 0), (0, 0), (0, 0), (0, feat - C_in)))

    body = _fused_body(x_pad.astype(jnp.bfloat16), w_all, b_all, a_all)
    out = body[..., :num_out_ch * r * r].astype(jnp.float32)   # drop padded chans

    # PixelShuffle(4): both models share the identical parameter-free upsampler,
    # so s*PS(out) + (1-s)*PS(out) == PS(out).  Emit NCHW to match PyTorch.
    ps = out.reshape(N, H, W, num_out_ch, r, r)
    ps = jnp.transpose(ps, (0, 3, 1, 4, 2, 5)).reshape(N, num_out_ch, H * r, W * r)

    # base = F.interpolate(x, scale_factor=4, mode='nearest') in NCHW.
    base = jnp.repeat(jnp.repeat(x_nchw, r, axis=2), r, axis=3)
    return ps + base


if __name__ == "__main__":
    key = jax.random.PRNGKey(0)
    k1, k2, kx = jax.random.split(key, 3)

    # Module-fixed channel counts: num_in_ch=3, num_feat=64, num_conv=32,
    # num_out_ch=3, upscale=4.  Small batch / spatial for the demo.
    params1 = make_params(k1)
    params2 = make_params(k2)
    x = jax.random.uniform(kx, (2, 3, 16, 16), jnp.float32)
    noise_strength = jnp.float32(0.3)

    out = srvgg_denoise_forward(x, params1, params2, noise_strength)
    out = jax.block_until_ready(out)

    assert out.shape == (2, 3, 64, 64), out.shape
    assert bool(jnp.all(jnp.isfinite(out)))
    print("KERNEL_OK")
</pallas_src>

<mosaic_0001>
module attributes {stable_mosaic.version = 11 : i64} {
  func.func @_fused_body_kernel(%arg0: i32, %arg1: memref<1x16x16x64xbf16, #tpu.memory_space<vmem>>, %arg2: memref<34x576x64xbf16, #tpu.memory_space<vmem>>, %arg3: memref<34x1x64xf32, #tpu.memory_space<vmem>>, %arg4: memref<34x1x64xf32, #tpu.memory_space<vmem>>, %arg5: memref<1x16x16x64xbf16, #tpu.memory_space<vmem>>, %arg6: memref<18x32x64xbf16, #tpu.memory_space<vmem>>) attributes {dimension_semantics = [#tpu.dimension_semantics<parallel>], iteration_bounds = array<i64: 2>, scalar_prefetch = 0 : i64, scratch_operands = 1 : i64, tpu.core_type = #tpu.core_type<tc>, window_params = [{transform_indices = @transform_0, window_bounds = array<i64: 1, 16, 16, 64>}, {pipeline_mode = #tpu.pipeline_mode<synchronous>, transform_indices = @transform_1, window_bounds = array<i64: 34, 576, 64>}, {pipeline_mode = #tpu.pipeline_mode<synchronous>, transform_indices = @transform_2, window_bounds = array<i64: 34, 1, 64>}, {pipeline_mode = #tpu.pipeline_mode<synchronous>, transform_indices = @transform_3, window_bounds = array<i64: 34, 1, 64>}, {transform_indices = @transform_4, window_bounds = array<i64: 1, 16, 16, 64>}]} {
    %cst = arith.constant 0.000000e+00 : bf16
    %0 = vector.broadcast %cst : bf16 to vector<1x32x64xbf16>
    %c0 = arith.constant 0 : index
    %c0_0 = arith.constant 0 : index
    %c0_1 = arith.constant 0 : index
    %1 = vector.load %arg6[%c0, %c0_0, %c0_1] : memref<18x32x64xbf16, #tpu.memory_space<vmem>>, vector<1x32x64xbf16>
    tpu.vector_store %arg6[%c0, %c0_0, %c0_1], %0 {strides = array<i32>} : memref<18x32x64xbf16, #tpu.memory_space<vmem>>, vector<1x32x64xbf16>,
    %c17 = arith.constant 17 : index
    %c0_2 = arith.constant 0 : index
    %c0_3 = arith.constant 0 : index
    %2 = vector.load %arg6[%c17, %c0_2, %c0_3] : memref<18x32x64xbf16, #tpu.memory_space<vmem>>, vector<1x32x64xbf16>
    tpu.vector_store %arg6[%c17, %c0_2, %c0_3], %0 {strides = array<i32>} : memref<18x32x64xbf16, #tpu.memory_space<vmem>>, vector<1x32x64xbf16>,
    %cst_4 = arith.constant 0.000000e+00 : bf16
    %3 = vector.broadcast %cst_4 : bf16 to vector<18x8x64xbf16>
    %c0_5 = arith.constant 0 : index
    %c0_6 = arith.constant 0 : index
    %c0_7 = arith.constant 0 : index
    %4 = vector.load %arg6[%c0_5, %c0_6, %c0_7] : memref<18x32x64xbf16, #tpu.memory_space<vmem>>, vector<18x8x64xbf16>
    tpu.vector_store %arg6[%c0_5, %c0_6, %c0_7], %3 {strides = array<i32>} : memref<18x32x64xbf16, #tpu.memory_space<vmem>>, vector<18x8x64xbf16>,
    %c0_8 = arith.constant 0 : index
    %c24 = arith.constant 24 : index
    %c0_9 = arith.constant 0 : index
    %5 = vector.load %arg6[%c0_8, %c24, %c0_9] : memref<18x32x64xbf16, #tpu.memory_space<vmem>>, vector<18x8x64xbf16>
    tpu.vector_store %arg6[%c0_8, %c24, %c0_9], %3 {strides = array<i32>} : memref<18x32x64xbf16, #tpu.memory_space<vmem>>, vector<18x8x64xbf16>,
    %c0_10 = arith.constant 0 : index
    %c0_11 = arith.constant 0 : index
    %c0_12 = arith.constant 0 : index
    %c0_13 = arith.constant 0 : index
    %6 = vector.load %arg1[%c0_10, %c0_11, %c0_12, %c0_13] : memref<1x16x16x64xbf16, #tpu.memory_space<vmem>>, vector<1x16x16x64xbf16>
    %7 = vector.shape_cast %6 : vector<1x16x16x64xbf16> to vector<16x16x64xbf16>
    %c1 = arith.constant 1 : index
    %c8 = arith.constant 8 : index
    %c0_14 = arith.constant 0 : index
    %8 = vector.load %arg6[%c1, %c8, %c0_14] : memref<18x32x64xbf16, #tpu.memory_space<vmem>>, vector<16x16x64xbf16>
    tpu.vector_store %arg6[%c1, %c8, %c0_14], %7 {strides = array<i32>} : memref<18x32x64xbf16, #tpu.memory_space<vmem>>, vector<16x16x64xbf16>,
    %c0_i32 = arith.constant 0 : i32
    %c34_i32 = arith.constant 34 : i32
    %9 = arith.addi %c0_i32, %c34_i32 : i32
    %c1_i32 = arith.constant 1 : i32
    scf.for %arg7 = %c0_i32 to %9 step %c1_i32  : i32 {
      %c1_i32_23 = arith.constant 1 : i32
      %14 = arith.muli %arg7, %c1_i32_23 : i32
      %c0_i32_24 = arith.constant 0 : i32
      %15 = arith.addi %c0_i32_24, %14 : i32
      %c0_25 = arith.constant 0 : index
      %c7 = arith.constant 7 : index
      %c0_26 = arith.constant 0 : index
      %16 = vector.load %arg6[%c0_25, %c7, %c0_26] : memref<18x32x64xbf16, #tpu.memory_space<vmem>>, vector<16x16x64xbf16>
      %c0_27 = arith.constant 0 : index
      %c8_28 = arith.constant 8 : index
      %c0_29 = arith.constant 0 : index
      %17 = vector.load %arg6[%c0_27, %c8_28, %c0_29] : memref<18x32x64xbf16, #tpu.memory_space<vmem>>, vector<16x16x64xbf16>
      %c0_30 = arith.constant 0 : index
      %c9 = arith.constant 9 : index
      %c0_31 = arith.constant 0 : index
      %18 = vector.load %arg6[%c0_30, %c9, %c0_31] : memref<18x32x64xbf16, #tpu.memory_space<vmem>>, vector<16x16x64xbf16>
      %c1_32 = arith.constant 1 : index
      %c7_33 = arith.constant 7 : index
      %c0_34 = arith.constant 0 : index
      %19 = vector.load %arg6[%c1_32, %c7_33, %c0_34] : memref<18x32x64xbf16, #tpu.memory_space<vmem>>, vector<16x16x64xbf16>
      %c1_35 = arith.constant 1 : index
      %c8_36 = arith.constant 8 : index
      %c0_37 = arith.constant 0 : index
      %20 = vector.load %arg6[%c1_35, %c8_36, %c0_37] : memref<18x32x64xbf16, #tpu.memory_space<vmem>>, vector<16x16x64xbf16>
      %c1_38 = arith.constant 1 : index
      %c9_39 = arith.constant 9 : index
      %c0_40 = arith.constant 0 : index
      %21 = vector.load %arg6[%c1_38, %c9_39, %c0_40] : memref<18x32x64xbf16, #tpu.memory_space<vmem>>, vector<16x16x64xbf16>
      %c2 = arith.constant 2 : index
      %c7_41 = arith.constant 7 : index
      %c0_42 = arith.constant 0 : index
      %22 = vector.load %arg6[%c2, %c7_41, %c0_42] : memref<18x32x64xbf16, #tpu.memory_space<vmem>>, vector<16x16x64xbf16>
      %c2_43 = arith.constant 2 : index
      %c8_44 = arith.constant 8 : index
      %c0_45 = arith.constant 0 : index
      %23 = vector.load %arg6[%c2_43, %c8_44, %c0_45] : memref<18x32x64xbf16, #tpu.memory_space<vmem>>, vector<16x16x64xbf16>
      %c2_46 = arith.constant 2 : index
      %c9_47 = arith.constant 9 : index
      %c0_48 = arith.constant 0 : index
      %24 = vector.load %arg6[%c2_46, %c9_47, %c0_48] : memref<18x32x64xbf16, #tpu.memory_space<vmem>>, vector<16x16x64xbf16>
      %25 = tpu.concatenate %16, %17, %18, %19, %20, %21, %22, %23, %24 in 2 : vector<16x16x64xbf16>, vector<16x16x64xbf16>, vector<16x16x64xbf16>, vector<16x16x64xbf16>, vector<16x16x64xbf16>, vector<16x16x64xbf16>, vector<16x16x64xbf16>, vector<16x16x64xbf16>, vector<16x16x64xbf16> -> vector<16x16x576xbf16>
      %26 = vector.shape_cast %25 : vector<16x16x576xbf16> to vector<256x576xbf16>
      %27 = arith.index_cast %15 : i32 to index
      %c0_49 = arith.constant 0 : index
      %c0_50 = arith.constant 0 : index
      %28 = vector.load %arg2[%27, %c0_49, %c0_50] : memref<34x576x64xbf16, #tpu.memory_space<vmem>>, vector<1x576x64xbf16>
      %29 = vector.shape_cast %28 : vector<1x576x64xbf16> to vector<576x64xbf16>
      %cst_51 = arith.constant dense<0.000000e+00> : vector<256x64xf32>
      %30 = tpu.matmul %26, %29, %cst_51 {dimension_numbers = #tpu.dot_dimension_numbers<[1], [0], [0], [1], [0, 0, 1, 1], [], []>} : vector<256x576xbf16>, vector<576x64xbf16>, vector<256x64xf32> -> vector<256x64xf32>
      %31 = arith.index_cast %15 : i32 to index
      %c0_52 = arith.constant 0 : index
      %c0_53 = arith.constant 0 : index
      %32 = vector.load %arg3[%31, %c0_52, %c0_53] : memref<34x1x64xf32, #tpu.memory_space<vmem>>, vector<1x1x64xf32>
      %33 = vector.shape_cast %32 : vector<1x1x64xf32> to vector<1x64xf32>
      %34 = vector.broadcast %33 : vector<1x64xf32> to vector<256x64xf32>
      %35 = arith.addf %30, %34 : vector<256x64xf32>
      %cst_54 = arith.constant 0.000000e+00 : f32
      %36 = vector.broadcast %cst_54 : f32 to vector<256x64xf32>
      %37 = arith.maximumf %35, %36 : vector<256x64xf32>
      %38 = arith.index_cast %15 : i32 to index
      %c0_55 = arith.constant 0 : index
      %c0_56 = arith.constant 0 : index
      %39 = vector.load %arg4[%38, %c0_55, %c0_56] : memref<34x1x64xf32, #tpu.memory_space<vmem>>, vector<1x1x64xf32>
      %40 = vector.shape_cast %39 : vector<1x1x64xf32> to vector<1x64xf32>
      %cst_57 = arith.constant 0.000000e+00 : f32
      %41 = vector.broadcast %cst_57 : f32 to vector<256x64xf32>
      %42 = arith.minimumf %35, %41 : vector<256x64xf32>
      %43 = vector.broadcast %40 : vector<1x64xf32> to vector<256x64xf32>
      %44 = arith.mulf %43, %42 : vector<256x64xf32>
      %45 = arith.addf %37, %44 : vector<256x64xf32>
      %46 = vector.shape_cast %45 : vector<256x64xf32> to vector<16x16x64xf32>
      %47 = arith.truncf %46 : vector<16x16x64xf32> to vector<16x16x64xbf16>
      %c1_58 = arith.constant 1 : index
      %c8_59 = arith.constant 8 : index
      %c0_60 = arith.constant 0 : index
      %48 = vector.load %arg6[%c1_58, %c8_59, %c0_60] : memref<18x32x64xbf16, #tpu.memory_space<vmem>>, vector<16x16x64xbf16>
      tpu.vector_store %arg6[%c1_58, %c8_59, %c0_60], %47 {strides = array<i32>} : memref<18x32x64xbf16, #tpu.memory_space<vmem>>, vector<16x16x64xbf16>,
    }
    %c34_i32_15 = arith.constant 34 : i32
    %c1_16 = arith.constant 1 : index
    %c8_17 = arith.constant 8 : index
    %c0_18 = arith.constant 0 : index
    %10 = vector.load %arg6[%c1_16, %c8_17, %c0_18] : memref<18x32x64xbf16, #tpu.memory_space<vmem>>, vector<16x16x64xbf16>
    %c0_19 = arith.constant 0 : index
    %c0_20 = arith.constant 0 : index
    %c0_21 = arith.constant 0 : index
    %c0_22 = arith.constant 0 : index
    %11 = vector.load %arg5[%c0_19, %c0_20, %c0_21, %c0_22] : memref<1x16x16x64xbf16, #tpu.memory_space<vmem>>, vector<1x16x16x64xbf16>
    %12 = vector.shape_cast %11 : vector<1x16x16x64xbf16> to vector<16x16x64xbf16>
    %13 = vector.shape_cast %10 : vector<16x16x64xbf16> to vector<1x16x16x64xbf16>
    tpu.vector_store %arg5[%c0_19, %c0_20, %c0_21, %c0_22], %13 {strides = array<i32>} : memref<1x16x16x64xbf16, #tpu.memory_space<vmem>>, vector<1x16x16x64xbf16>,
    return
  }
  func.func @transform_0(%arg0: i32) -> (i32, i32, i32, i32) {
    %c0_i32 = arith.constant 0 : i32
    %c0_i32_0 = arith.constant 0 : i32
    %c0_i32_1 = arith.constant 0 : i32
    %c0_i32_2 = arith.constant 0 : i32
    return %arg0, %c0_i32, %c0_i32_0, %c0_i32_1 : i32, i32, i32, i32
  }
  func.func @transform_1(%arg0: i32) -> (i32, i32, i32) {
    %c0_i32 = arith.constant 0 : i32
    %c0_i32_0 = arith.constant 0 : i32
    %c0_i32_1 = arith.constant 0 : i32
    %c0_i32_2 = arith.constant 0 : i32
    return %c0_i32, %c0_i32_0, %c0_i32_1 : i32, i32, i32
  }
  func.func @transform_2(%arg0: i32) -> (i32, i32, i32) {
    %c0_i32 = arith.constant 0 : i32
    %c0_i32_0 = arith.constant 0 : i32
    %c0_i32_1 = arith.constant 0 : i32
    %c0_i32_2 = arith.constant 0 : i32
    return %c0_i32, %c0_i32_0, %c0_i32_1 : i32, i32, i32
  }
  func.func @transform_3(%arg0: i32) -> (i32, i32, i32) {
    %c0_i32 = arith.constant 0 : i32
    %c0_i32_0 = arith.constant 0 : i32
    %c0_i32_1 = arith.constant 0 : i32
    %c0_i32_2 = arith.constant 0 : i32
    return %c0_i32, %c0_i32_0, %c0_i32_1 : i32, i32, i32
  }
  func.func @transform_4(%arg0: i32) -> (i32, i32, i32, i32) {
    %c0_i32 = arith.constant 0 : i32
    %c0_i32_0 = arith.constant 0 : i32
    %c0_i32_1 = arith.constant 0 : i32
    %c0_i32_2 = arith.constant 0 : i32
    return %arg0, %c0_i32, %c0_i32_0, %c0_i32_1 : i32, i32, i32, i32
  }
}

</mosaic_0001>

<bundles_post_ra>
// kernel: srvgg_denoise_forward.1
= control target key start
LH: loop header
LB: loop body
LE: loop exit
PB: predicated region body
PF: predicated region fallthrough
CT: control target
= control target key end

     0   :  { %s5094_s15 = smov 0   ;;  %s7268_s0 = inlined_call_operand.vmem [shape: bf16[2,16,16,64], index: 0, kind: input, shape index: {}]   ;;  %s7269_s1 = inlined_call_operand.vmem [shape: bf16[34,576,64], index: 1, kind: input, shape index: {}]   ;;  %s7270_s2 = inlined_call_operand.vmem [shape: f32[34,1,64], index: 2, kind: input, shape index: {}]   ;;  %s7271_s3 = inlined_call_operand.vmem [shape: f32[34,1,64], index: 3, kind: input, shape index: {}]   ;;  %s7272_s4 = inlined_call_operand.vmem [shape: bf16[2,16,16,64], index: 4, kind: output, shape index: {}]  }
   0x1 LB: > { %s4554_s16 = sadd.s32 4294967295, %s5061_s15   ;;  %p4558_p0 = scmp.ge.s32.totalorder %s5061_s15, 1  ;;  %s5061_s15 = sphi %s5094_s15, %s14_s15  }
   0x2   : > { %p162_p1 = scmp.lt.s32.totalorder %s5061_s15, 3 }
   0x4   : > { %p163_p2 = pnand %p4558_p0, %p162_p1 }
   0x5   : > { %p188_p3 = scmp.lt.s32.totalorder (!%p163_p2), %s4554_s16, 1  ;;  %s5227_s24 = smov (!%p163_p2), 0  }
   0x6   : > { %166 = sbr.rel (%p163_p2) target bundleno = 772 (0x304), region = 36 }
   0xb   : > { %vm199_vm0 = vcmask 519168   ;;  %v5067_v0 = vmov 0   ;;  %s7468_s16 = smov (!%p188_p3, %s4554_s16), 1 }
   0xc   : > { %200 = vst.msk [vmem:[#allocation2] sm:$0xf] %vm199_vm0, %v5067_v0  ;;  %s4726_s17 = sshll.u32 %s7468_s16, 7 }
   0xd   : > { %201 = vst.msk [vmem:[#allocation2 + $0x4] sm:$0xf] %vm199_vm0, %v5067_v0  ;;  %s5115_s20 = scalar_lea.vmem %s7272_s4, %s4726_s17  ;;  %s5156_s23 = scalar_lea.vmem %s7268_s0, %s4726_s17 }
   0xe   : > { %202 = vst.msk [vmem:[#allocation2 + $0x8] sm:$0xf] %vm199_vm0, %v5067_v0  ;;  %v245_v1 = vld [vmem:[%s5156_s23] sm:$0xf]  ;;  %v246_v2 = vld [vmem:[%s5156_s23 + $0x4] sm:$0xf] }
   0xf   : > { %203 = vst.msk [vmem:[#allocation2 + $0xc] sm:$0xf] %vm199_vm0, %v5067_v0  ;;  %v247_v3 = vld [vmem:[%s5156_s23 + $0x8] sm:$0xf]  ;;  %v248_v4 = vld [vmem:[%s5156_s23 + $0xc] sm:$0xf] }
  0x10   : > { %205 = vst.msk [vmem:[#allocation2 + $0x110] sm:$0xf] %vm199_vm0, %v5067_v0  ;;  %v249_v5 = vld [vmem:[%s5156_s23 + $0x10] sm:$0xf]  ;;  %v250_v6 = vld [vmem:[%s5156_s23 + $0x14] sm:$0xf] }
  0x11   : > { %206 = vst.msk [vmem:[#allocation2 + $0x114] sm:$0xf] %vm199_vm0, %v5067_v0  ;;  %v251_v7 = vld [vmem:[%s5156_s23 + $0x18] sm:$0xf]  ;;  %v252_v8 = vld [vmem:[%s5156_s23 + $0x1c] sm:$0xf] }
  0x12   : > { %207 = vst.msk [vmem:[#allocation2 + $0x118] sm:$0xf] %vm199_vm0, %v5067_v0  ;;  %v253_v9 = vld [vmem:[%s5156_s23 + $0x20] sm:$0xf]  ;;  %v254_v10 = vld [vmem:[%s5156_s23 + $0x24] sm:$0xf] }
  0x13   : > { %208 = vst.msk [vmem:[#allocation2 + $0x11c] sm:$0xf] %vm199_vm0, %v5067_v0  ;;  %v255_v11 = vld [vmem:[%s5156_s23 + $0x28] sm:$0xf]  ;;  %v256_v12 = vld [vmem:[%s5156_s23 + $0x2c] sm:$0xf] }
  0x14   : > { %209 = vst.msk [vmem:[#allocation2] sm:$0xf] %vm199_vm0, %v5067_v0  ;;  %v257_v13 = vld [vmem:[%s5156_s23 + $0x30] sm:$0xf]  ;;  %v258_v14 = vld [vmem:[%s5156_s23 + $0x34] sm:$0xf] }
  0x15   : > { %210 = vst.msk [vmem:[#allocation2 + $0x10] sm:$0xf] %vm199_vm0, %v5067_v0  ;;  %v259_v15 = vld [vmem:[%s5156_s23 + $0x38] sm:$0xf]  ;;  %v260_v16 = vld [vmem:[%s5156_s23 + $0x3c] sm:$0xf] }
  0x16   : > { %211 = vst.msk [vmem:[#allocation2 + $0x20] sm:$0xf] %vm199_vm0, %v5067_v0  ;;  %v261_v17 = vld [vmem:[%s5156_s23 + $0x40] sm:$0xf]  ;;  %v262_v18 = vld [vmem:[%s5156_s23 + $0x44] sm:$0xf] }
  0x17   : > { %212 = vst.msk [vmem:[#allocation2 + $0x30] sm:$0xf] %vm199_vm0, %v5067_v0  ;;  %v263_v19 = vld [vmem:[%s5156_s23 + $0x48] sm:$0xf]  ;;  %v264_v20 = vld [vmem:[%s5156_s23 + $0x4c] sm:$0xf] }
  0x18   : > { %213 = vst.msk [vmem:[#allocation2 + $0x40] sm:$0xf] %vm199_vm0, %v5067_v0  ;;  %v265_v21 = vld [vmem:[%s5156_s23 + $0x50] sm:$0xf]  ;;  %v266_v22 = vld [vmem:[%s5156_s23 + $0x54] sm:$0xf] }
  0x19   : > { %214 = vst.msk [vmem:[#allocation2 + $0x50] sm:$0xf] %vm199_vm0, %v5067_v0  ;;  %v267_v23 = vld [vmem:[%s5156_s23 + $0x58] sm:$0xf]  ;;  %v268_v24 = vld [vmem:[%s5156_s23 + $0x5c] sm:$0xf] }
  0x1a   : > { %215 = vst.msk [vmem:[#allocation2 + $0x60] sm:$0xf] %vm199_vm0, %v5067_v0  ;;  %v269_v25 = vld [vmem:[%s5156_s23 + $0x60] sm:$0xf]  ;;  %v270_v26 = vld [vmem:[%s5156_s23 + $0x64] sm:$0xf] }
  0x1b   : > { %216 = vst.msk [vmem:[#allocation2 + $0x70] sm:$0xf] %vm199_vm0, %v5067_v0  ;;  %v271_v27 = vld [vmem:[%s5156_s23 + $0x68] sm:$0xf]  ;;  %v272_v28 = vld [vmem:[%s5156_s23 + $0x6c] sm:$0xf] }
  0x1c   : > { %217 = vst.msk [vmem:[#allocation2 + $0x80] sm:$0xf] %vm199_vm0, %v5067_v0  ;;  %v273_v29 = vld [vmem:[%s5156_s23 + $0x70] sm:$0xf]  ;;  %v274_v30 = vld [vmem:[%s5156_s23 + $0x74] sm:$0xf] }
  0x1d   : > { %218 = vst.msk [vmem:[#allocation2 + $0x90] sm:$0xf] %vm199_vm0, %v5067_v0  ;;  %v275_v31 = vld [vmem:[%s5156_s23 + $0x78] sm:$0xf]  ;;  %v276_v32 = vld [vmem:[%s5156_s23 + $0x7c] sm:$0xf] }
  0x1e   : > { %219 = vst.msk [vmem:[#allocation2 + $0xa0] sm:$0xf] %vm199_vm0, %v5067_v0 }
  0x1f   : > { %220 = vst.msk [vmem:[#allocation2 + $0xb0] sm:$0xf] %vm199_vm0, %v5067_v0 }
  0x20   : > { %221 = vst.msk [vmem:[#allocation2 + $0xc0] sm:$0xf] %vm199_vm0, %v5067_v0 }
  0x21   : > { %222 = vst.msk [vmem:[#allocation2 + $0xd0] sm:$0xf] %vm199_vm0, %v5067_v0 }
  0x22   : > { %223 = vst.msk [vmem:[#allocation2 + $0xe0] sm:$0xf] %vm199_vm0, %v5067_v0 }
  0x23   : > { %224 = vst.msk [vmem:[#allocation2 + $0xf0] sm:$0xf] %vm199_vm0, %v5067_v0 }
  0x24   : > { %225 = vst.msk [vmem:[#allocation2 + $0x100] sm:$0xf] %vm199_vm0, %v5067_v0 }
  0x25   : > { %228 = vst.msk [vmem:[#allocation2 + $0x1c] sm:$0xf] %vm199_vm0, %v5067_v0 }
  0x26   : > { %229 = vst.msk [vmem:[#allocation2 + $0x2c] sm:$0xf] %vm199_vm0, %v5067_v0 }
  0x27   : > { %230 = vst.msk [vmem:[#allocation2 + $0x3c] sm:$0xf] %vm199_vm0, %v5067_v0 }
  0x28   : > { %231 = vst.msk [vmem:[#allocation2 + $0x4c] sm:$0xf] %vm199_vm0, %v5067_v0 }
  0x29   : > { %232 = vst.msk [vmem:[#allocation2 + $0x5c] sm:$0xf] %vm199_vm0, %v5067_v0 }
  0x2a   : > { %233 = vst.msk [vmem:[#allocation2 + $0x6c] sm:$0xf] %vm199_vm0, %v5067_v0 }
  0x2b   : > { %234 = vst.msk [vmem:[#allocation2 + $0x7c] sm:$0xf] %vm199_vm0, %v5067_v0 }
  0x2c   : > { %235 = vst.msk [vmem:[#allocation2 + $0x8c] sm:$0xf] %vm199_vm0, %v5067_v0 }
  0x2d   : > { %236 = vst.msk [vmem:[#allocation2 + $0x9c] sm:$0xf] %vm199_vm0, %v5067_v0 }
  0x2e   : > { %237 = vst.msk [vmem:[#allocation2 + $0xac] sm:$0xf] %vm199_vm0, %v5067_v0 }
  0x2f   : > { %238 = vst.msk [vmem:[#allocation2 + $0xbc] sm:$0xf] %vm199_vm0, %v5067_v0 }
  0x30   : > { %239 = vst.msk [vmem:[#allocation2 + $0xcc] sm:$0xf] %vm199_vm0, %v5067_v0 }
  0x31   : > { %240 = vst.msk [vmem:[#allocation2 + $0xdc] sm:$0xf] %vm199_vm0, %v5067_v0 }
  0x32   : > { %241 = vst.msk [vmem:[#allocation2 + $0xec] sm:$0xf] %vm199_vm0, %v5067_v0 }
  0x33   : > { %242 = vst.msk [vmem:[#allocation2 + $0xfc] sm:$0xf] %vm199_vm0, %v5067_v0 }
  0x34   : > { %243 = vst.msk [vmem:[#allocation2 + $0x10c] sm:$0xf] %vm199_vm0, %v5067_v0 }
  0x35   : > { %226 = vst.msk [vmem:[#allocation2 + $0x110] sm:$0xf] %vm199_vm0, %v5067_v0 }
  0x36   : > { %227 = vst.msk [vmem:[#allocation2 + $0xc] sm:$0xf] %vm199_vm0, %v5067_v0 }
  0x37   : > { %244 = vst.msk [vmem:[#allocation2 + $0x11c] sm:$0xf] %vm199_vm0, %v5067_v0 }
  0x38   : > { %278 = vst.msk [vmem:[#allocation2 + $0x14] sm:$0xf] %vm199_vm0, %v245_v1 }
  0x39   : > { %279 = vst.msk [vmem:[#allocation2 + $0x18] sm:$0xf] %vm199_vm0, %v246_v2 }
  0x3a   : > { %280 = vst.msk [vmem:[#allocation2 + $0x24] sm:$0xf] %vm199_vm0, %v247_v3 }
  0x3b   : > { %281 = vst.msk [vmem:[#allocation2 + $0x28] sm:$0xf] %vm199_vm0, %v248_v4 }
  0x3c   : > { %282 = vst.msk [vmem:[#allocation2 + $0x34] sm:$0xf] %vm199_vm0, %v249_v5 }
  0x3d   : > { %283 = vst.msk [vmem:[#allocation2 + $0x38] sm:$0xf] %vm199_vm0, %v250_v6 }
  0x3e   : > { %284 = vst.msk [vmem:[#allocation2 + $0x44] sm:$0xf] %vm199_vm0, %v251_v7 }
  0x3f   : > { %285 = vst.msk [vmem:[#allocation2 + $0x48] sm:$0xf] %vm199_vm0, %v252_v8 }
  0x40   : > { %286 = vst.msk [vmem:[#allocation2 + $0x54] sm:$0xf] %vm199_vm0, %v253_v9 }
  0x41   : > { %287 = vst.msk [vmem:[#allocation2 + $0x58] sm:$0xf] %vm199_vm0, %v254_v10 }
  0x42   : > { %288 = vst.msk [vmem:[#allocation2 + $0x64] sm:$0xf] %vm199_vm0, %v255_v11 }
  0x43   : > { %289 = vst.msk [vmem:[#allocation2 + $0x68] sm:$0xf] %vm199_vm0, %v256_v12 }
  0x44   : > { %290 = vst.msk [vmem:[#allocation2 + $0x74] sm:$0xf] %vm199_vm0, %v257_v13 }
  0x45   : > { %291 = vst.msk [vmem:[#allocation2 + $0x78] sm:$0xf] %vm199_vm0, %v258_v14 }
  0x46   : > { %292 = vst.msk [vmem:[#allocation2 + $0x84] sm:$0xf] %vm199_vm0, %v259_v15 }
  0x47   : > { %293 = vst.msk [vmem:[#allocation2 + $0x88] sm:$0xf] %vm199_vm0, %v260_v16 }
  0x48   : > { %294 = vst.msk [vmem:[#allocation2 + $0x94] sm:$0xf] %vm199_vm0, %v261_v17 }
  0x49   : > { %295 = vst.msk [vmem:[#allocation2 + $0x98] sm:$0xf] %vm199_vm0, %v262_v18 }
  0x4a   : > { %296 = vst.msk [vmem:[#allocation2 + $0xa4] sm:$0xf] %vm199_vm0, %v263_v19 }
  0x4b   : > { %297 = vst.msk [vmem:[#allocation2 + $0xa8] sm:$0xf] %vm199_vm0, %v264_v20 }
  0x4c   : > { %298 = vst.msk [vmem:[#allocation2 + $0xb4] sm:$0xf] %vm199_vm0, %v265_v21 }
  0x4d   : > { %299 = vst.msk [vmem:[#allocation2 + $0xb8] sm:$0xf] %vm199_vm0, %v266_v22 }
  0x4e   : > { %300 = vst.msk [vmem:[#allocation2 + $0xc4] sm:$0xf] %vm199_vm0, %v267_v23 }
  0x4f   : > { %301 = vst.msk [vmem:[#allocation2 + $0xc8] sm:$0xf] %vm199_vm0, %v268_v24 }
  0x50   : > { %302 = vst.msk [vmem:[#allocation2 + $0xd4] sm:$0xf] %vm199_vm0, %v269_v25 }
  0x51   : > { %303 = vst.msk [vmem:[#allocation2 + $0xd8] sm:$0xf] %vm199_vm0, %v270_v26 }
  0x52   : > { %304 = vst.msk [vmem:[#allocation2 + $0xe4] sm:$0xf] %vm199_vm0, %v271_v27 }
  0x53   : > { %305 = vst.msk [vmem:[#allocation2 + $0xe8] sm:$0xf] %vm199_vm0, %v272_v28 }
  0x54   : > { %306 = vst.msk [vmem:[#allocation2 + $0xf4] sm:$0xf] %vm199_vm0, %v273_v29 }
  0x55   : > { %307 = vst.msk [vmem:[#allocation2 + $0xf8] sm:$0xf] %vm199_vm0, %v274_v30 }
  0x56   : > { %308 = vst.msk [vmem:[#allocation2 + $0x104] sm:$0xf] %vm199_vm0, %v275_v31 }
  0x57   : > { %309 = vst.msk [vmem:[#allocation2 + $0x108] sm:$0xf] %vm199_vm0, %v276_v32 }
  0x58 LB: >> { %v5232_v33 = vld [vmem:[#allocation2 + $0x84] sm:$0xff]   ;;  %v5250_v43 = vld [vmem:[#allocation2 + $0x54] sm:$0xff]   ;;  %s5068_s25 = smov 64   ;;  %s4728_s26 = smul.u32 288, %s5065_s24  ;;  %v4813_v11 = vld [vmem:[#allocation2 + $0x10] sm:$0x8]  ;;  %s5065_s24 = sphi %s5227_s24, %s315_s24  }
  0x59   : >> { %7317 = vst [vmem:[#allocation3_spill] sm:$0xff] %v5232_v33  ;;  %v5234_v34 = vld [vmem:[#allocation2 + $0x80] sm:$0xf0]   ;;  %v5252_v44 = vld [vmem:[#allocation2 + $0x50] sm:$0xf0]   ;;  %v718_v51 = vshrl.u32 %v5232_v33, 16  ;;  %s5719_s6 = scalar_lea.vmem %s7270_s2, %s5065_s24  ;;  %s6120_s9 = scalar_lea.vmem %s7271_s3, %s5065_s24 }
  0x5a   : >> { %v5236_v35 = vld [vmem:[#allocation2 + $0x44] sm:$0xff]   ;;  %7321 = vst [vmem:[#allocation7_spill] sm:$0xff] %v5250_v43  ;;  %v5254_v45 = vld [vmem:[#allocation2 + $0x14] sm:$0xff]   ;;  %v721_v52 = vshll.u32 %v5232_v33, 16  ;;  %v694_v16 = vshrl.u32 %v5250_v43, 16  ;;  %v697_v17 = vshll.u32 %v5250_v43, 16  ;;  %s5375_s29 = scalar_lea.vmem %s7269_s1, %s4728_s26 }
  0x5b   : >> { %7318 = vst [vmem:[#allocation4_spill] sm:$0xff] %v5236_v35  ;;  %v5238_v36 = vld [vmem:[#allocation2 + $0x40] sm:$0xf0]   ;;  %v5256_v46 = vld [vmem:[#allocation2 + $0x10] sm:$0xf0]   ;;  %v686_v53 = vshrl.u32 %v5236_v35, 16 }
  0x5c   : >> { %v5240_v37 = vld [vmem:[#allocation2 + $0xc4] sm:$0xff]   ;;  %7322 = vst [vmem:[#allocation8_spill] sm:$0xff] %v5254_v45  ;;  %v689_v54 = vshll.u32 %v5236_v35, 16  ;;  %v720_v59 = vrot.slane %v718_v51, 4  ;;  %v723_v60 = vrot.slane %v721_v52, 5  ;;  %v5274_v5 = vld [vmem:[#allocation2 + $0x94] sm:$0xff]  }
  0x5d   : >> { %7319 = vst [vmem:[#allocation5_spill] sm:$0xff] %v5240_v37  ;;  %v5242_v38 = vld [vmem:[#allocation2 + $0xc0] sm:$0xf0]   ;;  %v750_v55 = vshrl.u32 %v5240_v37, 16  ;;  %v753_v56 = vshll.u32 %v5240_v37, 16  ;;  %v688_v61 = vrot.slane %v686_v53, 4  ;;  %v586_v12 = vunpack.c.h.b16 %v5274_v5 }
  0x5e   : >> { %v5246_v41 = vld [vmem:[#allocation2 + $0x4] sm:$0xff]   ;;  %v691_v62 = vrot.slane %v689_v54, 5  ;;  %v724_v0 = vor.u32 %v723_v60, %v720_v59  ;;  %7323 = vst [vmem:[#allocation9_spill] sm:$0xff] %v5274_v5  ;;  %v5276_v6 = vld [vmem:[#allocation2 + $0x90] sm:$0xf0]   ;;  %v662_v20 = vshrl.u32 %v5254_v45, 16 }
  0x5f   : >> { %7320 = vst [vmem:[#allocation6_spill] sm:$0xff] %v5246_v41  ;;  %v5248_v42 = vld [vmem:[#allocation2] sm:$0xf0]   ;;  %v654_v57 = vshrl.u32 %v5246_v41, 16  ;;  %v657_v58 = vshll.u32 %v5246_v41, 16  ;;  %v752_v63 = vrot.slane %v750_v55, 4 }
  0x60   : >> { %v692_v1 = vor.u32 %v691_v62, %v688_v61  ;;  %v755_v2 = vrot.slane %v753_v56, 5  ;;  %v5270_v3 = vld [vmem:[#allocation2 + $0x64] sm:$0xff]   ;;  %797 = vrot.lane.b32.xlu0 %v724_v0, %s5068_s25  ;;  %v5286_v13 = vld [vmem:[#allocation2 + $0xd4] sm:$0xff]   ;;  %v665_v21 = vshll.u32 %v5254_v45, 16  ;;  %v726_v23 = vshrl.u32 %v5274_v5, 16  ;;  %s315_s24 = sadd.s32 1, %s5065_s24  }
  0x61   : >> { %v5272_v4 = vld [vmem:[#allocation2 + $0x60] sm:$0xf0]   ;;  %v656_v7 = vrot.slane %v654_v57, 4  ;;  %v659_v8 = vrot.slane %v657_v58, 5  ;;  %7325 = vst [vmem:[#allocation11_spill] sm:$0xff] %v5286_v13  ;;  %v729_v24 = vshll.u32 %v5274_v5, 16  ;;  %v7341_v5 = vunpack.c.h.b16 %v5236_v35 }
  0x62   : >> { %789 = vrot.lane.b32.xlu1 %v692_v1, %s5068_s25  ;;  %v5280_v9 = vld [vmem:[#allocation2 + $0xe4] sm:$0xff]   ;;  %v5288_v14 = vld [vmem:[#allocation2 + $0xd0] sm:$0xf0]   ;;  %v756_v15 = vor.u32 %v755_v2, %v752_v63  ;;  %v696_v25 = vrot.slane %v694_v16, 4  ;;  %v699_v26 = vrot.slane %v697_v17, 5  ;;  %v728_v27 = vrot.slane %v726_v23, 4 }
  0x63   : >> { %7324 = vst [vmem:[#allocation10_spill] sm:$0xff] %v5280_v9  ;;  %v5282_v10 = vld [vmem:[#allocation2 + $0xe0] sm:$0xf0]   ;;  %v660_v18 = vor.u32 %v659_v8, %v656_v7  ;;  %v731_v28 = vrot.slane %v729_v24, 5  ;;  %v5298_v29 = vld [vmem:[#allocation2 + $0xb4] sm:$0xff]   ;;  %v664_v51 = vrot.slane %v662_v20, 4 }
  0x64   : >> { %v5300_v30 = vld [vmem:[#allocation2 + $0xb0] sm:$0xf0]   ;;  %v5302_v31 = vld [vmem:[#allocation2 + $0xa4] sm:$0xff]   ;;  %v667_v52 = vrot.slane %v665_v21, 5  ;;  %v758_v53 = vshrl.u32 %v5286_v13, 16  ;;  %v761_v54 = vshll.u32 %v5286_v13, 16  ;;  %v700_v60 = vor.u32 %v699_v26, %v696_v25 }
  0x65   : >> { %v5304_v32 = vld [vmem:[#allocation2 + $0xa0] sm:$0xf0]   ;;  %v702_v55 = vshrl.u32 %v5270_v3, 16  ;;  %v705_v56 = vshll.u32 %v5270_v3, 16  ;;  %v732_v57 = vor.u32 %v731_v28, %v728_v27  ;;  %v5312_v58 = vld [vmem:[#allocation2 + $0xf4] sm:$0xff]   ;;  %v766_v62 = vshrl.u32 %v5280_v9, 16 }
  0x66   : >> { %7326 = vst [vmem:[#allocation12_spill] sm:$0xff] %v5312_v58  ;;  %v5314_v59 = vld [vmem:[#allocation2 + $0xf0] sm:$0xf0]   ;;  %v760_v63 = vrot.slane %v758_v53, 4  ;;  %v763_v0 = vrot.slane %v761_v54, 5  ;;  %v668_v2 = vor.u32 %v667_v52, %v664_v51  ;;  %v769_v7 = vshll.u32 %v5280_v9, 16 }
  0x67   : >> { %799 = vrot.lane.b32.xlu2 %v732_v57, %s5068_s25  ;;  %v707_v16 = vrot.slane %v705_v56, 5  ;;  %v768_v17 = vrot.slane %v766_v62, 4  ;;  %v5322_v20 = vld [vmem:[#allocation2 + $0x34] sm:$0xff]   ;;  %v734_v24 = vshrl.u32 %v5302_v31, 16  ;;  %v737_v25 = vshll.u32 %v5302_v31, 16  ;;  %v5330_v26 = vld [vmem:[#allocation2 + $0x24] sm:$0xff]  }
  0x68   : >> { %805 = vrot.lane.b32.xlu0 %v756_v15, %s5068_s25  ;;  %v704_v15 = vrot.slane %v702_v55, 4  ;;  %v5324_v21 = vld [vmem:[#allocation2 + $0x30] sm:$0xf0]   ;;  %v771_v23 = vrot.slane %v769_v7, 5  ;;  %v5332_v27 = vld [vmem:[#allocation2 + $0x20] sm:$0xf0]  }
  0x69   : >> { %7327 = vst [vmem:[#allocation13_spill] sm:$0xff] %v5324_v21  ;;  %v742_v28 = vshrl.u32 %v5298_v29, 16  ;;  %v745_v51 = vshll.u32 %v5298_v29, 16  ;;  %v736_v52 = vrot.slane %v734_v24, 4  ;;  %v739_v53 = vrot.slane %v737_v25, 5  ;;  %v5341_v7 = vld [vmem:[#allocation2 + $0x14] sm:$0xff]  }
  0x6a   : >> { %781 = vrot.lane.b32.xlu1 %v660_v18, %s5068_s25  ;;  %v764_v18 = vor.u32 %v763_v0, %v760_v63  ;;  %v708_v56 = vor.u32 %v707_v16, %v704_v15  ;;  %v772_v57 = vor.u32 %v771_v23, %v768_v17  ;;  %v777_v62 = vshll.u32 %v5312_v58, 16  ;;  %v5343_v8 = vld [vmem:[#allocation2 + $0x10] sm:$0xf0]   ;;  %v5349_v17 = vld [vmem:[#allocation2 + $0x24] sm:$0xff]   ;;  %v4732_v50 = vld [vmem:[%s5375_s29 + $0x18] sm:$0xff]  ;;  %p312_p4 = scmp.ge.s32.totalorder %s315_s24, 34  }
  0x6b   : >> { %v744_v63 = vrot.slane %v742_v28, 4  ;;  %v747_v0 = vrot.slane %v745_v51, 5  ;;  %v673_v24 = vshll.u32 %v5330_v26, 16  ;;  %7328 = vst [vmem:[#allocation14_spill] sm:$0xff] %v5349_v17  ;;  %v5351_v23 = vld [vmem:[#allocation2 + $0x20] sm:$0xf0]  }
  0x6c   : >> { %v779_v16 = vrot.slane %v777_v62, 5  ;;  %7329 = vst [vmem:[#allocation15_spill] sm:$0xff] %v5351_v23  ;;  %v5353_v25 = vld [vmem:[#allocation2 + $0x74] sm:$0xff]   ;;  %v681_v54 = vshll.u32 %v5322_v20, 16  ;;  %vm861_vm1 = vcmask 1042432   ;;  %vm1806_vm2 = vcmask 523264  }
  0x6d   : >> { %v5355_v28 = vld [vmem:[#allocation2 + $0x70] sm:$0xf0]   ;;  %v748_v51 = vor.u32 %v747_v0, %v744_v63  ;;  %v710_v19 = vshrl.u32 %v5353_v25, 16  ;;  %v713_v63 = vshll.u32 %v5353_v25, 16  ;;  %vm2143_vm3 = vsmask.f32 4352 }
  0x6e   : >> { %v5429_v40 = vld [vmem:[#allocation2 + $0x54] sm:$0xff]   ;;  %v4749_v23 = vld [vmem:[%s5375_s29 + $0xa0] sm:$0xff] }
  0x6f   : >> { %807 = vrot.lane.b32.xlu2 %v764_v18, %s5068_s25  ;;  %v670_v18 = vshrl.u32 %v5330_v26, 16  ;;  %7337 = vst [vmem:[#allocation23_spill] sm:$0xff] %v5429_v40 }
  0x70   : >> { %791 = vrot.lane.b32.xlu0 %v700_v60, %s5068_s25  ;;  %v774_v60 = vshrl.u32 %v5312_v58, 16 }
  0x72   : >> { %783 = vrot.lane.b32.xlu1 %v668_v2, %s5068_s25  ;;  %v740_v2 = vor.u32 %v739_v53, %v736_v52  ;;  %v776_v15 = vrot.slane %v774_v60, 4  ;;  %v960_v52 = vunpack.c.h.b16 %v5341_v7  ;;  %v675_v60 = vrot.slane %v673_v24, 5  ;;  %v428_v53 = vld [vmem:[#allocation2 + $0x1c] sm:$0x1] }
  0x73   : >> { %v712_v24 = vrot.slane %v710_v19, 4  ;;  %v1262_v61 = vunpack.c.l.b16 %v428_v53 }
  0x74   : >> { %v780_v62 = vor.u32 %v779_v16, %v776_v15  ;;  %v715_v15 = vrot.slane %v713_v63, 5  ;;  %v4736_v63 = vld [vmem:[%s5375_s29 + $0x38] sm:$0xff] }
  0x75   : >> { %v1278_v53 = vpack.c.b16 %v1262_v61, %v1262_v61  ;;  %4765 = vmatpush.bf16.msra.mxu1 %v4736_v63  ;;  %4766 = vmatpush.bf16.msra.mxu2 %v4736_v63 }
  0x76   : >> { %v716_v19 = vor.u32 %v715_v15, %v712_v24  ;;  %3784 = vmatpush.bf16.msra.mxu0 %v4736_v63  ;;  %v4814_v24 = vor.u32 %v5343_v8, %v4813_v11  ;;  %4767 = vmatpush.bf16.msra.mxu3 %v4736_v63  ;;  %v5396_v11 = vld [vmem:[#allocation2 + $0x34] sm:$0xff]   ;;  %v4817_v63 = vld [vmem:[#allocation2 + $0x20] sm:$0x8] }
  0x77   : >> { %801 = vrot.lane.b32.xlu2 %v740_v2, %s5068_s25  ;;  %v683_v2 = vrot.slane %v681_v54, 5  ;;  %v5377_v54 = vld [vmem:[#allocation2 + $0x24] sm:$0xff]   ;;  %v1295_v15 = vrot.slane %v1278_v53, 5  ;;  %7333 = vst [vmem:[#allocation19_spill] sm:$0xff] %v5396_v11  ;;  %v5398_v8 = vld [vmem:[#allocation2 + $0x30] sm:$0xf0]  }
  0x78   : >> { %809 = vrot.lane.b32.xlu0 %v772_v57, %s5068_s25  ;;  %v672_v57 = vrot.slane %v670_v18, 4  ;;  %v1294_v18 = vrot.slane %v5341_v7, 5  ;;  %7330 = vst [vmem:[#allocation16_spill] sm:$0xff] %v5377_v54 }
  0x79   : >> { %7334 = vst [vmem:[#allocation20_spill] sm:$0xff] %v5398_v8 }
  0x7a   : >> { %793 = vrot.lane.b32.xlu1 %v708_v56, %s5068_s25  ;;  %v678_v56 = vshrl.u32 %v5322_v20, 16  ;;  %v676_v55 = vor.u32 %v675_v60, %v672_v57  ;;  %v1551_v57 = vshrl.u32 %v5349_v17, 16  ;;  %v1554_v60 = vshll.u32 %v5349_v17, 16 }
  0x7b   : >> { %v1296_v61 = vsel %vm861_vm1, %v1294_v18, %v1295_v15  ;;  %v430_v15 = vld [vmem:[#allocation2 + $0x3c] sm:$0x1] }
  0x7c   : >> { %v680_v0 = vrot.slane %v678_v56, 4  ;;  %v1553_v56 = vrot.slane %v1551_v57, 4  ;;  %v4735_v57 = vld [vmem:[%s5375_s29 + $0x30] sm:$0xff] }
  0x7d   : >> { %4768 = vmatpush.bf16.msra.mxu1 %v4735_v57  ;;  %4769 = vmatpush.bf16.msra.mxu2 %v4735_v57 }
  0x7e   : >> { %v684_v16 = vor.u32 %v683_v2, %v680_v0  ;;  %v963_v0 = vunpack.c.h.b16 %v5377_v54  ;;  %3785 = vmatpush.bf16.msra.mxu0 %v4735_v57  ;;  %4770 = vmatpush.bf16.msra.mxu3 %v4735_v57  ;;  %v1562_v57 = vshll.u32 %v5396_v11, 16 }
  0x7f   : >> { %785 = vrot.lane.b32.xlu2 %v676_v55, %s5068_s25  ;;  %v429_v55 = vld [vmem:[#allocation2 + $0x2c] sm:$0x1] }
  0x80   : >> { %803 = vrot.lane.b32.xlu0 %v748_v51, %s5068_s25  ;;  %v5379_v51 = vld [vmem:[#allocation2 + $0x20] sm:$0xf0]   ;;  %v1263_v2 = vunpack.c.l.b16 %v429_v55  ;;  %v1564_v49 = vrot.slane %v1562_v57, 5  ;;  %v1009_v48 = vpack.c.b16 %v963_v0, %v963_v0 }
  0x81   : >> { %v4818_v22 = vor.u32 %v5379_v51, %v4817_v63  ;;  %v5426_v57 = vld [vmem:[#allocation2 + $0x44] sm:$0xff]  }
  0x82   : >> { %811 = vrot.lane.b32.xlu1 %v780_v62, %s5068_s25  ;;  %v1556_v62 = vrot.slane %v1554_v60, 5  ;;  %v1297_v60 = vrot.slane %v5377_v54, 5  ;;  %7336 = vst [vmem:[#allocation22_spill] sm:$0xff] %v5426_v57  ;;  %v5033_v51 = vld [vmem:[#allocation2 + $0x40] sm:$0xf0]  }
  0x84   : >> { %v1557_v1 = vor.u32 %v1556_v62, %v1553_v56  ;;  %v5394_v56 = vld [vmem:[#allocation2 + $0x40] sm:$0xf0]   ;;  %v1559_v62 = vshrl.u32 %v5396_v11, 16  ;;  %v7348_v11 = vunpack.c.h.b16 %v5250_v43  ;;  %v4743_v43 = vld [vmem:[%s5375_s29 + $0x70] sm:$0xff] }
  0x85   : >> { %7332 = vst [vmem:[#allocation18_spill] sm:$0xff] %v5394_v56  ;;  %v7345_v56 = vunpack.c.h.b16 %v5286_v13 }
  0x87   : >> { %795 = vrot.lane.b32.xlu2 %v716_v19, %s5068_s25  ;;  %v5392_v19 = vld [vmem:[#allocation2 + $0x44] sm:$0xff]  }
  0x88   : >> { %787 = vrot.lane.b32.xlu0 %v684_v16, %s5068_s25  ;;  %v1279_v16 = vpack.c.b16 %v1263_v2, %v1263_v2  ;;  %7331 = vst [vmem:[#allocation17_spill] sm:$0xff] %v5392_v19  ;;  %v5405_v2 = vld [vmem:[#allocation2 + $0x34] sm:$0xff]  }
  0x89   : >> { %7335 = vst [vmem:[#allocation21_spill] sm:$0xff] %v5405_v2  ;;  %v1300_v0 = vrot.slane %v5405_v2, 5 }
  0x8a   : >> { %1342 = vrot.lane.b32.xlu1 %v1294_v18, %s5068_s25  ;;  %v1298_v55 = vrot.slane %v1279_v16, 5  ;;  %v4733_v16 = vld [vmem:[%s5375_s29 + $0x20] sm:$0xff]  ;;  %v1264_v18 = vunpack.c.l.b16 %v430_v15 }
  0x8c   : >> { %v1299_v53 = vsel %vm861_vm1, %v1297_v60, %v1298_v55  ;;  %v966_v55 = vunpack.c.h.b16 %v5405_v2  ;;  %v1280_v47 = vpack.c.b16 %v1264_v18, %v1264_v18  ;;  %v5431_v18 = vld [vmem:[#allocation2 + $0x50] sm:$0xf0]   ;;  %v5522_v2 = vld [vmem:[#allocation2 + $0x10] sm:$0x8] }
  0x8d   : >> { %7338 = vst [vmem:[#allocation24_spill] sm:$0xff] %v5431_v18  ;;  %v433_v18 = vld [vmem:[#allocation2 + $0x6c] sm:$0x1] }
  0x8e   : >> { %v1301_v63 = vrot.slane %v1280_v47, 5  ;;  %v1011_v47 = vpack.c.b16 %v966_v55, %v966_v55 }
  0x8f   : >> { %1344 = vrot.lane.b32.xlu2 %v1296_v61, %s5068_s25  ;;  %v1007_v61 = vpack.c.b16 %v960_v52, %v960_v52  ;;  %v1561_v52 = vrot.slane %v1559_v62, 4 }
  0x90   : >> { %1678 = vrot.lane.b32.xlu0 %v1557_v1, %s5068_s25  ;;  %v4734_v1 = vld [vmem:[%s5375_s29 + $0x28] sm:$0xff] }
  0x91   : >> { %4771 = vmatpush.bf16.msra.mxu1 %v4734_v1  ;;  %4772 = vmatpush.bf16.msra.mxu2 %v4734_v1  ;;  %v1565_v15 = vor.u32 %v1564_v49, %v1561_v52  ;;  %v1575_v52 = vshrl.u32 %v5429_v40, 16 }
  0x92   : >> { %1038 = vrot.lane.b32.xlu1 %v4814_v24, %s5068_s25  ;;  %v5407_v24 = vld [vmem:[#allocation2 + $0x30] sm:$0xf0]   ;;  %3786 = vmatpush.bf16.msra.mxu0 %v4734_v1 }
  0x93   : >> { %4773 = vmatpush.bf16.msra.mxu3 %v4734_v1  ;;  %v4731_v1 = vld [vmem:[%s5375_s29 + $0x10] sm:$0xff] }
  0x95   : >> { %4774 = vmatpush.bf16.msra.mxu1 %v4733_v16  ;;  %4775 = vmatpush.bf16.msra.mxu2 %v4733_v16 }
  0x96   : >> { %3787 = vmatpush.bf16.msra.mxu0 %v4733_v16 }
  0x97   : >> { %1040 = vrot.lane.b32.xlu2 %v1007_v61, %s5068_s25  ;;  %4776 = vmatpush.bf16.msra.mxu3 %v4733_v16  ;;  %v1302_v16 = vsel %vm861_vm1, %v1300_v0, %v1301_v63 }
  0x98   : >> { %1346 = vrot.lane.b32.xlu0 %v1297_v60, %s5068_s25  ;;  %v1567_v60 = vshrl.u32 %v5392_v19, 16 }
  0x99   : >> { %4777 = vmatpush.bf16.msra.mxu1 %v4732_v50  ;;  %4778 = vmatpush.bf16.msra.mxu2 %v4732_v50 }
  0x9a   : >> { %1348 = vrot.lane.b32.xlu1 %v1299_v53, %s5068_s25  ;;  %v1570_v53 = vshll.u32 %v5392_v19, 16  ;;  %3788 = vmatpush.bf16.msra.mxu0 %v4732_v50  ;;  %v1569_v62 = vrot.slane %v1567_v60, 4  ;;  %v1578_v60 = vshll.u32 %v5429_v40, 16  ;;  %v4853_v40 = vld [vmem:[#allocation2 + $0xd0] sm:$0x8] }
  0x9b   : >> { %4779 = vmatpush.bf16.msra.mxu3 %v4732_v50  ;;  %v1303_v50 = vrot.slane %v5426_v57, 5 }
  0x9c   : >> { %v1572_v61 = vrot.slane %v1570_v53, 5  ;;  %v4821_v53 = vld [vmem:[#allocation2 + $0x40] sm:$0x8] }
  0x9d   : >> { %4780 = vmatpush.bf16.msra.mxu1 %v4731_v1  ;;  %4781 = vmatpush.bf16.msra.mxu2 %v4731_v1 }
  0x9e   : >> { %3789 = vmatpush.bf16.msra.mxu0 %v4731_v1  ;;  %v1573_v49 = vor.u32 %v1572_v61, %v1569_v62  ;;  %v5445_v62 = vld [vmem:[#allocation2 + $0x54] sm:$0xff]  }
  0x9f   : >> { %1680 = vrot.lane.b32.xlu2 %v1565_v15, %s5068_s25  ;;  %4782 = vmatpush.bf16.msra.mxu3 %v4731_v1  ;;  %v1577_v1 = vrot.slane %v1575_v52, 4  ;;  %v1580_v15 = vrot.slane %v1578_v60, 5  ;;  %7339 = vst [vmem:[#allocation25_spill] sm:$0xff] %v5445_v62  ;;  %v5447_v61 = vld [vmem:[#allocation2 + $0x50] sm:$0xf0]   ;;  %v972_v55 = vunpack.c.h.b16 %v5445_v62  ;;  %v4729_v60 = vld [vmem:[%s5375_s29] sm:$0xff] }
  0xa0   : >> { %1042 = vrot.lane.b32.xlu0 %v4818_v22, %s5068_s25  ;;  %v4822_v22 = vor.u32 %v5033_v51, %v4821_v53  ;;  %v1306_v39 = vrot.slane %v5445_v62, 5  ;;  %v5457_v51 = vld [vmem:[#allocation2 + $0x80] sm:$0x8] }
  0xa2   : >> { %1044 = vrot.lane.b32.xlu1 %v1009_v48, %s5068_s25  ;;  %v4825_v48 = vld [vmem:[#allocation2 + $0x30] sm:$0x8] }
  0xa3   : >> { %v4826_v52 = vor.u32 %v5407_v24, %v4825_v48  ;;  %v5460_v24 = vld [vmem:[#allocation2 + $0x40] sm:$0x8]  ;;  %v431_v48 = vld [vmem:[#allocation2 + $0x4c] sm:$0x1] }
  0xa7   : >> { %1350 = vrot.lane.b32.xlu2 %v1300_v0, %s5068_s25  ;;  %v432_v0 = vld [vmem:[#allocation2 + $0x5c] sm:$0x1] }
  0xa8   : >> { %1352 = vrot.lane.b32.xlu0 %v1302_v16, %s5068_s25  ;;  %v1266_v63 = vunpack.c.l.b16 %v432_v0  ;;  %v1581_v16 = vor.u32 %v1580_v15, %v1577_v1  ;;  %v5462_v15 = vld [vmem:[#allocation2 + $0xc0] sm:$0x8]  ;;  %v4833_v0 = vld [vmem:[#allocation2 + $0x50] sm:$0x8] }
  0xaa   : >> { %1682 = vrot.lane.b32.xlu1 %v1573_v49, %s5068_s25  ;;  %v4730_v49 = vld [vmem:[%s5375_s29 + $0x8] sm:$0xff] }
  0xab   : >> { %4783 = vmatpush.bf16.msra.mxu1 %v4730_v49  ;;  %4784 = vmatpush.bf16.msra.mxu2 %v4730_v49 }
  0xac   : >> { %3790 = vmatpush.bf16.msra.mxu0 %v4730_v49  ;;  %4785 = vmatpush.bf16.msra.mxu3 %v4730_v49  ;;  %v4752_v49 = vld [vmem:[%s5375_s29 + $0xb8] sm:$0xff] }
  0xaf   : >> { %1046 = vrot.lane.b32.xlu2 %v4826_v52, %s5068_s25  ;;  %4786 = vmatpush.bf16.msra.mxu1 %v4729_v60  ;;  %v7340_v52 = vunpack.c.h.b16 %v5232_v33  ;;  %v5503_v33 = vld [vmem:[#allocation2 + $0x64] sm:$0xff]  }
  0xb0   : >> { %1048 = vrot.lane.b32.xlu0 %v1011_v47, %s5068_s25  ;;  %v1282_v47 = vpack.c.b16 %v1266_v63, %v1266_v63  ;;  %4787 = vmatpush.bf16.msra.mxu2 %v4729_v60 }
  0xb1   : >> { %3791 = vmatpush.bf16.msra.mxu0 %v4729_v60  ;;  %4788 = vmatpush.bf16.msra.mxu3 %v4729_v60  ;;  %v5473_v60 = vpack.c.b16 %v7340_v52, %v7340_v52  ;;  %v5484_v52 = vpack.c.b16 %v7341_v5, %v7341_v5 }
  0xb2   : >> { %1354 = vrot.lane.b32.xlu1 %v1303_v50, %s5068_s25  ;;  %v1307_v1 = vrot.slane %v1282_v47, 5  ;;  %v624_v47 = vpack.c.b16 %v586_v12, %v586_v12 }
  0xb4   : >> { %v1308_v53 = vsel %vm861_vm1, %v1306_v39, %v1307_v1  ;;  %v5475_v1 = vld [vmem:[#allocation2] sm:$0x8]  ;;  %3962 = vmatpush.bf16.msrb.mxu2 %v4752_v49 }
  0xb8   : >> { %1684 = vrot.lane.b32.xlu0 %v1581_v16, %s5068_s25  ;;  %v4837_v16 = vld [vmem:[#allocation2 + $0x90] sm:$0x8] }
  0xb9   : >> { %v4838_v12 = vor.u32 %v5276_v6, %v4837_v16  ;;  %v4744_v16 = vld [vmem:[%s5375_s29 + $0x78] sm:$0xff]  ;;  %v7343_v6 = vunpack.c.h.b16 %v5246_v41 }
  0xba   : >> { %1050 = vrot.lane.b32.xlu1 %v4822_v22, %s5068_s25  ;;  %v1265_v22 = vunpack.c.l.b16 %v431_v48  ;;  %3873 = vmatpush.bf16.msrb.mxu1 %v4744_v16  ;;  %v5526_v16 = vld [vmem:[#allocation2 + $0x74] sm:$0xff]  }
  0xbb   : >> { %7346 = vst [vmem:[#allocation26_spill] sm:$0xff] %v5526_v16 }
  0xbc   : >> { %v1281_v63 = vpack.c.b16 %v1265_v22, %v1265_v22  ;;  %v1015_v22 = vpack.c.b16 %v972_v55, %v972_v55 }
  0xbe   : >> { %v1304_v48 = vrot.slane %v1281_v63, 5  ;;  %v7342_v63 = vunpack.c.h.b16 %v5240_v37  ;;  %3874 = vmatpush.bf16.msrb.mxu1 %v4743_v43 }
  0xc0   : >> { %1358 = vrot.lane.b32.xlu0 %v1306_v39, %s5068_s25  ;;  %v5491_v49 = vpack.c.b16 %v7342_v63, %v7342_v63  ;;  %v1305_v39 = vsel %vm861_vm1, %v1303_v50, %v1304_v48  ;;  %v5505_v63 = vld [vmem:[#allocation2 + $0x60] sm:$0xf0]  }
  0xc1   : >> { %v800_v62 = vpop.permute.xlu2 %799  ;;  %1356 = vrot.lane.b32.xlu2 %v1305_v39, %s5068_s25  ;;  %v5510_v39 = vpack.c.b16 %v7343_v6, %v7343_v6  ;;  %v632_v6 = vpack.c.b16 %v7345_v56, %v7345_v56  ;;  %v4854_v56 = vor.u32 %v5288_v14, %v4853_v40 }
  0xc2   : >> { %1360 = vrot.lane.b32.xlu1 %v1308_v53, %s5068_s25  ;;  %v4834_v53 = vor.u32 %v5447_v61, %v4833_v0  ;;  %v5494_v61 = vld [vmem:[#allocation2 + $0x50] sm:$0x8]  ;;  %v1854_v5 = vsel %vm1806_vm2, %v4838_v12, %v800_v62  ;;  %v1856_v55 = vsel %vm1806_vm2, %v624_v47, %v800_v62  ;;  %v4760_v0 = vld [vmem:[%s5375_s29 + $0xf8] sm:$0xff]  ;;  %v975_v62 = vunpack.c.h.b16 %v5503_v33 }
  0xc3   : >> { %v2837_v50 = vshrl.u32 %v1854_v5, 16  ;;  %v2840_v48 = vshll.u32 %v1854_v5, 16  ;;  %v2844_v37 = vshrl.u32 %v1856_v55, 16  ;;  %v2847_v35 = vshll.u32 %v1856_v55, 16  ;;  %v4751_v12 = vld [vmem:[%s5375_s29 + $0xb0] sm:$0xff]  ;;  %4051 = vmatpush.bf16.msrb.mxu3 %v4760_v0 }
  0xc4   : >> { %v1267_v47 = vunpack.c.l.b16 %v433_v18  ;;  %v7344_v5 = vunpack.c.h.b16 %v5426_v57  ;;  %3963 = vmatpush.bf16.msrb.mxu2 %v4751_v12  ;;  %v5528_v57 = vld [vmem:[#allocation2 + $0x70] sm:$0xf0]  }
  0xc5   : >> { %v2839_v19 = vrot.slane %v2837_v50, 3  ;;  %v2846_v50 = vrot.slane %v2844_v37, 3  ;;  %v2849_v0 = vrot.slane %v2847_v35, 4  ;;  %7347 = vst [vmem:[#allocation27_spill] sm:$0xff] %v5528_v57 }
  0xc6   : >> { %v1013_v55 = vpack.c.b16 %v7344_v5, %v7344_v5  ;;  %v7292_v5 = vrot.slane %v5503_v33, 5 }
  0xc8   : >> { %1054 = vrot.lane.b32.xlu0 %v4834_v53, %s5068_s25  ;;  %v2842_v53 = vrot.slane %v2840_v48, 4  ;;  %v5535_v48 = vpack.c.b16 %v7348_v11, %v7348_v11 }
  0xc9   : >> { %v808_v12 = vpop.permute.xlu2 %807  ;;  %1052 = vrot.lane.b32.xlu2 %v1013_v55, %s5068_s25 }
  0xca   : >> { %1056 = vrot.lane.b32.xlu1 %v1015_v22, %s5068_s25  ;;  %v1283_v22 = vpack.c.b16 %v1267_v47, %v1267_v47  ;;  %v1874_v40 = vsel %vm1806_vm2, %v4854_v56, %v808_v12  ;;  %v1876_v14 = vsel %vm1806_vm2, %v632_v6, %v808_v12  ;;  %v2843_v11 = vor.u32 %v2842_v53, %v2839_v19  ;;  %v4759_v12 = vld [vmem:[%s5375_s29 + $0xf0] sm:$0xff] }
  0xcb   : >> { %v3148_v18 = vshll.u32 %v1874_v40, 16  ;;  %v3152_v47 = vshrl.u32 %v1876_v14, 16  ;;  %v3155_v57 = vshll.u32 %v1876_v14, 16  ;;  %v2850_v56 = vor.u32 %v2849_v0, %v2846_v50  ;;  %v4750_v0 = vld [vmem:[%s5375_s29 + $0xa8] sm:$0xff]  ;;  %4052 = vmatpush.bf16.msrb.mxu3 %v4759_v12 }
  0xcc   : >> { %v1310_v13 = vrot.slane %v1283_v22, 5  ;;  %v3145_v22 = vshrl.u32 %v1874_v40, 16  ;;  %v1591_v50 = vshrl.u32 %v5526_v16, 16  ;;  %3964 = vmatpush.bf16.msrb.mxu2 %v4750_v0 }
  0xcd   : >> { %v5556_v19 = vrot.slane %v3148_v18, 4  ;;  %v5558_v6 = vrot.slane %v3152_v47, 3  ;;  %v5560_v53 = vrot.slane %v3155_v57, 4  ;;  %v5565_v35 = vsel %vm2143_vm3, %v2843_v11, %v2850_v56 }
  0xce   : >> { %v1311_v37 = vsel %vm861_vm1, %v7292_v5, %v1310_v13  ;;  %v7349_v13 = vunpack.c.h.b16 %v5254_v45  ;;  %v5554_v5 = vrot.slane %v3145_v22, 3  ;;  %v1594_v18 = vshll.u32 %v5526_v16, 16 }
  0xcf   : >> { %v7350_v57 = vor.u32 %v5234_v34, %v5457_v51  ;;  %v7351_v11 = vor.u32 %v5238_v36, %v5460_v24  ;;  %v4758_v34 = vld [vmem:[%s5375_s29 + $0xe8] sm:$0xff]  ;;  %v5585_v36 = vld [vmem:[#allocation2 + $0xa0] sm:$0x8] }
  0xd0   : >> { %1364 = vrot.lane.b32.xlu0 %v1311_v37, %s5068_s25  ;;  %v5552_v55 = vpack.c.b16 %v7349_v13, %v7349_v13  ;;  %v4764_v37 = vld [vmem:[%s5375_s29 + $0x118] sm:$0xff]  ;;  %v1017_v13 = vpack.c.b16 %v975_v62, %v975_v62  ;;  %v4742_v51 = vld [vmem:[%s5375_s29 + $0x68] sm:$0xff]  ;;  %4053 = vmatpush.bf16.msrb.mxu3 %v4758_v34  ;;  %v1596_v0 = vrot.slane %v1594_v18, 5 }
  0xd1   : >> { %4144 = vmatpush.bf16.msrb.mxu0 %v4764_v37  ;;  %3875 = vmatpush.bf16.msrb.mxu1 %v4742_v51 }
  0xd2   : >> { %v798_v40 = vpop.permute.xlu0 %797  ;;  %3965 = vmatpush.bf16.msrb.mxu2 %v4749_v23  ;;  %v7355_v23 = vor.u32 %v5248_v42, %v5475_v1  ;;  %v802_v1 = vpop.permute.xlu2 %801 }
  0xd3   : >> { %v1849_v47 = vsel %vm1806_vm2, %v7350_v57, %v798_v40  ;;  %v1851_v22 = vsel %vm1806_vm2, %v5473_v60, %v798_v40 }
  0xd4   : >> { %v790_v14 = vpop.permute.xlu1 %789  ;;  %v2760_v8 = vshrl.u32 %v1849_v47, 16  ;;  %v2763_v16 = vshll.u32 %v1849_v47, 16  ;;  %v2767_v45 = vshrl.u32 %v1851_v22, 16  ;;  %v2770_v54 = vshll.u32 %v1851_v22, 16 }
  0xd5   : >> { %v1829_v56 = vsel %vm1806_vm2, %v7351_v11, %v790_v14  ;;  %v1831_v62 = vsel %vm1806_vm2, %v5484_v52, %v790_v14  ;;  %v5587_v14 = vld [vmem:[#allocation2 + $0x60] sm:$0x8] }
  0xd6   : >> { %v2452_v57 = vshrl.u32 %v1829_v56, 16  ;;  %v2455_v60 = vshll.u32 %v1829_v56, 16  ;;  %v2459_v40 = vshrl.u32 %v1831_v62, 16  ;;  %v2462_v41 = vshll.u32 %v1831_v62, 16 }
  0xd7   : >> { %v2762_v24 = vrot.slane %v2760_v8, 3  ;;  %v2765_v11 = vrot.slane %v2763_v16, 4  ;;  %v2769_v52 = vrot.slane %v2767_v45, 3  ;;  %v2772_v12 = vrot.slane %v2770_v54, 4 }
  0xd8   : >> { %v2454_v47 = vrot.slane %v2452_v57, 3  ;;  %v2457_v22 = vrot.slane %v2455_v60, 4  ;;  %v2461_v37 = vrot.slane %v2459_v40, 3  ;;  %v2464_v43 = vrot.slane %v2462_v41, 4  ;;  %1060 = vrot.lane.b32.xlu0 %v1017_v13, %s5068_s25 }
  0xd9   : >> { %v2766_v17 = vor.u32 %v2765_v11, %v2762_v24  ;;  %v2773_v21 = vor.u32 %v2772_v12, %v2769_v52  ;;  %v1593_v56 = vrot.slane %v1591_v50, 4  ;;  %v7352_v45 = vunpack.c.h.b16 %v5302_v31 }
  0xda   : >> { %v2458_v62 = vor.u32 %v2457_v22, %v2454_v47  ;;  %v2465_v8 = vor.u32 %v2464_v43, %v2461_v37  ;;  %v806_v16 = vpop.permute.xlu0 %805  ;;  %v7353_v60 = vunpack.c.h.b16 %v5270_v3  ;;  %v7354_v13 = vor.u32 %v5242_v38, %v5462_v15 }
  0xdb   : >> { %v626_v54 = vpack.c.b16 %v7352_v45, %v7352_v45  ;;  %v2774_v41 = vsel %vm2143_vm3, %v2766_v17, %v2773_v21  ;;  %v1597_v34 = vor.u32 %v1596_v0, %v1593_v56  ;;  %v1871_v18 = vsel %vm1806_vm2, %v5491_v49, %v806_v16 }
  0xdc   : >> { %v782_v57 = vpop.permute.xlu1 %781  ;;  %v5598_v40 = vpack.c.b16 %v7353_v60, %v7353_v60  ;;  %v1869_v50 = vsel %vm1806_vm2, %v7354_v13, %v806_v16  ;;  %3832 = vmatmul.bf16.vlgmr.msra.gmra.mxu2 %v2774_v41  ;;  %v3075_v11 = vshrl.u32 %v1871_v18, 16  ;;  %v3078_v52 = vshll.u32 %v1871_v18, 16  ;;  %v4757_v18 = vld [vmem:[%s5375_s29 + $0xe0] sm:$0xff] }
  0xdd   : >> { %v1809_v51 = vsel %vm1806_vm2, %v7355_v23, %v782_v57  ;;  %v1811_v21 = vsel %vm1806_vm2, %v5510_v39, %v782_v57  ;;  %v3068_v17 = vshrl.u32 %v1869_v50, 16  ;;  %v3071_v24 = vshll.u32 %v1869_v50, 16  ;;  %1688 = vrot.lane.b32.xlu1 %v1597_v34, %s5068_s25  ;;  %v4763_v23 = vld [vmem:[%s5375_s29 + $0x110] sm:$0xff]  ;;  %4054 = vmatpush.bf16.msrb.mxu3 %v4757_v18  ;;  %v4740_v18 = vld [vmem:[%s5375_s29 + $0x58] sm:$0xff] }
  0xde   : >> { %v2144_v38 = vshrl.u32 %v1809_v51, 16  ;;  %v2147_v15 = vshll.u32 %v1809_v51, 16  ;;  %v2151_v12 = vshrl.u32 %v1811_v21, 16  ;;  %v2154_v47 = vshll.u32 %v1811_v21, 16  ;;  %v4741_v51 = vld [vmem:[%s5375_s29 + $0x60] sm:$0xff]  ;;  %4145 = vmatpush.bf16.msrb.mxu0 %v4763_v23 }
  0xdf   : >> { %v3070_v49 = vrot.slane %v3068_v17, 3  ;;  %v3073_v22 = vrot.slane %v3071_v24, 4  ;;  %v3077_v37 = vrot.slane %v3075_v11, 3  ;;  %v3080_v42 = vrot.slane %v3078_v52, 4  ;;  %3876 = vmatpush.bf16.msrb.mxu1 %v4741_v51 }
  0xe0   : >> { %v2146_v39 = vrot.slane %v2144_v38, 3  ;;  %v2149_v43 = vrot.slane %v2147_v15, 4  ;;  %v2153_v56 = vrot.slane %v2151_v12, 3  ;;  %v2156_v0 = vrot.slane %v2154_v47, 4  ;;  %v4748_v38 = vld [vmem:[%s5375_s29 + $0x98] sm:$0xff] }
  0xe1   : >> { %v2466_v45 = vsel %vm2143_vm3, %v2458_v62, %v2465_v8  ;;  %v3074_v16 = vor.u32 %v3073_v22, %v3070_v49  ;;  %v3081_v57 = vor.u32 %v3080_v42, %v3077_v37  ;;  %v4866_v41 = vor.u32 %v5304_v32, %v5585_v36  ;;  %3966 = vmatpush.bf16.msrb.mxu2 %v4748_v38 }
  0xe2   : >> { %3812 = vmatmul.bf16.vlgmr.msra.gmra.mxu1 %v2466_v45  ;;  %v2150_v34 = vor.u32 %v2149_v43, %v2146_v39  ;;  %v2157_v60 = vor.u32 %v2156_v0, %v2153_v56  ;;  %v1861_v13 = vsel %vm1806_vm2, %v626_v54, %v802_v1  ;;  %v4870_v50 = vor.u32 %v5272_v4, %v5587_v14  ;;  %v792_v21 = vpop.permute.xlu0 %791 }
  0xe3   : >> { %v3082_v62 = vsel %vm2143_vm3, %v3074_v16, %v3081_v57  ;;  %v1859_v17 = vsel %vm1806_vm2, %v4866_v41, %v802_v1  ;;  %v2921_v24 = vshrl.u32 %v1861_v13, 16  ;;  %v2924_v32 = vshll.u32 %v1861_v13, 16  ;;  %v4756_v13 = vld [vmem:[%s5375_s29 + $0xd8] sm:$0xff]  ;;  %3877 = vmatpush.bf16.msrb.mxu1 %v4740_v18 }
  0xe4   : >> { %v784_v8 = vpop.permute.xlu1 %783  ;;  %v7356_v36 = vor.u32 %v5252_v44, %v5494_v61  ;;  %v1836_v11 = vsel %vm1806_vm2, %v5535_v48, %v792_v21  ;;  %v2158_v4 = vsel %vm2143_vm3, %v2150_v34, %v2157_v60  ;;  %3852 = vmatmul.bf16.vlgmr.msra.gmra.mxu3 %v3082_v62  ;;  %v7357_v14 = vor.u32 %v5256_v46, %v5522_v2 }
  0xe5   : >> { %v2536_v47 = vshrl.u32 %v1836_v11, 16  ;;  %v2539_v49 = vshll.u32 %v1836_v11, 16  ;;  %3792 = vmatmul.bf16.vlgmr.msra.gmra.mxu0 %v2158_v4  ;;  %v1816_v44 = vsel %vm1806_vm2, %v5552_v55, %v784_v8  ;;  %v2914_v22 = vshrl.u32 %v1859_v17, 16  ;;  %v5661_v4 = vld [vmem:[#allocation2 + $0x74] sm:$0xff]   ;;  %4055 = vmatpush.bf16.msrb.mxu3 %v4756_v13 }
  0xe6   : >> { %v1834_v54 = vsel %vm1806_vm2, %v7356_v36, %v792_v21  ;;  %v1814_v52 = vsel %vm1806_vm2, %v7357_v14, %v784_v8  ;;  %v2228_v43 = vshrl.u32 %v1816_v44, 16  ;;  %v2231_v56 = vshll.u32 %v1816_v44, 16  ;;  %v5651_v36 = vld [vmem:[#allocation2 + $0x64] sm:$0xff]   ;;  %v5663_v14 = vld [vmem:[#allocation2 + $0x70] sm:$0xf0]  }
  0xe7   : >> { %v2529_v15 = vshrl.u32 %v1834_v54, 16  ;;  %v2532_v12 = vshll.u32 %v1834_v54, 16  ;;  %v2221_v61 = vshrl.u32 %v1814_v52, 16  ;;  %v2224_v48 = vshll.u32 %v1814_v52, 16  ;;  %v4747_v44 = vld [vmem:[%s5375_s29 + $0x90] sm:$0xff] }
  0xe8   : >> { %v2538_v46 = vrot.slane %v2536_v47, 3  ;;  %v2541_v2 = vrot.slane %v2539_v49, 4  ;;  %v5638_v16 = vrot.slane %v2914_v22, 3  ;;  %v2917_v55 = vshll.u32 %v1859_v17, 16  ;;  %v5653_v17 = vld [vmem:[#allocation2 + $0x60] sm:$0xf0]   ;;  %v786_v22 = vpop.permute.xlu2 %785  ;;  %3967 = vmatpush.bf16.msrb.mxu2 %v4747_v44 }
  0xe9   : >> { %v2531_v37 = vrot.slane %v2529_v15, 3  ;;  %v2534_v42 = vrot.slane %v2532_v12, 4  ;;  %v2223_v1 = vrot.slane %v2221_v61, 3  ;;  %v2226_v39 = vrot.slane %v2224_v48, 4  ;;  %v4873_v15 = vld [vmem:[#allocation2 + $0xe0] sm:$0x8] }
  0xea   : >> { %v2542_v45 = vor.u32 %v2541_v2, %v2538_v46  ;;  %v2230_v57 = vrot.slane %v2228_v43, 3  ;;  %v2233_v41 = vrot.slane %v2231_v56, 4  ;;  %v5640_v34 = vrot.slane %v2921_v24, 3  ;;  %v4877_v12 = vld [vmem:[#allocation2 + $0x20] sm:$0x8]  ;;  %v810_v48 = vpop.permute.xlu0 %809 }
  0xeb   : >> { %v2535_v0 = vor.u32 %v2534_v42, %v2531_v37  ;;  %v5642_v60 = vrot.slane %v2924_v32, 4  ;;  %v5647_v51 = vrot.slane %v2917_v55, 4  ;;  %v2227_v62 = vor.u32 %v2226_v39, %v2223_v1 }
  0xec   : >> { %v794_v21 = vpop.permute.xlu1 %793  ;;  %v3151_v8 = vor.u32 %v5556_v19, %v5554_v5  ;;  %3837 = vmatmul.bf16.gmra.mxu2 %v5565_v35  ;;  %v2234_v54 = vor.u32 %v2233_v41, %v2230_v57  ;;  %v3158_v11 = vor.u32 %v5560_v53, %v5558_v6  ;;  %v978_v61 = vunpack.c.h.b16 %v5661_v4 }
  0xed   : >> { %v2543_v23 = vsel %vm2143_vm3, %v2535_v0, %v2542_v45  ;;  %v1839_v24 = vsel %vm1806_vm2, %v4870_v50, %v794_v21  ;;  %v1841_v32 = vsel %vm1806_vm2, %v5598_v40, %v794_v21  ;;  %v7358_v37 = vunpack.c.h.b16 %v5280_v9 }
  0xee   : >> { %v2606_v5 = vshrl.u32 %v1839_v24, 16  ;;  %v2609_v19 = vshll.u32 %v1839_v24, 16  ;;  %v2613_v52 = vshrl.u32 %v1841_v32, 16  ;;  %v2616_v38 = vshll.u32 %v1841_v32, 16  ;;  %v5684_v24 = vld [vmem:[#allocation2 + $0x84] sm:$0xff]   ;;  %v4739_v32 = vld [vmem:[%s5375_s29 + $0x50] sm:$0xff] }
  0xef   : >> { %v2235_v35 = vsel %vm2143_vm3, %v2227_v62, %v2234_v54  ;;  %v3159_v40 = vsel %vm2143_vm3, %v3151_v8, %v3158_v11  ;;  %v634_v42 = vpack.c.b16 %v7358_v37, %v7358_v37  ;;  %v7359_v46 = vunpack.c.h.b16 %v5330_v26  ;;  %3878 = vmatpush.bf16.msrb.mxu1 %v4739_v32 }
  0xf0   : >> { %v2608_v6 = vrot.slane %v2606_v5, 3  ;;  %v2611_v53 = vrot.slane %v2609_v19, 4  ;;  %v2615_v47 = vrot.slane %v2613_v52, 3  ;;  %v2618_v49 = vrot.slane %v2616_v38, 4  ;;  %v4881_v52 = vld [vmem:[#allocation2 + $0x70] sm:$0x8] }
  0xf1   : >> { %v610_v2 = vpack.c.b16 %v7359_v46, %v7359_v46  ;;  %v1583_v39 = vshrl.u32 %v5651_v36, 16  ;;  %v1586_v43 = vshll.u32 %v5651_v36, 16  ;;  %v4874_v56 = vor.u32 %v5282_v10, %v4873_v15  ;;  %v4755_v38 = vld [vmem:[%s5375_s29 + $0xd0] sm:$0xff]  ;;  %v4762_v15 = vld [vmem:[%s5375_s29 + $0x108] sm:$0xff] }
  0xf2   : >> { %v2612_v1 = vor.u32 %v2611_v53, %v2608_v6  ;;  %3817 = vmatmul.bf16.gmra.mxu1 %v2543_v23  ;;  %v1881_v0 = vsel %vm1806_vm2, %v634_v42, %v810_v48  ;;  %v4878_v45 = vor.u32 %v5332_v27, %v4877_v12  ;;  %v2619_v57 = vor.u32 %v2618_v49, %v2615_v47  ;;  %v5686_v27 = vld [vmem:[#allocation2 + $0x80] sm:$0xf0]   ;;  %v4885_v12 = vld [vmem:[#allocation2 + $0xb0] sm:$0x8] }
  0xf3   : >> { %v1821_v55 = vsel %vm1806_vm2, %v610_v2, %v786_v22  ;;  %v1585_v41 = vrot.slane %v1583_v39, 4  ;;  %v1588_v13 = vrot.slane %v1586_v43, 5  ;;  %v1312_v18 = vrot.slane %v5661_v4, 5  ;;  %v4889_v6 = vld [vmem:[#allocation2 + $0x70] sm:$0x8]  ;;  %4056 = vmatpush.bf16.msrb.mxu3 %v4755_v38  ;;  %4146 = vmatpush.bf16.msrb.mxu0 %v4762_v15 }
  0xf4   : >> { %3857 = vmatmul.bf16.gmra.mxu3 %v3159_v40  ;;  %v1879_v23 = vsel %vm1806_vm2, %v4874_v56, %v810_v48  ;;  %v3229_v62 = vshrl.u32 %v1881_v0, 16  ;;  %v3232_v8 = vshll.u32 %v1881_v0, 16  ;;  %v1819_v11 = vsel %vm1806_vm2, %v4878_v45, %v786_v22  ;;  %v4746_v48 = vld [vmem:[%s5375_s29 + $0x88] sm:$0xff]  ;;  %v4893_v46 = vld [vmem:[#allocation2 + $0xf0] sm:$0x8]  ;;  %v804_v56 = vpop.permute.xlu0 %803  ;;  %v796_v45 = vpop.permute.xlu2 %795 }
  0xf5   : >> { %3797 = vmatmul.bf16.gmra.mxu0 %v2235_v35  ;;  %v3222_v21 = vshrl.u32 %v1879_v23, 16  ;;  %v3225_v10 = vshll.u32 %v1879_v23, 16  ;;  %v1589_v54 = vor.u32 %v1588_v13, %v1585_v41  ;;  %1366 = vrot.lane.b32.xlu1 %v1312_v18, %s5068_s25  ;;  %v2305_v5 = vshrl.u32 %v1821_v55, 16  ;;  %v4921_v43 = vld [vmem:[#allocation2 + $0x40] sm:$0x8] }
  0xf6   : >> { %v2308_v19 = vshll.u32 %v1821_v55, 16  ;;  %v5700_v53 = vrot.slane %v3229_v62, 3  ;;  %v5702_v47 = vrot.slane %v3232_v8, 4  ;;  %v2298_v49 = vshrl.u32 %v1819_v11, 16  ;;  %3968 = vmatpush.bf16.msrb.mxu2 %v4746_v48  ;;  %v4738_v8 = vld [vmem:[%s5375_s29 + $0x48] sm:$0xff] }
  0xf7   : >> { %v5695_v35 = vrot.slane %v3222_v21, 3  ;;  %v5697_v40 = vrot.slane %v3225_v10, 4  ;;  %1686 = vrot.lane.b32.xlu2 %v1589_v54, %s5068_s25  ;;  %v2301_v44 = vshll.u32 %v1819_v11, 16  ;;  %v5705_v22 = vrot.slane %v2305_v5, 3  ;;  %3879 = vmatpush.bf16.msrb.mxu1 %v4738_v8 }
  0xf8   : >> { %v2920_v37 = vor.u32 %v5647_v51, %v5638_v16  ;;  %v2927_v42 = vor.u32 %v5642_v60, %v5640_v34  ;;  %v5711_v2 = vrot.slane %v2308_v19, 4  ;;  %v2620_v39 = vsel %vm2143_vm3, %v2612_v1, %v2619_v57 }
  0xf9   : >> { %v7360_v34 = vunpack.c.h.b16 %v5298_v29  ;;  %v4882_v51 = vor.u32 %v5663_v14, %v4881_v52  ;;  %v7361_v1 = vunpack.c.h.b16 %v5353_v25  ;;  %v4886_v55 = vor.u32 %v5300_v30, %v4885_v12 }
  0xfa   : >> { %v2928_v16 = vsel %vm2143_vm3, %v2920_v37, %v2927_v42  ;;  %v4890_v41 = vor.u32 %v5355_v28, %v4889_v6  ;;  %v7362_v13 = vunpack.c.h.b16 %v5312_v58  ;;  %v1599_v21 = vshrl.u32 %v5684_v24, 16  ;;  %v4754_v37 = vld [vmem:[%s5375_s29 + $0xc8] sm:$0xff] }
  0xfb   : >> { %v628_v60 = vpack.c.b16 %v7360_v34, %v7360_v34  ;;  %v620_v0 = vpack.c.b16 %v7361_v1, %v7361_v1  ;;  %v1602_v10 = vshll.u32 %v5684_v24, 16  ;;  %v1864_v30 = vsel %vm1806_vm2, %v4886_v55, %v804_v56  ;;  %4057 = vmatpush.bf16.msrb.mxu3 %v4754_v37  ;;  %v4745_v1 = vld [vmem:[%s5375_s29 + $0x80] sm:$0xff] }
  0xfc   : >> { %3842 = vmatmul.bf16.gmra.mxu2 %v2928_v16  ;;  %v636_v23 = vpack.c.b16 %v7362_v13, %v7362_v13  ;;  %v1844_v32 = vsel %vm1806_vm2, %v4890_v41, %v796_v45  ;;  %v4894_v54 = vor.u32 %v5314_v59, %v4893_v46  ;;  %v1601_v11 = vrot.slane %v1599_v21, 4  ;;  %v812_v16 = vpop.permute.xlu1 %811  ;;  %v5766_v41 = vld [vmem:[#allocation2 + $0x80] sm:$0xf0]   ;;  %v435_v13 = vld [vmem:[#allocation2 + $0x8c] sm:$0x1]  ;;  %v788_v21 = vpop.permute.xlu0 %787 }
  0xfd   : >> { %v1866_v57 = vsel %vm1806_vm2, %v628_v60, %v804_v56  ;;  %1062 = vrot.lane.b32.xlu1 %v4882_v51, %s5068_s25  ;;  %v1846_v28 = vsel %vm1806_vm2, %v620_v0, %v796_v45  ;;  %v1604_v5 = vrot.slane %v1602_v10, 5  ;;  %v7363_v19 = vrot.slane %v5503_v33, 5  ;;  %3969 = vmatpush.bf16.msrb.mxu2 %v4745_v1 }
  0xfe   : >> { %v2998_v14 = vshrl.u32 %v1866_v57, 16  ;;  %v3001_v62 = vshll.u32 %v1866_v57, 16  ;;  %v2991_v52 = vshrl.u32 %v1864_v30, 16  ;;  %v2994_v38 = vshll.u32 %v1864_v30, 16  ;;  %v5764_v57 = vld [vmem:[#allocation2 + $0x84] sm:$0xff]  }
  0xff   : >> { %1362 = vrot.lane.b32.xlu2 %v7363_v19, %s5068_s25  ;;  %v2300_v15 = vrot.slane %v2298_v49, 3  ;;  %v2303_v12 = vrot.slane %v2301_v44, 4  ;;  %v2683_v6 = vshrl.u32 %v1844_v32, 16  ;;  %v2686_v48 = vshll.u32 %v1844_v32, 16  ;;  %v4737_v44 = vld [vmem:[%s5375_s29 + $0x40] sm:$0xff] }
 0x100   : >> { %v1605_v42 = vor.u32 %v1604_v5, %v1601_v11  ;;  %v5747_v56 = vrot.slane %v2998_v14, 3  ;;  %v5749_v59 = vrot.slane %v3001_v62, 4  ;;  %v2690_v46 = vshrl.u32 %v1846_v28, 16  ;;  %v4897_v30 = vld [vmem:[#allocation2 + $0x60] sm:$0x8]  ;;  %3880 = vmatpush.bf16.msrb.mxu1 %v4737_v44 }
 0x101   : >> { %v5751_v34 = vrot.slane %v2991_v52, 3  ;;  %v5753_v60 = vrot.slane %v2994_v38, 4  ;;  %v2693_v51 = vshll.u32 %v1846_v28, 16  ;;  %v1884_v49 = vsel %vm1806_vm2, %v4894_v54, %v812_v16  ;;  %v4901_v11 = vld [vmem:[#allocation2 + $0x30] sm:$0x8] }
 0x102   : >> { %3822 = vmatmul.bf16.gmra.mxu1 %v2620_v39  ;;  %1690 = vrot.lane.b32.xlu0 %v1605_v42, %s5068_s25  ;;  %v5759_v39 = vrot.slane %v2683_v6, 3  ;;  %v5762_v0 = vsel %vm1806_vm2, %v636_v23, %v812_v16  ;;  %v3299_v45 = vshrl.u32 %v1884_v49, 16  ;;  %v3302_v55 = vshll.u32 %v1884_v49, 16  ;;  %v7365_v42 = vld [vmem:[#allocation13_spill] sm:$0xff] }
 0x103   : >> { %v2688_v10 = vrot.slane %v2686_v48, 4  ;;  %v2692_v14 = vrot.slane %v2690_v46, 3  ;;  %v2695_v62 = vrot.slane %v2693_v51, 4  ;;  %v2304_v8 = vor.u32 %v2303_v12, %v2300_v15  ;;  %v4761_v48 = vld [vmem:[%s5375_s29 + $0x100] sm:$0xff] }
 0x104   : >> { %v3306_v32 = vshrl.u32 %v5762_v0, 16  ;;  %v3309_v23 = vshll.u32 %v5762_v0, 16  ;;  %v2311_v28 = vor.u32 %v5711_v2, %v5705_v22  ;;  %v3228_v54 = vor.u32 %v5697_v40, %v5695_v35  ;;  %v4753_v2 = vld [vmem:[%s5375_s29 + $0xc0] sm:$0xff]  ;;  %4147 = vmatpush.bf16.msrb.mxu0 %v4761_v48 }
 0x105   : >> { %v5774_v5 = vrot.slane %v3299_v45, 3  ;;  %v5776_v19 = vrot.slane %v3302_v55, 4  ;;  %v3235_v52 = vor.u32 %v5702_v47, %v5700_v53  ;;  %v981_v15 = vunpack.c.h.b16 %v5764_v57  ;;  %4058 = vmatpush.bf16.msrb.mxu3 %v4753_v2 }
 0x106   : >> { %v2312_v38 = vsel %vm2143_vm3, %v2304_v8, %v2311_v28  ;;  %v1269_v12 = vunpack.c.l.b16 %v435_v13  ;;  %v7364_v22 = vunpack.c.h.b16 %v5322_v20  ;;  %v1119_v40 = vshrl.u32 %v5341_v7, 16  ;;  %v4905_v28 = vld [vmem:[#allocation2 + $0x80] sm:$0x8] }
 0x107   : >> { %3802 = vmatmul.bf16.gmra.mxu0 %v2312_v38  ;;  %v3236_v6 = vsel %vm2143_vm3, %v3228_v54, %v3235_v52  ;;  %v4898_v37 = vor.u32 %v5505_v63, %v4897_v30  ;;  %v1122_v47 = vshll.u32 %v5341_v7, 16  ;;  %v4902_v46 = vor.u32 %v7365_v42, %v4901_v11  ;;  %v1343_v63 = vpop.permute.xlu1 %1342  ;;  %v434_v54 = vld [vmem:[#allocation2 + $0x7c] sm:$0x1]  ;;  %v1679_v38 = vpop.permute.xlu0 %1678 }
 0x108   : >> { %v612_v35 = vpack.c.b16 %v7364_v22, %v7364_v22  ;;  %3862 = vmatmul.bf16.gmra.mxu3 %v3236_v6  ;;  %v1285_v53 = vpack.c.b16 %v1269_v12, %v1269_v12  ;;  %v1121_v51 = vrot.slane %v1119_v40, 4  ;;  %v2689_v49 = vor.u32 %v2688_v10, %v5759_v39 }
 0x109   : >> { %v1315_v44 = vrot.slane %v5764_v57, 5  ;;  %1058 = vrot.lane.b32.xlu2 %v4898_v37, %s5068_s25  ;;  %v1824_v13 = vsel %vm1806_vm2, %v4902_v46, %v788_v21  ;;  %v1124_v7 = vrot.slane %v1122_v47, 5  ;;  %v2696_v8 = vor.u32 %v2695_v62, %v2692_v14  ;;  %v1345_v14 = vpop.permute.xlu2 %1344 }
 0x10a   : >> { %v1826_v16 = vsel %vm1806_vm2, %v612_v35, %v788_v21  ;;  %v1316_v1 = vrot.slane %v1285_v53, 5  ;;  %v2997_v30 = vor.u32 %v5753_v60, %v5751_v34  ;;  %v2375_v10 = vshrl.u32 %v1824_v13, 16  ;;  %v4909_v35 = vld [vmem:[#allocation2 + $0x20] sm:$0x8] }
 0x10b   : >> { %v2382_v45 = vshrl.u32 %v1826_v16, 16  ;;  %v2385_v55 = vshll.u32 %v1826_v16, 16  ;;  %1370 = vrot.lane.b32.xlu0 %v1315_v44, %s5068_s25  ;;  %v2378_v11 = vshll.u32 %v1824_v13, 16  ;;  %v1125_v21 = vor.u32 %v1124_v7, %v1121_v51  ;;  %v364_v16 = vld [vmem:[#allocation2 + $0xc] sm:$0x1]  ;;  %v7366_v51 = vld [vmem:[#allocation14_spill] sm:$0xff] }
 0x10c   : >> { %v1317_v39 = vsel %vm861_vm1, %v1315_v44, %v1316_v1  ;;  %v2697_v62 = vsel %vm2143_vm3, %v2689_v49, %v2696_v8  ;;  %v3004_v34 = vor.u32 %v5749_v59, %v5747_v56  ;;  %v2377_v60 = vrot.slane %v2375_v10, 3  ;;  %v7368_v13 = vld [vmem:[#allocation15_spill] sm:$0xff] }
 0x10d   : >> { %v5801_v52 = vrot.slane %v2382_v45, 3  ;;  %1372 = vrot.lane.b32.xlu1 %v1317_v39, %s5068_s25  ;;  %v5804_v12 = vrot.slane %v2385_v55, 4  ;;  %v2380_v6 = vrot.slane %v2378_v11, 4  ;;  %v1268_v22 = vunpack.c.l.b16 %v434_v54 }
 0x10e   : >> { %v1987_v40 = vsel %vm1806_vm2, %v1125_v21, %v1345_v14  ;;  %v1985_v2 = vsel %vm1806_vm2, %v1125_v21, %v1343_v63  ;;  %v3005_v48 = vsel %vm2143_vm3, %v2997_v30, %v3004_v34  ;;  %v1021_v37 = vpack.c.b16 %v981_v15, %v981_v15 }
 0x10f   : >> { %v2181_v53 = vshrl.u32 %v1987_v40, 16  ;;  %v2184_v47 = vshll.u32 %v1987_v40, 16  ;;  %v2174_v42 = vshrl.u32 %v1985_v2, 16  ;;  %v2177_v46 = vshll.u32 %v1985_v2, 16  ;;  %3847 = vmatmul.bf16.gmra.mxu2 %v3005_v48  ;;  %v1039_v10 = vpop.permute.xlu1 %1038 }
 0x110   : >> { %v4906_v56 = vor.u32 %v5766_v41, %v4905_v28  ;;  %v1284_v59 = vpack.c.b16 %v1268_v22, %v1268_v22  ;;  %v7367_v49 = vunpack.c.h.b16 %v7366_v51  ;;  %v4910_v7 = vor.u32 %v7368_v13, %v4909_v35  ;;  %v5839_v35 = vpop.permute.xlu0 %1346 }
 0x111   : >> { %v5816_v1 = vrot.slane %v2181_v53, 3  ;;  %v5818_v45 = vrot.slane %v2184_v47, 4  ;;  %v5820_v55 = vrot.slane %v2174_v42, 3  ;;  %v2179_v15 = vrot.slane %v2177_v46, 4  ;;  %v5850_v46 = vld [vmem:[#allocation2 + $0x94] sm:$0xff]  }
 0x112   : >> { %3827 = vmatmul.bf16.gmra.mxu1 %v2697_v62  ;;  %v1503_v44 = vpack.c.b16 %v7367_v49, %v7367_v49  ;;  %v1313_v63 = vrot.slane %v1284_v59, 5  ;;  %v829_v30 = vunpack.c.l.b16 %v364_v16  ;;  %v3308_v41 = vrot.slane %v3306_v32, 3  ;;  %v7369_v62 = vld [vmem:[#allocation6_spill] sm:$0xff]  ;;  %v5852_v16 = vld [vmem:[#allocation2 + $0x90] sm:$0xf0]  }
 0x113   : >> { %v3311_v28 = vrot.slane %v3309_v23, 4  ;;  %1066 = vrot.lane.b32.xlu0 %v4906_v56, %s5068_s25  ;;  %v2065_v21 = vsel %vm1806_vm2, %v4910_v7, %v1679_v38  ;;  %v862_v34 = vrot.slane %v7369_v62, 5  ;;  %v2187_v0 = vor.u32 %v5818_v45, %v5816_v1 }
 0x114   : >> { %v2067_v8 = vsel %vm1806_vm2, %v1503_v44, %v1679_v38  ;;  %v1314_v11 = vsel %vm861_vm1, %v1312_v18, %v1313_v63  ;;  %v845_v14 = vpack.c.b16 %v829_v30, %v829_v30  ;;  %v2180_v32 = vor.u32 %v2179_v15, %v5820_v55  ;;  %v1041_v18 = vpop.permute.xlu2 %1040 }
 0x115   : >> { %v2196_v54 = vshrl.u32 %v2067_v8, 16  ;;  %v2199_v39 = vshll.u32 %v2067_v8, 16  ;;  %1068 = vrot.lane.b32.xlu1 %v1021_v37, %s5068_s25  ;;  %1368 = vrot.lane.b32.xlu2 %v1314_v11, %s5068_s25  ;;  %v2189_v23 = vshrl.u32 %v2065_v21, 16  ;;  %v2192_v22 = vshll.u32 %v2065_v21, 16  ;;  %v5868_v8 = vld [vmem:[#allocation2 + $0xa0] sm:$0xf0]  }
 0x116   : >> { %v863_v40 = vrot.slane %v845_v14, 5  ;;  %v1889_v2 = vsel %vm1806_vm2, %v862_v34, %v1039_v10  ;;  %v2381_v48 = vor.u32 %v2380_v6, %v2377_v60  ;;  %v2388_v38 = vor.u32 %v5804_v12, %v5801_v52  ;;  %v436_v52 = vld [vmem:[#allocation2 + $0x9c] sm:$0x1]  ;;  %v4913_v14 = vld [vmem:[#allocation2 + $0x30] sm:$0x8] }
 0x117   : >> { %v5844_v37 = vrot.slane %v2189_v23, 3  ;;  %v5846_v53 = vrot.slane %v2196_v54, 3  ;;  %v5848_v47 = vrot.slane %v2199_v39, 4  ;;  %v2159_v42 = vshrl.u32 %v1889_v2, 16 }
 0x118   : >> { %v864_v56 = vsel %vm861_vm1, %v862_v34, %v863_v40  ;;  %v2162_v59 = vshll.u32 %v1889_v2, 16  ;;  %v2389_v49 = vsel %vm2143_vm3, %v2381_v48, %v2388_v38  ;;  %v3305_v60 = vor.u32 %v5776_v19, %v5774_v5  ;;  %v5866_v19 = vld [vmem:[#allocation2 + $0xa4] sm:$0xff]   ;;  %v365_v2 = vld [vmem:[#allocation2 + $0x1c] sm:$0x1] }
 0x119   : >> { %v5858_v12 = vrot.slane %v2192_v22, 4  ;;  %v1892_v6 = vsel %vm1806_vm2, %v864_v56, %v1041_v18  ;;  %v2161_v44 = vrot.slane %v2159_v42, 3  ;;  %3807 = vmatmul.bf16.gmra.mxu0 %v2389_v49  ;;  %v3312_v1 = vor.u32 %v3311_v28, %v3308_v41  ;;  %v7370_v41 = vld [vmem:[#allocation16_spill] sm:$0xff]  ;;  %v1043_v18 = vpop.permute.xlu0 %1042  ;;  %v1349_v49 = vpop.permute.xlu1 %1348 }
 0x11a   : >> { %v2166_v45 = vshrl.u32 %v1892_v6, 16  ;;  %v2169_v55 = vshll.u32 %v1892_v6, 16  ;;  %v2164_v15 = vrot.slane %v2162_v59, 4  ;;  %v984_v13 = vunpack.c.h.b16 %v5850_v46  ;;  %v7371_v42 = vld [vmem:[#allocation8_spill] sm:$0xff] }
 0x11b   : >> { %v3313_v63 = vsel %vm2143_vm3, %v3305_v60, %v3312_v1  ;;  %v1270_v7 = vunpack.c.l.b16 %v436_v52  ;;  %v1019_v5 = vpack.c.b16 %v978_v61, %v978_v61  ;;  %v1127_v28 = vshrl.u32 %v7370_v41, 16  ;;  %v7372_v52 = vld [vmem:[#allocation20_spill] sm:$0xff] }
 0x11c   : >> { %v2168_v30 = vrot.slane %v2166_v45, 3  ;;  %v2171_v54 = vrot.slane %v2169_v55, 4  ;;  %v2165_v39 = vor.u32 %v2164_v15, %v2161_v44  ;;  %3867 = vmatmul.bf16.gmra.mxu3 %v3313_v63  ;;  %v1130_v11 = vshll.u32 %v7370_v41, 16 }
 0x11d   : >> { %v1286_v10 = vpack.c.b16 %v1270_v7, %v1270_v7  ;;  %1064 = vrot.lane.b32.xlu2 %v1019_v5, %s5068_s25  ;;  %v2188_v21 = vsel %vm2143_vm3, %v2180_v32, %v2187_v0  ;;  %v1129_v61 = vrot.slane %v1127_v28, 4  ;;  %v1318_v34 = vrot.slane %v5850_v46, 5 }
 0x11e   : >> { %v2172_v62 = vor.u32 %v2171_v54, %v2168_v30  ;;  %v1132_v22 = vrot.slane %v1130_v11, 5  ;;  %v2202_v48 = vor.u32 %v5848_v47, %v5846_v53  ;;  %v865_v56 = vrot.slane %v7371_v42, 5  ;;  %v7373_v47 = vld [vmem:[#allocation19_spill] sm:$0xff]  ;;  %v1681_v30 = vpop.permute.xlu2 %1680 }
 0x11f   : >> { %v1319_v23 = vrot.slane %v1286_v10, 5  ;;  %3970 = vmatmul.bf16.vlgmr.msrb.gmra.mxu2 %v2188_v21  ;;  %v2195_v0 = vor.u32 %v5858_v12, %v5844_v37  ;;  %v4914_v53 = vor.u32 %v7372_v52, %v4913_v14  ;;  %v7374_v6 = vunpack.c.h.b16 %v7373_v47  ;;  %v493_v21 = vld [vmem:[#allocation2 + $0x2c] sm:$0x1] }
 0x120   : >> { %v2173_v38 = vsel %vm2143_vm3, %v2165_v39, %v2172_v62  ;;  %v1133_v59 = vor.u32 %v1132_v22, %v1129_v61  ;;  %v1895_v60 = vsel %vm1806_vm2, %v865_v56, %v1043_v18  ;;  %v830_v1 = vunpack.c.l.b16 %v365_v2  ;;  %v5907_v22 = vld [vmem:[#allocation2 + $0x94] sm:$0xff]  }
 0x121   : >> { %v1320_v32 = vsel %vm861_vm1, %v1318_v34, %v1319_v23  ;;  %v1505_v44 = vpack.c.b16 %v7374_v6, %v7374_v6  ;;  %v1615_v45 = vshrl.u32 %v5866_v19, 16  ;;  %v1618_v55 = vshll.u32 %v5866_v19, 16  ;;  %v5909_v18 = vld [vmem:[#allocation2 + $0x90] sm:$0xf0]  }
 0x122   : >> { %3881 = vmatmul.bf16.vlgmr.msrb.gmra.mxu1 %v2173_v38  ;;  %1376 = vrot.lane.b32.xlu0 %v1320_v32, %s5068_s25  ;;  %v1990_v37 = vsel %vm1806_vm2, %v1133_v59, %v5839_v35  ;;  %v1992_v12 = vsel %vm1806_vm2, %v1133_v59, %v1349_v49  ;;  %v2236_v41 = vshrl.u32 %v1895_v60, 16  ;;  %v2239_v28 = vshll.u32 %v1895_v60, 16  ;;  %v5918_v49 = vld [vmem:[#allocation2 + $0xa4] sm:$0xff]  }
 0x123   : >> { %v2251_v15 = vshrl.u32 %v1990_v37, 16  ;;  %v2254_v63 = vshll.u32 %v1990_v37, 16  ;;  %v2258_v7 = vshrl.u32 %v1992_v12, 16  ;;  %v2261_v5 = vshll.u32 %v1992_v12, 16  ;;  %v5920_v60 = vld [vmem:[#allocation2 + $0xa0] sm:$0xf0]   ;;  %v1045_v37 = vpop.permute.xlu1 %1044 }
 0x124   : >> { %v1617_v54 = vrot.slane %v1615_v45, 4  ;;  %v1620_v39 = vrot.slane %v1618_v55, 5  ;;  %v1023_v10 = vpack.c.b16 %v984_v13, %v984_v13  ;;  %v5897_v11 = vsel %vm1806_vm2, %v1505_v44, %v1681_v30 }
 0x125   : >> { %v2203_v35 = vsel %vm2143_vm3, %v2195_v0, %v2202_v48  ;;  %v5900_v14 = vrot.slane %v2251_v15, 3  ;;  %v5902_v62 = vrot.slane %v2254_v63, 4  ;;  %v5905_v23 = vsel %vm1806_vm2, %v4914_v53, %v1681_v30  ;;  %v7375_v15 = vld [vmem:[#allocation21_spill] sm:$0xff] }
 0x126   : >> { %v1621_v61 = vor.u32 %v1620_v39, %v1617_v54  ;;  %v5911_v2 = vrot.slane %v2258_v7, 3  ;;  %v5913_v13 = vrot.slane %v2261_v5, 4  ;;  %v2238_v38 = vrot.slane %v2236_v41, 3 }
 0x127   : >> { %v2241_v42 = vrot.slane %v2239_v28, 4  ;;  %v2266_v48 = vshrl.u32 %v5905_v23, 16  ;;  %v846_v0 = vpack.c.b16 %v830_v1, %v830_v1  ;;  %v1726_v32 = vunpack.c.l.b16 %v493_v21  ;;  %v1351_v28 = vpop.permute.xlu2 %1350 }
 0x128   : >> { %1694 = vrot.lane.b32.xlu1 %v1621_v61, %s5068_s25  ;;  %v1758_v59 = vrot.slane %v7366_v51, 5  ;;  %v2269_v52 = vshll.u32 %v5905_v23, 16  ;;  %v2273_v53 = vshrl.u32 %v5897_v11, 16  ;;  %v2276_v6 = vshll.u32 %v5897_v11, 16 }
 0x129   : >> { %v866_v44 = vrot.slane %v846_v0, 5  ;;  %v1742_v12 = vpack.c.b16 %v1726_v32, %v1726_v32  ;;  %v987_v55 = vunpack.c.h.b16 %v5918_v49  ;;  %v1135_v63 = vshrl.u32 %v7375_v15, 16 }
 0x12a   : >> { %1072 = vrot.lane.b32.xlu0 %v1023_v10, %s5068_s25  ;;  %v2205_v45 = vshrl.u32 %v1758_v59, 16  ;;  %v2208_v1 = vshll.u32 %v1758_v59, 16  ;;  %v1607_v0 = vshrl.u32 %v5907_v22, 16  ;;  %v1610_v32 = vshll.u32 %v5907_v22, 16 }
 0x12b   : >> { %v867_v7 = vsel %vm861_vm1, %v865_v56, %v866_v44  ;;  %v1759_v5 = vrot.slane %v1742_v12, 5  ;;  %v1137_v41 = vrot.slane %v1135_v63, 4  ;;  %v1321_v44 = vrot.slane %v5918_v49, 5 }
 0x12c   : >> { %4059 = vmatmul.bf16.vlgmr.msrb.gmra.mxu3 %v2203_v35  ;;  %v2207_v30 = vrot.slane %v2205_v45, 3  ;;  %v2210_v54 = vrot.slane %v2208_v1, 4  ;;  %v1898_v39 = vsel %vm1806_vm2, %v867_v7, %v1045_v37  ;;  %v1138_v12 = vshll.u32 %v7375_v15, 16  ;;  %v1353_v37 = vpop.permute.xlu0 %1352  ;;  %v5936_v45 = vld [vmem:[#allocation2 + $0xb4] sm:$0xff]  }
 0x12d   : >> { %v2243_v10 = vshrl.u32 %v1898_v39, 16  ;;  %v2246_v11 = vshll.u32 %v1898_v39, 16  ;;  %v1760_v21 = vsel %vm861_vm1, %v1758_v59, %v1759_v5  ;;  %v5938_v1 = vld [vmem:[#allocation2 + $0xb0] sm:$0xf0]   ;;  %v1609_v7 = vrot.slane %v1607_v0, 4 }
 0x12e   : >> { %v2211_v35 = vor.u32 %v2210_v54, %v2207_v30  ;;  %v2213_v61 = vshrl.u32 %v1760_v21, 16  ;;  %v2216_v23 = vshll.u32 %v1760_v21, 16  ;;  %v1612_v5 = vrot.slane %v1610_v32, 5  ;;  %v4917_v30 = vld [vmem:[#allocation2 + $0xa0] sm:$0x8] }
 0x12f   : >> { %v2245_v40 = vrot.slane %v2243_v10, 3  ;;  %v2248_v56 = vrot.slane %v2246_v11, 4  ;;  %v1140_v54 = vrot.slane %v1138_v12, 5  ;;  %v2242_v39 = vor.u32 %v2241_v42, %v2238_v38  ;;  %v366_v11 = vld [vmem:[#allocation2 + $0x2c] sm:$0x1] }
 0x130   : >> { %v2215_v63 = vrot.slane %v2213_v61, 3  ;;  %v2218_v59 = vrot.slane %v2216_v23, 4  ;;  %1378 = vrot.lane.b32.xlu1 %v1321_v44, %s5068_s25  ;;  %v2257_v15 = vor.u32 %v5902_v62, %v5900_v14  ;;  %v1613_v51 = vor.u32 %v1612_v5, %v1609_v7 }
 0x131   : >> { %v2249_v10 = vor.u32 %v2248_v56, %v2245_v40  ;;  %v2264_v61 = vor.u32 %v5913_v13, %v5911_v2  ;;  %v1141_v23 = vor.u32 %v1140_v54, %v1137_v41  ;;  %v2268_v50 = vrot.slane %v2266_v48, 3  ;;  %v1047_v41 = vpop.permute.xlu2 %1046 }
 0x132   : >> { %v2219_v21 = vor.u32 %v2218_v59, %v2215_v63  ;;  %1692 = vrot.lane.b32.xlu2 %v1613_v51, %s5068_s25  ;;  %v831_v14 = vunpack.c.l.b16 %v366_v11  ;;  %v868_v13 = vrot.slane %v5330_v26, 5  ;;  %v2271_v38 = vrot.slane %v2269_v52, 4 }
 0x133   : >> { %v2250_v0 = vsel %vm2143_vm3, %v2242_v39, %v2249_v10  ;;  %v2265_v40 = vsel %vm2143_vm3, %v2257_v15, %v2264_v61  ;;  %v1997_v62 = vsel %vm1806_vm2, %v1141_v23, %v1353_v37  ;;  %v1995_v2 = vsel %vm1806_vm2, %v1141_v23, %v1351_v28  ;;  %v7376_v15 = vld [vmem:[#allocation18_spill] sm:$0xff] }
 0x134   : >> { %v2220_v12 = vsel %vm2143_vm3, %v2211_v35, %v2219_v21  ;;  %3886 = vmatmul.bf16.gmra.mxu1 %v2250_v0  ;;  %3975 = vmatmul.bf16.gmra.mxu2 %v2265_v40  ;;  %v2275_v42 = vrot.slane %v2273_v53, 3  ;;  %v2278_v48 = vrot.slane %v2276_v6, 4  ;;  %v1623_v35 = vshrl.u32 %v5936_v45, 16  ;;  %v1049_v52 = vpop.permute.xlu0 %1048  ;;  %v1683_v6 = vpop.permute.xlu1 %1682  ;;  %v7377_v21 = vld [vmem:[#allocation17_spill] sm:$0xff] }
 0x135   : >> { %4708 = vmatmul.msk.bf16.vlgmr.msrb.gmra.mxu0 %vm1806_vm2, %v2220_v12  ;;  %v1626_v51 = vshll.u32 %v5936_v45, 16  ;;  %v4918_v56 = vor.u32 %v5920_v60, %v4917_v30  ;;  %v847_v63 = vpack.c.b16 %v831_v14, %v831_v14  ;;  %v2335_v59 = vshrl.u32 %v1997_v62, 16 }
 0x136   : >> { %v2338_v7 = vshll.u32 %v1997_v62, 16  ;;  %v2328_v5 = vshrl.u32 %v1995_v2, 16  ;;  %v2331_v37 = vshll.u32 %v1995_v2, 16  ;;  %v1625_v54 = vrot.slane %v1623_v35, 4  ;;  %v494_v2 = vld [vmem:[#allocation2 + $0x3c] sm:$0x1] }
 0x137   : >> { %v1628_v28 = vrot.slane %v1626_v51, 5  ;;  %v869_v26 = vrot.slane %v847_v63, 5  ;;  %v1901_v53 = vsel %vm1806_vm2, %v868_v13, %v1047_v41  ;;  %v4922_v11 = vor.u32 %v7376_v15, %v4921_v43  ;;  %v4925_v63 = vld [vmem:[#allocation2 + $0x90] sm:$0x8] }
 0x138   : >> { %1074 = vrot.lane.b32.xlu1 %v4918_v56, %s5068_s25  ;;  %v2313_v39 = vshrl.u32 %v1901_v53, 16  ;;  %v2316_v10 = vshll.u32 %v1901_v53, 16  ;;  %v7378_v60 = vunpack.c.h.b16 %v7377_v21  ;;  %v2272_v0 = vor.u32 %v2271_v38, %v2268_v50  ;;  %v5984_v56 = vld [vmem:[#allocation2 + $0xb0] sm:$0xf0]  }
 0x139   : >> { %v1629_v61 = vor.u32 %v1628_v28, %v1625_v54  ;;  %v870_v23 = vsel %vm861_vm1, %v868_v13, %v869_v26  ;;  %v2279_v12 = vor.u32 %v2278_v48, %v2275_v42  ;;  %v5966_v40 = vrot.slane %v2335_v59, 3  ;;  %v438_v28 = vld [vmem:[#allocation2 + $0xbc] sm:$0x1] }
 0x13a   : >> { %v1507_v30 = vpack.c.b16 %v7378_v60, %v7378_v60  ;;  %v5968_v14 = vrot.slane %v2338_v7, 4  ;;  %1374 = vrot.lane.b32.xlu2 %v1318_v34, %s5068_s25  ;;  %v1904_v62 = vsel %vm1806_vm2, %v870_v23, %v1049_v52  ;;  %v5975_v43 = vsel %vm1806_vm2, %v4922_v11, %v1683_v6  ;;  %v5982_v34 = vld [vmem:[#allocation2 + $0xb4] sm:$0xff]  }
 0x13b   : >> { %v2330_v41 = vrot.slane %v2328_v5, 3  ;;  %1696 = vrot.lane.b32.xlu0 %v1629_v61, %s5068_s25  ;;  %v2320_v13 = vshrl.u32 %v1904_v62, 16  ;;  %v2323_v50 = vshll.u32 %v1904_v62, 16  ;;  %v2333_v42 = vrot.slane %v2331_v37, 4  ;;  %v7379_v60 = vld [vmem:[#allocation22_spill] sm:$0xff] }
 0x13c   : >> { %v5979_v38 = vsel %vm1806_vm2, %v1507_v30, %v1683_v6  ;;  %v2315_v48 = vrot.slane %v2313_v39, 3  ;;  %v2318_v35 = vrot.slane %v2316_v10, 4  ;;  %v2280_v51 = vsel %vm2143_vm3, %v2272_v0, %v2279_v12  ;;  %v1355_v12 = vpop.permute.xlu1 %1354 }
 0x13d   : >> { %v2343_v59 = vshrl.u32 %v5975_v43, 16  ;;  %v2346_v7 = vshll.u32 %v5975_v43, 16  ;;  %v2350_v5 = vshrl.u32 %v5979_v38, 16  ;;  %4064 = vmatmul.bf16.gmra.mxu3 %v2280_v51  ;;  %v1727_v54 = vunpack.c.l.b16 %v494_v2 }
 0x13e   : >> { %v2322_v26 = vrot.slane %v2320_v13, 3  ;;  %v2325_v37 = vrot.slane %v2323_v50, 4  ;;  %v2353_v52 = vshll.u32 %v5979_v38, 16  ;;  %v1761_v53 = vrot.slane %v7373_v47, 5 }
 0x13f   : >> { %v1743_v6 = vpack.c.b16 %v1727_v54, %v1727_v54  ;;  %v990_v39 = vunpack.c.h.b16 %v5982_v34  ;;  %v1272_v11 = vunpack.c.l.b16 %v438_v28  ;;  %v1143_v30 = vshrl.u32 %v7379_v60, 16  ;;  %v4929_v54 = vld [vmem:[#allocation2 + $0xb0] sm:$0x8] }
 0x140   : >> { %v2282_v10 = vshrl.u32 %v1761_v53, 16  ;;  %v2285_v15 = vshll.u32 %v1761_v53, 16  ;;  %v4926_v23 = vor.u32 %v5852_v16, %v4925_v63  ;;  %v1146_v0 = vshll.u32 %v7379_v60, 16 }
 0x141   : >> { %v1762_v61 = vrot.slane %v1743_v6, 5  ;;  %v1288_v2 = vpack.c.b16 %v1272_v11, %v1272_v11  ;;  %v1145_v13 = vrot.slane %v1143_v30, 4  ;;  %v1324_v50 = vrot.slane %v5982_v34, 5 }
 0x142   : >> { %v2284_v62 = vrot.slane %v2282_v10, 3  ;;  %v2287_v43 = vrot.slane %v2285_v15, 4  ;;  %1070 = vrot.lane.b32.xlu2 %v4926_v23, %s5068_s25  ;;  %v1148_v38 = vrot.slane %v1146_v0, 5  ;;  %v2319_v51 = vor.u32 %v2318_v35, %v2315_v48  ;;  %v437_v23 = vld [vmem:[#allocation2 + $0xac] sm:$0x1] }
 0x143   : >> { %v1763_v47 = vsel %vm861_vm1, %v1761_v53, %v1762_v61  ;;  %v1325_v16 = vrot.slane %v1288_v2, 5  ;;  %1382 = vrot.lane.b32.xlu0 %v1324_v50, %s5068_s25  ;;  %v2326_v10 = vor.u32 %v2325_v37, %v2322_v26  ;;  %v2334_v15 = vor.u32 %v2333_v42, %v2330_v41  ;;  %v1357_v61 = vpop.permute.xlu2 %1356 }
 0x144   : >> { %v2288_v28 = vor.u32 %v2287_v43, %v2284_v62  ;;  %v2290_v6 = vshrl.u32 %v1763_v47, 16  ;;  %v2293_v32 = vshll.u32 %v1763_v47, 16  ;;  %v1149_v63 = vor.u32 %v1148_v38, %v1145_v13  ;;  %v1685_v62 = vpop.permute.xlu0 %1684  ;;  %v367_v13 = vld [vmem:[#allocation2 + $0x3c] sm:$0x1] }
 0x145   : >> { %v2341_v11 = vor.u32 %v5968_v14, %v5966_v40  ;;  %v1326_v30 = vsel %vm861_vm1, %v1324_v50, %v1325_v16  ;;  %v2327_v35 = vsel %vm2143_vm3, %v2319_v51, %v2326_v10  ;;  %v2345_v26 = vrot.slane %v2343_v59, 3  ;;  %v1051_v16 = vpop.permute.xlu1 %1050 }
 0x146   : >> { %v2292_v53 = vrot.slane %v2290_v6, 3  ;;  %v2295_v60 = vrot.slane %v2293_v32, 4  ;;  %1384 = vrot.lane.b32.xlu1 %v1326_v30, %s5068_s25  ;;  %v2002_v48 = vsel %vm1806_vm2, %v1149_v63, %v1357_v61  ;;  %v2348_v41 = vrot.slane %v2346_v7, 4  ;;  %3891 = vmatmul.bf16.gmra.mxu1 %v2327_v35  ;;  %v4933_v32 = vld [vmem:[#allocation2 + $0x50] sm:$0x8] }
 0x147   : >> { %v2342_v0 = vsel %vm2143_vm3, %v2334_v15, %v2341_v11  ;;  %v2352_v42 = vrot.slane %v2350_v5, 3  ;;  %v2355_v40 = vrot.slane %v2353_v52, 4  ;;  %v2000_v14 = vsel %vm1806_vm2, %v1149_v63, %v1355_v12  ;;  %v7380_v5 = vld [vmem:[#allocation23_spill] sm:$0xff]  ;;  %v495_v52 = vld [vmem:[#allocation2 + $0x4c] sm:$0x1] }
 0x148   : >> { %v2296_v37 = vor.u32 %v2295_v60, %v2292_v53  ;;  %3980 = vmatmul.bf16.gmra.mxu2 %v2342_v0  ;;  %v4930_v43 = vor.u32 %v5984_v56, %v4929_v54  ;;  %v1271_v2 = vunpack.c.l.b16 %v437_v23  ;;  %v2412_v50 = vshrl.u32 %v2002_v48, 16  ;;  %v6027_v0 = vld [vmem:[#allocation2 + $0xc4] sm:$0xff]  }
 0x149   : >> { %v2415_v38 = vshll.u32 %v2002_v48, 16  ;;  %v1027_v7 = vpack.c.b16 %v990_v39, %v990_v39  ;;  %v7381_v51 = vunpack.c.h.b16 %v7380_v5  ;;  %v2405_v10 = vshrl.u32 %v2000_v14, 16 }
 0x14a   : >> { %v2297_v47 = vsel %vm2143_vm3, %v2288_v28, %v2296_v37  ;;  %v1287_v59 = vpack.c.b16 %v1271_v2, %v1271_v2  ;;  %v2408_v12 = vshll.u32 %v2000_v14, 16  ;;  %v832_v63 = vunpack.c.l.b16 %v367_v13  ;;  %v7382_v28 = vld [vmem:[#allocation24_spill] sm:$0xff] }
 0x14b   : >> { %4709 = vmatmul.msk.bf16.gmra.mxu0 %vm1806_vm2, %v2297_v47  ;;  %v1509_v6 = vpack.c.b16 %v7381_v51, %v7381_v51  ;;  %v871_v56 = vrot.slane %v5322_v20, 5  ;;  %1078 = vrot.lane.b32.xlu0 %v4930_v43, %s5068_s25  ;;  %v4934_v15 = vor.u32 %v7382_v28, %v4933_v32  ;;  %v2349_v11 = vor.u32 %v2348_v41, %v2345_v26  ;;  %v6029_v26 = vld [vmem:[#allocation2 + $0xc0] sm:$0xf0]   ;;  %v1053_v43 = vpop.permute.xlu2 %1052 }
 0x14c   : >> { %v1322_v54 = vrot.slane %v1287_v59, 5  ;;  %v2356_v53 = vor.u32 %v2355_v40, %v2352_v42  ;;  %v848_v60 = vpack.c.b16 %v832_v63, %v832_v63  ;;  %v1728_v61 = vunpack.c.l.b16 %v495_v52  ;;  %v1359_v13 = vpop.permute.xlu0 %1358 }
 0x14d   : >> { %v6017_v39 = vsel %vm1806_vm2, %v1509_v6, %v1685_v62  ;;  %v1907_v30 = vsel %vm1806_vm2, %v871_v56, %v1051_v16  ;;  %v6025_v20 = vsel %vm1806_vm2, %v4934_v15, %v1685_v62  ;;  %v6031_v41 = vrot.slane %v2412_v50, 3 }
 0x14e   : >> { %v1323_v23 = vsel %vm861_vm1, %v1321_v44, %v1322_v54  ;;  %1080 = vrot.lane.b32.xlu1 %v1027_v7, %s5068_s25  ;;  %v2390_v48 = vshrl.u32 %v1907_v30, 16  ;;  %v2393_v35 = vshll.u32 %v1907_v30, 16  ;;  %v6033_v42 = vrot.slane %v2415_v38, 4  ;;  %v439_v44 = vld [vmem:[#allocation2 + $0xcc] sm:$0x1] }
 0x14f   : >> { %v6035_v37 = vrot.slane %v2405_v10, 3  ;;  %v6037_v32 = vrot.slane %v2408_v12, 4  ;;  %1380 = vrot.lane.b32.xlu2 %v1323_v23, %s5068_s25  ;;  %v2420_v62 = vshrl.u32 %v6025_v20, 16  ;;  %v2427_v40 = vshrl.u32 %v6017_v39, 16 }
 0x150   : >> { %v872_v14 = vrot.slane %v848_v60, 5  ;;  %v2357_v2 = vsel %vm2143_vm3, %v2349_v11, %v2356_v53  ;;  %v2392_v47 = vrot.slane %v2390_v48, 3  ;;  %v2395_v50 = vrot.slane %v2393_v35, 4 }
 0x151   : >> { %4069 = vmatmul.bf16.gmra.mxu3 %v2357_v2  ;;  %v1744_v38 = vpack.c.b16 %v1728_v61, %v1728_v61  ;;  %v1764_v59 = vrot.slane %v7377_v21, 5  ;;  %v993_v51 = vunpack.c.h.b16 %v6027_v0  ;;  %v1273_v6 = vunpack.c.l.b16 %v439_v44  ;;  %v7383_v44 = vld [vmem:[#allocation25_spill] sm:$0xff] }
 0x152   : >> { %v873_v7 = vsel %vm861_vm1, %v871_v56, %v872_v14  ;;  %v1025_v21 = vpack.c.b16 %v987_v55, %v987_v55  ;;  %v1327_v48 = vrot.slane %v6027_v0, 5  ;;  %v1151_v14 = vshrl.u32 %v7383_v44, 16  ;;  %v6057_v55 = vld [vmem:[#allocation2 + $0xd0] sm:$0xf0]  }
 0x153   : >> { %v1910_v16 = vsel %vm1806_vm2, %v873_v7, %v1053_v43  ;;  %v1765_v52 = vrot.slane %v1744_v38, 5  ;;  %v2359_v10 = vshrl.u32 %v1764_v59, 16  ;;  %v2362_v12 = vshll.u32 %v1764_v59, 16  ;;  %v6055_v7 = vld [vmem:[#allocation2 + $0xd4] sm:$0xff]  }
 0x154   : >> { %v2397_v63 = vshrl.u32 %v1910_v16, 16  ;;  %v2400_v54 = vshll.u32 %v1910_v16, 16  ;;  %v1289_v28 = vpack.c.b16 %v1273_v6, %v1273_v6  ;;  %v1154_v38 = vshll.u32 %v7383_v44, 16  ;;  %7384 = vst [vmem:[#allocation13_spill] sm:$0xff] %v6055_v7  ;;  %v6080_v44 = vld [vmem:[#allocation2 + $0x60] sm:$0x8] }
 0x155   : >> { %v1766_v15 = vsel %vm861_vm1, %v1764_v59, %v1765_v52  ;;  %v2361_v11 = vrot.slane %v2359_v10, 3  ;;  %v2364_v53 = vrot.slane %v2362_v12, 4  ;;  %v2396_v59 = vor.u32 %v2395_v50, %v2392_v47  ;;  %v1055_v50 = vpop.permute.xlu0 %1054 }
 0x156   : >> { %v2399_v56 = vrot.slane %v2397_v63, 3  ;;  %v2402_v60 = vrot.slane %v2400_v54, 4  ;;  %v2367_v30 = vshrl.u32 %v1766_v15, 16  ;;  %v2370_v61 = vshll.u32 %v1766_v15, 16 }
 0x157   : >> { %v2365_v23 = vor.u32 %v2364_v53, %v2361_v11  ;;  %v1328_v35 = vrot.slane %v1289_v28, 5  ;;  %1076 = vrot.lane.b32.xlu2 %v1025_v21, %s5068_s25  ;;  %v1153_v16 = vrot.slane %v1151_v14, 4  ;;  %v2411_v10 = vor.u32 %v6037_v32, %v6035_v37  ;;  %v7385_v11 = vld [vmem:[#allocation4_spill] sm:$0xff] }
 0x158   : >> { %v2369_v43 = vrot.slane %v2367_v30, 3  ;;  %v2372_v2 = vrot.slane %v2370_v61, 4  ;;  %v2403_v52 = vor.u32 %v2402_v60, %v2399_v56  ;;  %v2423_v12 = vshll.u32 %v6025_v20, 16  ;;  %v1361_v20 = vpop.permute.xlu1 %1360  ;;  %v368_v60 = vld [vmem:[#allocation2 + $0x4c] sm:$0x1] }
 0x159   : >> { %v1329_v6 = vsel %vm861_vm1, %v1327_v48, %v1328_v35  ;;  %v1156_v54 = vrot.slane %v1154_v38, 5  ;;  %v2418_v47 = vor.u32 %v6033_v42, %v6031_v41  ;;  %v874_v53 = vrot.slane %v7385_v11, 5 }
 0x15a   : >> { %v2373_v63 = vor.u32 %v2372_v2, %v2369_v43  ;;  %1388 = vrot.lane.b32.xlu0 %v1329_v6, %s5068_s25  ;;  %v2404_v28 = vsel %vm2143_vm3, %v2396_v59, %v2403_v52  ;;  %v2430_v21 = vshll.u32 %v6017_v39, 16  ;;  %v2422_v30 = vrot.slane %v2420_v62, 3 }
 0x15b   : >> { %v1157_v32 = vor.u32 %v1156_v54, %v1153_v16  ;;  %3896 = vmatmul.bf16.gmra.mxu1 %v2404_v28  ;;  %v2419_v56 = vsel %vm2143_vm3, %v2411_v10, %v2418_v47  ;;  %v2429_v61 = vrot.slane %v2427_v40, 3  ;;  %v1913_v41 = vsel %vm1806_vm2, %v874_v53, %v1055_v50 }
 0x15c   : >> { %v2374_v37 = vsel %vm2143_vm3, %v2365_v23, %v2373_v63  ;;  %3985 = vmatmul.bf16.gmra.mxu2 %v2419_v56  ;;  %v1029_v23 = vpack.c.b16 %v993_v51, %v993_v51  ;;  %v2467_v35 = vshrl.u32 %v1913_v41, 16  ;;  %v2425_v14 = vrot.slane %v2423_v12, 4  ;;  %v496_v63 = vld [vmem:[#allocation2 + $0x5c] sm:$0x1] }
 0x15d   : >> { %4710 = vmatmul.msk.bf16.gmra.mxu0 %vm1806_vm2, %v2374_v37  ;;  %v2005_v42 = vsel %vm1806_vm2, %v1157_v32, %v1359_v13  ;;  %v2007_v39 = vsel %vm1806_vm2, %v1157_v32, %v1361_v20  ;;  %v2470_v2 = vshll.u32 %v1913_v41, 16  ;;  %v833_v62 = vunpack.c.l.b16 %v368_v60  ;;  %v1687_v13 = vpop.permute.xlu2 %1686  ;;  %v6097_v41 = vld [vmem:[#allocation2 + $0xc4] sm:$0xff]  }
 0x15e   : >> { %v2482_v43 = vshrl.u32 %v2005_v42, 16  ;;  %v2432_v40 = vrot.slane %v2430_v21, 4  ;;  %v1639_v38 = vshrl.u32 %v6055_v7, 16  ;;  %v1642_v59 = vshll.u32 %v6055_v7, 16 }
 0x15f   : >> { %v7386_v6 = vunpack.c.h.b16 %v5651_v36  ;;  %v2485_v52 = vshll.u32 %v2005_v42, 16  ;;  %v2489_v10 = vshrl.u32 %v2007_v39, 16  ;;  %v2492_v51 = vshll.u32 %v2007_v39, 16  ;;  %v6099_v42 = vld [vmem:[#allocation2 + $0xc0] sm:$0xf0]  }
 0x160   : >> { %v1641_v12 = vrot.slane %v1639_v38, 4  ;;  %v1644_v54 = vrot.slane %v1642_v59, 5  ;;  %v6088_v47 = vrot.slane %v2467_v35, 3  ;;  %v6090_v50 = vrot.slane %v2482_v43, 3  ;;  %v1057_v43 = vpop.permute.xlu1 %1056  ;;  %v6114_v38 = vld [vmem:[#allocation2 + $0xd0] sm:$0xf0]   ;;  %v1365_v59 = vpop.permute.xlu0 %1364 }
 0x161   : >> { %v1511_v16 = vpack.c.b16 %v7386_v6, %v7386_v6  ;;  %v6092_v28 = vrot.slane %v2470_v2, 4  ;;  %v849_v21 = vpack.c.b16 %v833_v62, %v833_v62  ;;  %v2426_v37 = vor.u32 %v2425_v14, %v2422_v30 }
 0x162   : >> { %1084 = vrot.lane.b32.xlu0 %v1029_v23, %s5068_s25  ;;  %v1645_v32 = vor.u32 %v1644_v54, %v1641_v12  ;;  %v2433_v56 = vor.u32 %v2432_v40, %v2429_v61  ;;  %v1729_v60 = vunpack.c.l.b16 %v496_v63  ;;  %v6101_v39 = vrot.slane %v2485_v52, 4  ;;  %v6112_v40 = vld [vmem:[#allocation2 + $0xd4] sm:$0xff]  }
 0x163   : >> { %v6095_v20 = vsel %vm1806_vm2, %v1511_v16, %v1687_v13  ;;  %v6103_v23 = vrot.slane %v2489_v10, 3  ;;  %v6105_v35 = vrot.slane %v2492_v51, 4  ;;  %v4938_v30 = vor.u32 %v5653_v17, %v6080_v44 }
 0x164   : >> { %1700 = vrot.lane.b32.xlu1 %v1645_v32, %s5068_s25  ;;  %v875_v14 = vrot.slane %v849_v21, 5  ;;  %v2434_v61 = vsel %vm2143_vm3, %v2426_v37, %v2433_v56  ;;  %v1745_v2 = vpack.c.b16 %v1729_v60, %v1729_v60  ;;  %v1767_v62 = vrot.slane %v7380_v5, 5 }
 0x165   : >> { %v2504_v17 = vshrl.u32 %v6095_v20, 16  ;;  %v2507_v44 = vshll.u32 %v6095_v20, 16  ;;  %4074 = vmatmul.bf16.gmra.mxu3 %v2434_v61  ;;  %v1363_v37 = vpop.permute.xlu2 %1362  ;;  %v1631_v11 = vshrl.u32 %v6097_v41, 16  ;;  %v7390_v20 = vld [vmem:[#allocation26_spill] sm:$0xff] }
 0x166   : >> { %v876_v5 = vsel %vm861_vm1, %v874_v53, %v875_v14  ;;  %v1768_v6 = vrot.slane %v1745_v2, 5  ;;  %v2436_v16 = vshrl.u32 %v1767_v62, 16  ;;  %v2439_v52 = vshll.u32 %v1767_v62, 16 }
 0x167   : >> { %v1916_v10 = vsel %vm1806_vm2, %v876_v5, %v1057_v43  ;;  %v1634_v14 = vshll.u32 %v6097_v41, 16  ;;  %v1633_v5 = vrot.slane %v1631_v11, 4 }
 0x168   : >> { %v2474_v63 = vshrl.u32 %v1916_v10, 16  ;;  %v2477_v12 = vshll.u32 %v1916_v10, 16  ;;  %v1769_v54 = vsel %vm861_vm1, %v1767_v62, %v1768_v6  ;;  %v2438_v21 = vrot.slane %v2436_v16, 3  ;;  %v6135_v6 = vpop.f32.mrf.mxu1 }
 0x169   : >> { %v2441_v32 = vrot.slane %v2439_v52, 4  ;;  %v2444_v56 = vshrl.u32 %v1769_v54, 16  ;;  %v2447_v60 = vshll.u32 %v1769_v54, 16  ;;  %v2085_v10 = vsel %vm1806_vm2, %v4938_v30, %v1687_v13 }
 0x16a   : >> { %v2476_v61 = vrot.slane %v2474_v63, 3  ;;  %v2479_v53 = vrot.slane %v2477_v12, 4  ;;  %v1636_v51 = vrot.slane %v1634_v14, 5  ;;  %v7302_v62 = vrot.slane %v6112_v40, 5 }
 0x16b   : >> { %v2442_v2 = vor.u32 %v2441_v32, %v2438_v21  ;;  %v2446_v15 = vrot.slane %v2444_v56, 3  ;;  %v2449_v43 = vrot.slane %v2447_v60, 4  ;;  %v1159_v16 = vshrl.u32 %v5503_v33, 16  ;;  %v6141_v21 = vld [vmem:[#allocation2 + $0xe4] sm:$0xff]   ;;  %v4941_v56 = vld [vmem:[#allocation2 + $0xd0] sm:$0x8] }
 0x16c   : >> { %v1162_v63 = vshll.u32 %v5503_v33, 16  ;;  %v2473_v12 = vor.u32 %v6092_v28, %v6088_v47  ;;  %v2480_v54 = vor.u32 %v2479_v53, %v2476_v61  ;;  %7387 = vst [vmem:[#allocation14_spill] sm:$0xff] %v6141_v21  ;;  %v6143_v32 = vld [vmem:[#allocation2 + $0xe0] sm:$0xf0]   ;;  %v1637_v13 = vor.u32 %v1636_v51, %v1633_v5  ;;  %1390 = vrot.lane.b32.xlu1 %v7302_v62, %s5068_s25  ;;  %v369_v60 = vld [vmem:[#allocation2 + $0x5c] sm:$0x1]  ;;  %v1689_v62 = vpop.permute.xlu1 %1688 }
 0x16d   : >> { %v2450_v52 = vor.u32 %v2449_v43, %v2446_v15  ;;  %7388 = vst [vmem:[#allocation15_spill] sm:$0xff] %v6143_v32  ;;  %v1161_v30 = vrot.slane %v1159_v16, 4  ;;  %v2488_v15 = vor.u32 %v6101_v39, %v6090_v50  ;;  %v2495_v33 = vor.u32 %v6105_v35, %v6103_v23  ;;  %v4945_v39 = vld [vmem:[#allocation2 + $0x70] sm:$0x8]  ;;  %v7389_v35 = vld [vmem:[#allocation7_spill] sm:$0xff]  ;;  %v1059_v43 = vpop.permute.xlu2 %1058 }
 0x16e   : >> { %v2497_v47 = vshrl.u32 %v2085_v10, 16  ;;  %v1164_v11 = vrot.slane %v1162_v63, 5  ;;  %v2481_v61 = vsel %vm2143_vm3, %v2473_v12, %v2480_v54  ;;  %1698 = vrot.lane.b32.xlu2 %v1637_v13, %s5068_s25  ;;  %v834_v50 = vunpack.c.l.b16 %v369_v60 }
 0x16f   : >> { %v2451_v28 = vsel %vm2143_vm3, %v2442_v2, %v2450_v52  ;;  %v2496_v51 = vsel %vm2143_vm3, %v2488_v15, %v2495_v33  ;;  %3901 = vmatmul.bf16.gmra.mxu1 %v2481_v61  ;;  %v4942_v23 = vor.u32 %v6114_v38, %v4941_v56  ;;  %v877_v2 = vrot.slane %v7389_v35, 5 }
 0x170   : >> { %4711 = vmatmul.msk.bf16.gmra.mxu0 %vm1806_vm2, %v2451_v28  ;;  %v1165_v14 = vor.u32 %v1164_v11, %v1161_v30  ;;  %3990 = vmatmul.bf16.gmra.mxu2 %v2496_v51  ;;  %v2500_v5 = vshll.u32 %v2085_v10, 16  ;;  %v850_v63 = vpack.c.b16 %v834_v50, %v834_v50  ;;  %v2499_v12 = vrot.slane %v2497_v47, 3  ;;  %v6166_v30 = vpop.f32.mrf.mxu2  ;;  %v1061_v10 = vpop.permute.xlu0 %1060 }
 0x171   : >> { %v2506_v54 = vrot.slane %v2504_v17, 3  ;;  %v2509_v13 = vrot.slane %v2507_v44, 4  ;;  %v1647_v38 = vshrl.u32 %v6141_v21, 16  ;;  %v1650_v56 = vshll.u32 %v6141_v21, 16  ;;  %v6172_v47 = vpop.f32.mrf.mxu0  ;;  %v6174_v17 = vpop.f32.mrf.mxu1 }
 0x172   : >> { %v2012_v16 = vsel %vm1806_vm2, %v1165_v14, %v1365_v59  ;;  %v2010_v52 = vsel %vm1806_vm2, %v1165_v14, %v1363_v37  ;;  %v878_v15 = vrot.slane %v850_v63, 5  ;;  %v1919_v59 = vsel %vm1806_vm2, %v877_v2, %v1059_v43  ;;  %v7392_v63 = vld [vmem:[#allocation27_spill] sm:$0xff] }
 0x173   : >> { %v2566_v33 = vshrl.u32 %v2012_v16, 16  ;;  %v2569_v37 = vshll.u32 %v2012_v16, 16  ;;  %v2559_v60 = vshrl.u32 %v2010_v52, 16  ;;  %v7391_v44 = vunpack.c.h.b16 %v7390_v20 }
 0x174   : >> { %1086 = vrot.lane.b32.xlu1 %v4942_v23, %s5068_s25  ;;  %v2562_v11 = vshll.u32 %v2010_v52, 16  ;;  %v1649_v61 = vrot.slane %v1647_v38, 4  ;;  %v1652_v51 = vrot.slane %v1650_v56, 5  ;;  %v879_v14 = vsel %vm861_vm1, %v877_v2, %v878_v15  ;;  %v497_v2 = vld [vmem:[#allocation2 + $0x6c] sm:$0x1]  ;;  %v1367_v32 = vpop.permute.xlu1 %1366 }
 0x175   : >> { %v1513_v28 = vpack.c.b16 %v7391_v44, %v7391_v44  ;;  %v2502_v50 = vrot.slane %v2500_v5, 4  ;;  %v1922_v23 = vsel %vm1806_vm2, %v879_v14, %v1061_v10  ;;  %v2544_v35 = vshrl.u32 %v1919_v59, 16  ;;  %v6197_v10 = vld [vmem:[#allocation2 + $0xe4] sm:$0xff]   ;;  %v441_v14 = vld [vmem:[#allocation2 + $0xec] sm:$0x1] }
 0x176   : >> { %1386 = vrot.lane.b32.xlu2 %v1327_v48, %s5068_s25  ;;  %v2547_v43 = vshll.u32 %v1919_v59, 16  ;;  %v1653_v16 = vor.u32 %v1652_v51, %v1649_v61  ;;  %v4946_v53 = vor.u32 %v7392_v63, %v4945_v39  ;;  %v6185_v58 = vrot.slane %v2566_v33, 3  ;;  %7393 = vst [vmem:[#allocation6_spill] sm:$0xff] %v6197_v10  ;;  %v6199_v39 = vld [vmem:[#allocation2 + $0xe0] sm:$0xf0]  }
 0x177   : >> { %v2551_v52 = vshrl.u32 %v1922_v23, 16  ;;  %v6188_v38 = vsel %vm1806_vm2, %v1513_v28, %v1689_v62  ;;  %v6190_v5 = vrot.slane %v2569_v37, 4  ;;  %v6192_v56 = vrot.slane %v2559_v60, 3  ;;  %v4949_v51 = vld [vmem:[#allocation2 + $0xc0] sm:$0x8] }
 0x178   : >> { %v6194_v48 = vrot.slane %v2562_v11, 4  ;;  %1702 = vrot.lane.b32.xlu0 %v1653_v16, %s5068_s25  ;;  %v2554_v15 = vshll.u32 %v1922_v23, 16  ;;  %v2546_v59 = vrot.slane %v2544_v35, 3  ;;  %v2549_v33 = vrot.slane %v2547_v43, 4  ;;  %v6208_v9 = vpop.f32.mrf.mxu2  ;;  %v6210_v35 = vpop.f32.mrf.mxu3 }
 0x179   : >> { %v2503_v44 = vor.u32 %v2502_v50, %v2499_v12  ;;  %v2510_v61 = vor.u32 %v2509_v13, %v2506_v54  ;;  %v6202_v28 = vsel %vm1806_vm2, %v4946_v53, %v1689_v62  ;;  %v2581_v37 = vshrl.u32 %v6188_v38, 16  ;;  %7394 = vst [vmem:[#allocation16_spill] sm:$0xff] %v6208_v9  ;;  %v6214_v43 = vpop.f32.mrf.mxu0 }
 0x17a   : >> { %v1730_v60 = vunpack.c.l.b16 %v497_v2  ;;  %v1770_v11 = vrot.slane %v5651_v36, 5  ;;  %v2553_v16 = vrot.slane %v2551_v52, 3  ;;  %v2584_v23 = vshll.u32 %v6188_v38, 16  ;;  %7395 = vst [vmem:[#allocation8_spill] sm:$0xff] %v6210_v35  ;;  %v6216_v52 = vpop.f32.mrf.mxu1 }
 0x17b   : >> { %v2511_v63 = vsel %vm2143_vm3, %v2503_v44, %v2510_v61  ;;  %v999_v54 = vunpack.c.h.b16 %v6197_v10  ;;  %v2556_v13 = vrot.slane %v2554_v15, 4  ;;  %v2574_v36 = vshrl.u32 %v6202_v28, 16 }
 0x17c   : >> { %4079 = vmatmul.bf16.gmra.mxu3 %v2511_v63  ;;  %v1746_v12 = vpack.c.b16 %v1730_v60, %v1730_v60  ;;  %v2513_v62 = vshrl.u32 %v1770_v11, 16  ;;  %v2516_v53 = vshll.u32 %v1770_v11, 16  ;;  %v1275_v50 = vunpack.c.l.b16 %v441_v14 }
 0x17d   : >> { %v4950_v61 = vor.u32 %v6029_v26, %v4949_v51  ;;  %v1167_v60 = vshrl.u32 %v5661_v4, 16  ;;  %v1170_v63 = vshll.u32 %v5661_v4, 16  ;;  %v2577_v9 = vshll.u32 %v6202_v28, 16 }
 0x17e   : >> { %v1771_v38 = vrot.slane %v1746_v12, 5  ;;  %v2515_v2 = vrot.slane %v2513_v62, 3  ;;  %v2518_v44 = vrot.slane %v2516_v53, 4  ;;  %v1291_v35 = vpack.c.b16 %v1275_v50, %v1275_v50  ;;  %v440_v50 = vld [vmem:[#allocation2 + $0xdc] sm:$0x1] }
 0x17f   : >> { %v1333_v14 = vrot.slane %v6197_v10, 5  ;;  %v2550_v21 = vor.u32 %v2549_v33, %v2546_v59  ;;  %1082 = vrot.lane.b32.xlu2 %v4950_v61, %s5068_s25  ;;  %v1169_v26 = vrot.slane %v1167_v60, 4  ;;  %v1172_v51 = vrot.slane %v1170_v63, 5  ;;  %v6232_v61 = vld [vmem:[%s5719_s6] ss:$0 sm:$0xff]  ;;  %v1369_v60 = vpop.permute.xlu2 %1368 }
 0x180   : >> { %v1772_v15 = vsel %vm861_vm1, %v1770_v11, %v1771_v38  ;;  %v1334_v62 = vrot.slane %v1291_v35, 5  ;;  %v2557_v53 = vor.u32 %v2556_v13, %v2553_v16  ;;  %v2565_v4 = vor.u32 %v6194_v48, %v6192_v56  ;;  %v4953_v11 = vld [vmem:[#allocation2 + $0xe0] sm:$0x8] }
 0x181   : >> { %v2521_v7 = vshrl.u32 %v1772_v15, 16  ;;  %v2524_v12 = vshll.u32 %v1772_v15, 16  ;;  %1394 = vrot.lane.b32.xlu0 %v1333_v14, %s5068_s25  ;;  %v2572_v28 = vor.u32 %v6190_v5, %v6185_v58  ;;  %v2519_v59 = vor.u32 %v2518_v44, %v2515_v2  ;;  %v6237_v58 = vpop.f32.mrf.mxu2  ;;  %v6239_v5 = vpop.f32.mrf.mxu3  ;;  %v4957_v13 = vld [vmem:[#allocation2 + $0x80] sm:$0x8] }
 0x182   : >> { %v1335_v15 = vsel %vm861_vm1, %v1333_v14, %v1334_v62  ;;  %v1173_v35 = vor.u32 %v1172_v51, %v1169_v26  ;;  %v2558_v16 = vsel %vm2143_vm3, %v2550_v21, %v2557_v53  ;;  %7396 = vst [vmem:[#allocation20_spill] sm:$0xff] %v6237_v58  ;;  %v6243_v2 = vadd.f32 %v6232_v61, %v6135_v6  ;;  %v3798_v51 = vpop.f32.mrf.mxu0  ;;  %v6248_v53 = vpop.f32.mrf.mxu1 }
 0x183   : >> { %v2523_v33 = vrot.slane %v2521_v7, 3  ;;  %v2526_v38 = vrot.slane %v2524_v12, 4  ;;  %1396 = vrot.lane.b32.xlu1 %v1335_v15, %s5068_s25  ;;  %v2573_v56 = vsel %vm2143_vm3, %v2565_v4, %v2572_v28  ;;  %3906 = vmatmul.bf16.gmra.mxu1 %v2558_v16  ;;  %7397 = vst [vmem:[#allocation19_spill] sm:$0xff] %v6239_v5  ;;  %v1274_v7 = vunpack.c.l.b16 %v440_v50  ;;  %v370_v4 = vld [vmem:[#allocation2 + $0x6c] sm:$0x1] }
 0x184   : >> { %3995 = vmatmul.bf16.gmra.mxu2 %v2573_v56  ;;  %v2583_v44 = vrot.slane %v2581_v37, 3  ;;  %v2586_v63 = vrot.slane %v2584_v23, 4  ;;  %v2017_v14 = vsel %vm1806_vm2, %v1173_v35, %v1369_v60  ;;  %v2576_v21 = vrot.slane %v2574_v36, 3  ;;  %v1691_v36 = vpop.permute.xlu0 %1690 }
 0x185   : >> { %v2527_v48 = vor.u32 %v2526_v38, %v2523_v33  ;;  %v2579_v12 = vrot.slane %v2577_v9, 4  ;;  %v2015_v26 = vsel %vm1806_vm2, %v1173_v35, %v1367_v32  ;;  %v4954_v28 = vor.u32 %v6199_v39, %v4953_v11  ;;  %v1063_v11 = vpop.permute.xlu1 %1062 }
 0x186   : >> { %v1290_v6 = vpack.c.b16 %v1274_v7, %v1274_v7  ;;  %v1033_v50 = vpack.c.b16 %v999_v54, %v999_v54  ;;  %v6254_v37 = vadd.f32 %v6232_v61, %v6166_v30  ;;  %v6258_v9 = vadd.f32 %v6232_v61, %v6172_v47 }
 0x187   : >> { %v2528_v62 = vsel %vm2143_vm3, %v2519_v59, %v2527_v48  ;;  %v6262_v32 = vadd.f32 %v6232_v61, %v6174_v17  ;;  %v2643_v23 = vshrl.u32 %v2017_v14, 16  ;;  %v2646_v59 = vshll.u32 %v2017_v14, 16 }
 0x188   : >> { %4712 = vmatmul.msk.bf16.gmra.mxu0 %vm1806_vm2, %v2528_v62  ;;  %7398 = vst [vmem:[#allocation21_spill] sm:$0xff] %v6254_v37  ;;  %v2636_v33 = vshrl.u32 %v2015_v26, 16  ;;  %v1331_v39 = vrot.slane %v1290_v6, 5  ;;  %v835_v54 = vunpack.c.l.b16 %v370_v4  ;;  %v2639_v38 = vshll.u32 %v2015_v26, 16  ;;  %v6291_v62 = vld [vmem:[#allocation2 + $0xf4] sm:$0xff]  }
 0x189   : >> { %7399 = vst [vmem:[#allocation18_spill] sm:$0xff] %v6262_v32  ;;  %1090 = vrot.lane.b32.xlu0 %v4954_v28, %s5068_s25  ;;  %v880_v30 = vrot.slane %v5270_v3, 5  ;;  %v2580_v15 = vor.u32 %v2579_v12, %v2576_v21  ;;  %v2587_v35 = vor.u32 %v2586_v63, %v2583_v44  ;;  %v6268_v47 = vadd.f32 %v6232_v61, %v6214_v43  ;;  %v498_v63 = vld [vmem:[#allocation2 + $0x7c] sm:$0x1]  ;;  %v6300_v6 = vpop.f32.mrf.mxu2 }
 0x18a   : >> { %v7400_v17 = vrot.slane %v6112_v40, 5  ;;  %v4958_v16 = vor.u32 %v5686_v27, %v4957_v13  ;;  %v7401_v56 = vunpack.c.h.b16 %v5684_v24  ;;  %v6280_v3 = vadd.f32 %v6232_v61, %v6216_v52  ;;  %v1065_v13 = vpop.permute.xlu2 %1064  ;;  %v6293_v52 = vld [vmem:[#allocation2 + $0xf0] sm:$0xf0]   ;;  %7403 = vst [vmem:[#allocation22_spill] sm:$0xff] %v6300_v6 }
 0x18b   : >> { %1092 = vrot.lane.b32.xlu1 %v1033_v50, %s5068_s25  ;;  %v6284_v43 = vadd.f32 %v6232_v61, %v3798_v51  ;;  %v851_v7 = vpack.c.b16 %v835_v54, %v835_v54  ;;  %v1925_v44 = vsel %vm1806_vm2, %v880_v30, %v1063_v11  ;;  %v6287_v14 = vrot.slane %v2643_v23, 3  ;;  %v6302_v50 = vpop.f32.mrf.mxu3  ;;  %v442_v54 = vld [vmem:[#allocation2 + $0xfc] sm:$0x1] }
 0x18c   : >> { %v1332_v60 = vsel %vm861_vm1, %v7400_v17, %v1331_v39  ;;  %v1515_v48 = vpack.c.b16 %v7401_v56, %v7401_v56  ;;  %7402 = vst [vmem:[#allocation17_spill] sm:$0xff] %v6280_v3  ;;  %v6289_v27 = vrot.slane %v2646_v59, 4  ;;  %v2621_v21 = vshrl.u32 %v1925_v44, 16 }
 0x18d   : >> { %1392 = vrot.lane.b32.xlu2 %v1332_v60, %s5068_s25  ;;  %v2624_v12 = vshll.u32 %v1925_v44, 16  ;;  %v6295_v26 = vrot.slane %v2636_v33, 3  ;;  %v6297_v4 = vrot.slane %v2639_v38, 4  ;;  %v881_v51 = vrot.slane %v851_v7, 5  ;;  %7404 = vst [vmem:[#allocation23_spill] sm:$0xff] %v6302_v50 }
 0x18e   : >> { %v2588_v28 = vsel %vm2143_vm3, %v2580_v15, %v2587_v35  ;;  %v6305_v23 = vsel %vm1806_vm2, %v4958_v16, %v1691_v36  ;;  %v6308_v59 = vsel %vm1806_vm2, %v1515_v48, %v1691_v36  ;;  %v1731_v39 = vunpack.c.l.b16 %v498_v63  ;;  %v6312_v15 = vpop.f32.mrf.mxu0  ;;  %v6314_v35 = vpop.f32.mrf.mxu1 }
 0x18f   : >> { %4084 = vmatmul.bf16.gmra.mxu3 %v2588_v28  ;;  %v1773_v33 = vrot.slane %v7390_v20, 5  ;;  %v882_v11 = vsel %vm861_vm1, %v880_v30, %v881_v51  ;;  %v2623_v38 = vrot.slane %v2621_v21, 3  ;;  %v2626_v17 = vrot.slane %v2624_v12, 4  ;;  %v1371_v20 = vpop.permute.xlu0 %1370 }
 0x190   : >> { %v1928_v60 = vsel %vm1806_vm2, %v882_v11, %v1065_v13  ;;  %v1747_v16 = vpack.c.b16 %v1731_v39, %v1731_v39  ;;  %v1002_v44 = vunpack.c.h.b16 %v6291_v62  ;;  %v1276_v63 = vunpack.c.l.b16 %v442_v54 }
 0x191   : >> { %v2590_v56 = vshrl.u32 %v1773_v33, 16  ;;  %v2593_v7 = vshll.u32 %v1773_v33, 16  ;;  %v2628_v36 = vshrl.u32 %v1928_v60, 16  ;;  %v2631_v48 = vshll.u32 %v1928_v60, 16 }
 0x192   : >> { %v1774_v28 = vrot.slane %v1747_v16, 5  ;;  %v7405_v21 = vunpack.c.h.b16 %v6112_v40  ;;  %v1292_v6 = vpack.c.b16 %v1276_v63, %v1276_v63  ;;  %v2658_v13 = vshrl.u32 %v6308_v59, 16 }
 0x193   : >> { %v2592_v50 = vrot.slane %v2590_v56, 3  ;;  %v2595_v30 = vrot.slane %v2593_v7, 4  ;;  %v2630_v51 = vrot.slane %v2628_v36, 3  ;;  %v2633_v5 = vrot.slane %v2631_v48, 4 }
 0x194   : >> { %v1031_v12 = vpack.c.b16 %v7405_v21, %v7405_v21  ;;  %v2661_v39 = vshll.u32 %v6308_v59, 16  ;;  %v1775_v11 = vsel %vm861_vm1, %v1773_v33, %v1774_v28  ;;  %v7309_v56 = vrot.slane %v6291_v62, 5  ;;  %v6333_v33 = vpop.f32.mrf.mxu2  ;;  %v6335_v28 = vpop.f32.mrf.mxu3 }
 0x195   : >> { %v2596_v60 = vor.u32 %v2595_v30, %v2592_v50  ;;  %v2598_v54 = vshrl.u32 %v1775_v11, 16  ;;  %v2601_v16 = vshll.u32 %v1775_v11, 16  ;;  %v1337_v7 = vrot.slane %v1292_v6, 5  ;;  %7406 = vst [vmem:[#allocation24_spill] sm:$0xff] %v6333_v33  ;;  %v6337_v6 = vld [vmem:[#allocation2 + $0x104] sm:$0xff]  }
 0x196   : >> { %1088 = vrot.lane.b32.xlu2 %v1031_v12, %s5068_s25  ;;  %v1175_v58 = vshrl.u32 %v5764_v57, 16  ;;  %v1178_v36 = vshll.u32 %v5764_v57, 16  ;;  %v2627_v48 = vor.u32 %v2626_v17, %v2623_v38  ;;  %v2634_v63 = vor.u32 %v2633_v5, %v2630_v51  ;;  %7407 = vst [vmem:[#allocation25_spill] sm:$0xff] %v6335_v28  ;;  %v6339_v30 = vld [vmem:[#allocation2 + $0x100] sm:$0xf0]   ;;  %v3803_v11 = vpop.f32.mrf.mxu0 }
 0x197   : >> { %v2600_v21 = vrot.slane %v2598_v54, 3  ;;  %v2603_v37 = vrot.slane %v2601_v16, 4  ;;  %v1338_v59 = vsel %vm861_vm1, %v7309_v56, %v1337_v7  ;;  %v2642_v50 = vor.u32 %v6297_v4, %v6295_v26  ;;  %7408 = vst [vmem:[#allocation4_spill] sm:$0xff] %v6337_v6  ;;  %v3825_v54 = vpop.f32.mrf.mxu1  ;;  %v4961_v16 = vld [vmem:[#allocation2 + $0x90] sm:$0x8] }
 0x198   : >> { %7409 = vst [vmem:[#allocation7_spill] sm:$0xff] %v6339_v30  ;;  %1400 = vrot.lane.b32.xlu0 %v1338_v59, %s5068_s25  ;;  %v1177_v57 = vrot.slane %v1175_v58, 4  ;;  %v1180_v5 = vrot.slane %v1178_v36, 5  ;;  %v2635_v38 = vsel %vm2143_vm3, %v2627_v48, %v2634_v63  ;;  %v2649_v17 = vor.u32 %v6289_v27, %v6287_v14  ;;  %v1067_v59 = vpop.permute.xlu0 %1066  ;;  %v6407_v28 = vld [vmem:[#allocation2 + $0xf0] sm:$0xf0]  }
 0x199   : >> { %v6347_v26 = vadd.f32 %v6232_v61, %v6248_v53  ;;  %v2651_v4 = vshrl.u32 %v6305_v23, 16  ;;  %v2654_v12 = vshll.u32 %v6305_v23, 16  ;;  %v2604_v51 = vor.u32 %v2603_v37, %v2600_v21  ;;  %3911 = vmatmul.bf16.gmra.mxu1 %v2635_v38  ;;  %v1373_v53 = vpop.permute.xlu1 %1372  ;;  %v1693_v38 = vpop.permute.xlu2 %1692  ;;  %7417 = vst [vmem:[#allocation32_spill] sm:$0xff] %v6407_v28 }
 0x19a   : >> { %v1181_v58 = vor.u32 %v1180_v5, %v1177_v57  ;;  %v2650_v7 = vsel %vm2143_vm3, %v2642_v50, %v2649_v17  ;;  %v2660_v48 = vrot.slane %v2658_v13, 3  ;;  %v2663_v14 = vrot.slane %v2661_v39, 4  ;;  %v371_v17 = vld [vmem:[#allocation2 + $0x7c] sm:$0x1] }
 0x19b   : >> { %7410 = vst [vmem:[#allocation26_spill] sm:$0xff] %v6347_v26  ;;  %v2605_v27 = vsel %vm2143_vm3, %v2596_v60, %v2604_v51  ;;  %4000 = vmatmul.bf16.gmra.mxu2 %v2650_v7  ;;  %v883_v63 = vrot.slane %v5353_v25, 5  ;;  %v1035_v23 = vpack.c.b16 %v1002_v44, %v1002_v44  ;;  %v2653_v21 = vrot.slane %v2651_v4, 3 }
 0x19c   : >> { %4713 = vmatmul.msk.bf16.gmra.mxu0 %vm1806_vm2, %v2605_v27  ;;  %v2020_v37 = vsel %vm1806_vm2, %v1181_v58, %v1371_v20  ;;  %v2656_v57 = vrot.slane %v2654_v12, 4  ;;  %v6359_v50 = vadd.f32 %v6232_v61, %v6312_v15  ;;  %v2022_v13 = vsel %vm1806_vm2, %v1181_v58, %v1373_v53  ;;  %v6379_v36 = vpop.f32.mrf.mxu3 }
 0x19d   : >> { %v1663_v39 = vshrl.u32 %v6337_v6, 16  ;;  %v1666_v60 = vshll.u32 %v6337_v6, 16  ;;  %v1931_v25 = vsel %vm1806_vm2, %v883_v63, %v1067_v59  ;;  %v4962_v5 = vor.u32 %v5909_v18, %v4961_v16  ;;  %v499_v59 = vld [vmem:[#allocation2 + $0x8c] sm:$0x1]  ;;  %7413 = vst [vmem:[#allocation29_spill] sm:$0xff] %v6379_v36 }
 0x19e   : >> { %v6368_v44 = vadd.f32 %v6232_v61, %v6314_v35  ;;  %v2713_v20 = vshrl.u32 %v2020_v37, 16  ;;  %v2716_v4 = vshll.u32 %v2020_v37, 16  ;;  %v6371_v15 = vadd.f32 %v6232_v61, %v3803_v11  ;;  %v6377_v35 = vpop.f32.mrf.mxu2 }
 0x19f   : >> { %v2720_v12 = vshrl.u32 %v2022_v13, 16  ;;  %v2723_v51 = vshll.u32 %v2022_v13, 16  ;;  %v1665_v58 = vrot.slane %v1663_v39, 4  ;;  %v1668_v7 = vrot.slane %v1666_v60, 5  ;;  %7412 = vst [vmem:[#allocation28_spill] sm:$0xff] %v6377_v35  ;;  %v6392_v56 = vpop.f32.mrf.mxu1 }
 0x1a0   : >> { %7411 = vst [vmem:[#allocation27_spill] sm:$0xff] %v6368_v44  ;;  %1096 = vrot.lane.b32.xlu0 %v1035_v23, %s5068_s25  ;;  %v2698_v27 = vshrl.u32 %v1931_v25, 16  ;;  %v6375_v18 = vsel %vm1806_vm2, %v4962_v5, %v1693_v38  ;;  %v836_v16 = vunpack.c.l.b16 %v371_v17  ;;  %v2657_v53 = vor.u32 %v2656_v57, %v2653_v21  ;;  %v6390_v57 = vpop.f32.mrf.mxu0 }
 0x1a1   : >> { %v1669_v37 = vor.u32 %v1668_v7, %v1665_v58  ;;  %v6382_v11 = vadd.f32 %v6232_v61, %v3825_v54  ;;  %v2701_v13 = vshll.u32 %v1931_v25, 16  ;;  %v7415_v23 = vunpack.c.h.b16 %v5907_v22 }
 0x1a2   : >> { %v6387_v60 = vrot.slane %v2713_v20, 3  ;;  %v2728_v5 = vshrl.u32 %v6375_v18, 16  ;;  %v852_v17 = vpack.c.b16 %v836_v16, %v836_v16  ;;  %v2664_v21 = vor.u32 %v2663_v14, %v2660_v48  ;;  %v6405_v14 = vld [vmem:[#allocation2 + $0xf4] sm:$0xff]  }
 0x1a3   : >> { %7414 = vst [vmem:[#allocation30_spill] sm:$0xff] %v6382_v11  ;;  %v1517_v39 = vpack.c.b16 %v7415_v23, %v7415_v23  ;;  %v6394_v36 = vrot.slane %v2716_v4, 4  ;;  %v6396_v58 = vrot.slane %v2720_v12, 3  ;;  %v6398_v54 = vrot.slane %v2723_v51, 4  ;;  %1706 = vrot.lane.b32.xlu1 %v1669_v37, %s5068_s25  ;;  %v1069_v23 = vpop.permute.xlu1 %1068 }
 0x1a4   : >> { %v1732_v25 = vunpack.c.l.b16 %v499_v59  ;;  %v6401_v7 = vrot.slane %v2698_v27, 3  ;;  %v884_v20 = vrot.slane %v852_v17, 5  ;;  %v2665_v16 = vsel %vm2143_vm3, %v2657_v53, %v2664_v21  ;;  %7416 = vst [vmem:[#allocation31_spill] sm:$0xff] %v6405_v14  ;;  %v6414_v53 = vld [vmem:[#allocation2 + $0x104] sm:$0xff]   ;;  %v6424_v26 = vpop.f32.mrf.mxu3 }
 0x1a5   : >> { %v1776_v48 = vrot.slane %v5684_v24, 5  ;;  %v2703_v4 = vrot.slane %v2701_v13, 4  ;;  %v2102_v12 = vsel %vm1806_vm2, %v1517_v39, %v1693_v38  ;;  %v2731_v51 = vshll.u32 %v6375_v18, 16  ;;  %4089 = vmatmul.bf16.gmra.mxu3 %v2665_v16  ;;  %v6416_v24 = vld [vmem:[#allocation2 + $0x100] sm:$0xf0]   ;;  %v1375_v38 = vpop.permute.xlu2 %1374  ;;  %7419 = vst [vmem:[#allocation34_spill] sm:$0xff] %v6424_v26 }
 0x1a6   : >> { %v1748_v37 = vpack.c.b16 %v1732_v25, %v1732_v25  ;;  %v6411_v59 = vrot.slane %v2728_v5, 3  ;;  %v885_v27 = vsel %vm861_vm1, %v883_v63, %v884_v20  ;;  %v2735_v20 = vshrl.u32 %v2102_v12, 16  ;;  %v6422_v6 = vpop.f32.mrf.mxu2 }
 0x1a7   : >> { %v2667_v17 = vshrl.u32 %v1776_v48, 16  ;;  %v2670_v35 = vshll.u32 %v1776_v48, 16  ;;  %v1934_v21 = vsel %vm1806_vm2, %v885_v27, %v1069_v23  ;;  %7418 = vst [vmem:[#allocation33_spill] sm:$0xff] %v6422_v6  ;;  %v1658_v27 = vshll.u32 %v6405_v14, 16  ;;  %v3830_v63 = vpop.f32.mrf.mxu1 }
 0x1a8   : >> { %v1777_v33 = vrot.slane %v1748_v37, 5  ;;  %v2705_v39 = vshrl.u32 %v1934_v21, 16  ;;  %v2708_v18 = vshll.u32 %v1934_v21, 16  ;;  %v1655_v37 = vshrl.u32 %v6405_v14, 16  ;;  %v1377_v21 = vpop.permute.xlu0 %1376  ;;  %v4965_v14 = vld [vmem:[#allocation2 + $0x100] sm:$0x8] }
 0x1a9   : >> { %v2669_v16 = vrot.slane %v2667_v17, 3  ;;  %v2672_v25 = vrot.slane %v2670_v35, 4  ;;  %v2738_v17 = vshll.u32 %v2102_v12, 16  ;;  %v1660_v3 = vrot.slane %v1658_v27, 5 }
 0x1aa   : >> { %v1778_v5 = vsel %vm861_vm1, %v1776_v48, %v1777_v33  ;;  %v2707_v11 = vrot.slane %v2705_v39, 3  ;;  %v2710_v44 = vrot.slane %v2708_v18, 4  ;;  %v1183_v33 = vshrl.u32 %v5850_v46, 16  ;;  %v3808_v48 = vpop.f32.mrf.mxu0 }
 0x1ab   : >> { %v2675_v30 = vshrl.u32 %v1778_v5, 16  ;;  %v2678_v23 = vshll.u32 %v1778_v5, 16  ;;  %v2673_v35 = vor.u32 %v2672_v25, %v2669_v16  ;;  %v1657_v18 = vrot.slane %v1655_v37, 4  ;;  %v372_v25 = vld [vmem:[#allocation2 + $0x8c] sm:$0x1] }
 0x1ac   : >> { %v7316_v6 = vrot.slane %v6414_v53, 5  ;;  %v1185_v28 = vrot.slane %v1183_v33, 4  ;;  %v1186_v5 = vshll.u32 %v5850_v46, 16  ;;  %v2704_v26 = vor.u32 %v2703_v4, %v6401_v7  ;;  %v6468_v33 = vpop.f32.mrf.mxu3 }
 0x1ad   : >> { %v2677_v13 = vrot.slane %v2675_v30, 3  ;;  %v2680_v39 = vrot.slane %v2678_v23, 4  ;;  %v2711_v32 = vor.u32 %v2710_v44, %v2707_v11  ;;  %v1661_v12 = vor.u32 %v1660_v3, %v1657_v18  ;;  %v4969_v11 = vld [vmem:[#allocation2 + $0xa0] sm:$0x8] }
 0x1ae   : >> { %1402 = vrot.lane.b32.xlu1 %v7316_v6, %s5068_s25  ;;  %v2719_v30 = vor.u32 %v6394_v36, %v6387_v60  ;;  %v2726_v16 = vor.u32 %v6398_v54, %v6396_v58  ;;  %v6439_v23 = vrot.slane %v2731_v51, 4  ;;  %v6441_v46 = vrot.slane %v2735_v20, 3  ;;  %v1071_v60 = vpop.permute.xlu2 %1070 }
 0x1af   : >> { %v2681_v10 = vor.u32 %v2680_v39, %v2677_v13  ;;  %v1188_v7 = vrot.slane %v1186_v5, 5  ;;  %v2712_v44 = vsel %vm2143_vm3, %v2704_v26, %v2711_v32  ;;  %v6444_v3 = vrot.slane %v2738_v17, 4  ;;  %1704 = vrot.lane.b32.xlu2 %v1661_v12, %s5068_s25  ;;  %v7420_v26 = vld [vmem:[#allocation3_spill] sm:$0xff] }
 0x1b0   : >> { %3916 = vmatmul.bf16.gmra.mxu1 %v2712_v44  ;;  %v2727_v36 = vsel %vm2143_vm3, %v2719_v30, %v2726_v16  ;;  %v6452_v58 = vadd.f32 %v6232_v61, %v6390_v57  ;;  %v837_v32 = vunpack.c.l.b16 %v372_v25  ;;  %v886_v51 = vrot.slane %v7420_v26, 5 }
 0x1b1   : >> { %v2682_v4 = vsel %vm2143_vm3, %v2673_v35, %v2681_v10  ;;  %v1189_v54 = vor.u32 %v1188_v7, %v1185_v28  ;;  %4005 = vmatmul.bf16.gmra.mxu2 %v2727_v36  ;;  %v6457_v10 = vadd.f32 %v6232_v61, %v6392_v56  ;;  %v4966_v13 = vor.u32 %v6416_v24, %v4965_v14  ;;  %v6466_v35 = vpop.f32.mrf.mxu2  ;;  %v1073_v14 = vpop.permute.xlu0 %1072 }
 0x1b2   : >> { %4714 = vmatmul.msk.bf16.gmra.mxu0 %vm1806_vm2, %v2682_v4  ;;  %v7421_v20 = vunpack.c.h.b16 %v5866_v19  ;;  %v853_v17 = vpack.c.b16 %v837_v32, %v837_v32  ;;  %v1937_v28 = vsel %vm1806_vm2, %v886_v51, %v1071_v60  ;;  %v4970_v16 = vor.u32 %v5868_v8, %v4969_v11  ;;  %v1695_v4 = vpop.permute.xlu1 %1694 }
 0x1b3   : >> { %v2027_v27 = vsel %vm1806_vm2, %v1189_v54, %v1377_v21  ;;  %v2025_v57 = vsel %vm1806_vm2, %v1189_v54, %v1375_v38  ;;  %v2775_v12 = vshrl.u32 %v1937_v28, 16  ;;  %v2778_v30 = vshll.u32 %v1937_v28, 16  ;;  %v6471_v21 = vpop.f32.mrf.mxu0  ;;  %v3882_v38 = vpop.f32.mrf.mxu1 }
 0x1b4   : >> { %v1519_v37 = vpack.c.b16 %v7421_v20, %v7421_v20  ;;  %v2797_v39 = vshrl.u32 %v2027_v27, 16  ;;  %v2800_v56 = vshll.u32 %v2027_v27, 16  ;;  %v2790_v18 = vshrl.u32 %v2025_v57, 16 }
 0x1b5   : >> { %v2793_v5 = vshll.u32 %v2025_v57, 16  ;;  %v887_v24 = vrot.slane %v853_v17, 5  ;;  %v6477_v7 = vadd.f32 %v6232_v61, %v3808_v48  ;;  %v6480_v44 = vadd.f32 %v6232_v61, %v3830_v63 }
 0x1b6   : >> { %v6473_v25 = vrot.slane %v2797_v39, 3  ;;  %1098 = vrot.lane.b32.xlu1 %v4966_v13, %s5068_s25  ;;  %v2734_v36 = vor.u32 %v6439_v23, %v6411_v59  ;;  %v6484_v60 = vrot.slane %v2800_v56, 4  ;;  %v6486_v8 = vrot.slane %v2790_v18, 3  ;;  %v500_v59 = vld [vmem:[#allocation2 + $0x9c] sm:$0x1] }
 0x1b7   : >> { %v888_v11 = vsel %vm861_vm1, %v886_v51, %v887_v24  ;;  %v2105_v54 = vsel %vm1806_vm2, %v4970_v16, %v1695_v4  ;;  %v6490_v32 = vrot.slane %v2793_v5, 4  ;;  %v7422_v48 = vrot.slane %v6291_v62, 5 }
 0x1b8   : >> { %v1940_v63 = vsel %vm1806_vm2, %v888_v11, %v1073_v14  ;;  %v2777_v26 = vrot.slane %v2775_v12, 3  ;;  %v2107_v13 = vsel %vm1806_vm2, %v1519_v37, %v1695_v4  ;;  %v2780_v27 = vrot.slane %v2778_v30, 4  ;;  %v6501_v14 = vld [vmem:[#allocation2 + $0x114] sm:$0xff]  }
 0x1b9   : >> { %1398 = vrot.lane.b32.xlu2 %v7422_v48, %s5068_s25  ;;  %v2782_v23 = vshrl.u32 %v1940_v63, 16  ;;  %v2785_v20 = vshll.u32 %v1940_v63, 16  ;;  %v2805_v57 = vshrl.u32 %v2105_v54, 16  ;;  %v2808_v17 = vshll.u32 %v2105_v54, 16  ;;  %v6503_v12 = vld [vmem:[#allocation2 + $0x110] sm:$0xf0]   ;;  %v6517_v63 = vpop.f32.mrf.mxu3 }
 0x1ba   : >> { %v2812_v51 = vshrl.u32 %v2107_v13, 16  ;;  %v2815_v28 = vshll.u32 %v2107_v13, 16  ;;  %v2741_v39 = vor.u32 %v6444_v3, %v6441_v46  ;;  %v1733_v24 = vunpack.c.l.b16 %v500_v59  ;;  %v4973_v48 = vld [vmem:[#allocation2 + $0xf0] sm:$0x8]  ;;  %v3971_v13 = vpop.f32.mrf.mxu2 }
 0x1bb   : >> { %v2784_v56 = vrot.slane %v2782_v23, 3  ;;  %v2787_v18 = vrot.slane %v2785_v20, 4  ;;  %v6499_v5 = vrot.slane %v2805_v57, 3  ;;  %v6505_v37 = vrot.slane %v2808_v17, 4 }
 0x1bc   : >> { %v6507_v16 = vrot.slane %v2812_v51, 3  ;;  %v6509_v30 = vrot.slane %v2815_v28, 4  ;;  %v2742_v4 = vsel %vm2143_vm3, %v2734_v36, %v2741_v39  ;;  %v2803_v46 = vor.u32 %v6484_v60, %v6473_v25  ;;  %v3884_v60 = vpop.f32.mrf.mxu1 }
 0x1bd   : >> { %v2796_v3 = vor.u32 %v6490_v32, %v6486_v8  ;;  %4094 = vmatmul.bf16.gmra.mxu3 %v2742_v4  ;;  %v1749_v11 = vpack.c.b16 %v1733_v24, %v1733_v24  ;;  %v1779_v54 = vrot.slane %v5907_v22, 5  ;;  %v2788_v59 = vor.u32 %v2787_v18, %v2784_v56  ;;  %v6522_v8 = vpop.f32.mrf.mxu0  ;;  %v1379_v4 = vpop.permute.xlu1 %1378 }
 0x1be   : >> { %v2781_v23 = vor.u32 %v2780_v27, %v2777_v26  ;;  %v3883_v32 = vadd.f32 %v3882_v38, %v6258_v9  ;;  %v1191_v51 = vshrl.u32 %v5918_v49, 16  ;;  %v4974_v18 = vor.u32 %v6293_v52, %v4973_v48  ;;  %v443_v9 = vld [vmem:[#allocation2 + $0x10c] sm:$0x1]  ;;  %v4977_v52 = vld [vmem:[#allocation2 + $0xb0] sm:$0x8] }
 0x1bf   : >> { %v1780_v36 = vrot.slane %v1749_v11, 5  ;;  %v2744_v57 = vshrl.u32 %v1779_v54, 16  ;;  %v2747_v17 = vshll.u32 %v1779_v54, 16  ;;  %v1671_v25 = vshrl.u32 %v6501_v14, 16 }
 0x1c0   : >> { %v1193_v24 = vrot.slane %v1191_v51, 4  ;;  %v1674_v20 = vshll.u32 %v6501_v14, 16  ;;  %v1194_v22 = vshll.u32 %v5918_v49, 16  ;;  %v6538_v51 = vadd.f32 %v6232_v61, %v6471_v21  ;;  %v373_v49 = vld [vmem:[#allocation2 + $0x9c] sm:$0x1] }
 0x1c1   : >> { %v1781_v26 = vsel %vm861_vm1, %v1779_v54, %v1780_v36  ;;  %v2746_v27 = vrot.slane %v2744_v57, 3  ;;  %v2749_v28 = vrot.slane %v2747_v17, 4  ;;  %1094 = vrot.lane.b32.xlu2 %v4974_v18, %s5068_s25  ;;  %v1381_v54 = vpop.permute.xlu2 %1380  ;;  %v2789_v36 = vsel %vm2143_vm3, %v2781_v23, %v2788_v59  ;;  %v1697_v59 = vpop.permute.xlu0 %1696 }
 0x1c2   : >> { %v2752_v39 = vshrl.u32 %v1781_v26, 16  ;;  %v2755_v56 = vshll.u32 %v1781_v26, 16  ;;  %v2804_v57 = vsel %vm2143_vm3, %v2796_v3, %v2803_v46  ;;  %v1673_v48 = vrot.slane %v1671_v25, 4  ;;  %3921 = vmatmul.bf16.gmra.mxu1 %v2789_v36  ;;  %v501_v46 = vld [vmem:[#allocation2 + $0xac] sm:$0x1]  ;;  %v3973_v21 = vpop.f32.mrf.mxu2  ;;  %v6548_v25 = vpop.f32.mrf.mxu3 }
 0x1c3   : >> { %v2750_v11 = vor.u32 %v2749_v28, %v2746_v27  ;;  %v1676_v17 = vrot.slane %v1674_v20, 5  ;;  %v1196_v26 = vrot.slane %v1194_v22, 5  ;;  %4010 = vmatmul.bf16.gmra.mxu2 %v2804_v57  ;;  %v6540_v28 = vadd.f32 %v3971_v13, %v3883_v32  ;;  %v7424_v32 = vld [vmem:[#allocation9_spill] sm:$0xff] }
 0x1c4   : >> { %v2754_v38 = vrot.slane %v2752_v39, 3  ;;  %v2757_v6 = vrot.slane %v2755_v56, 4  ;;  %v1277_v39 = vunpack.c.l.b16 %v443_v9  ;;  %v6543_v56 = vadd.f32 %v3884_v60, %v6268_v47 }
 0x1c5   : >> { %v1677_v3 = vor.u32 %v1676_v17, %v1673_v48  ;;  %v1197_v23 = vor.u32 %v1196_v26, %v1193_v24  ;;  %v7423_v20 = vunpack.c.h.b16 %v5936_v45  ;;  %v838_v13 = vunpack.c.l.b16 %v373_v49  ;;  %v6559_v36 = vpop.f32.mrf.mxu0 }
 0x1c6   : >> { %v2758_v27 = vor.u32 %v2757_v6, %v2754_v38  ;;  %v1293_v6 = vpack.c.b16 %v1277_v39, %v1277_v39  ;;  %v889_v18 = vrot.slane %v7424_v32, 5  ;;  %v4978_v24 = vor.u32 %v5938_v1, %v4977_v52  ;;  %v6557_v38 = vpop.f32.mrf.mxu1 }
 0x1c7   : >> { %v1521_v61 = vpack.c.b16 %v7423_v20, %v7423_v20  ;;  %1708 = vrot.lane.b32.xlu0 %v1677_v3, %s5068_s25  ;;  %v2032_v47 = vsel %vm1806_vm2, %v1197_v23, %v1381_v54  ;;  %v2030_v60 = vsel %vm1806_vm2, %v1197_v23, %v1379_v4  ;;  %v1734_v9 = vunpack.c.l.b16 %v501_v46  ;;  %v1075_v46 = vpop.permute.xlu1 %1074 }
 0x1c8   : >> { %v2759_v22 = vsel %vm2143_vm3, %v2750_v11, %v2758_v27  ;;  %v2874_v11 = vshrl.u32 %v2032_v47, 16  ;;  %v2877_v57 = vshll.u32 %v2032_v47, 16  ;;  %v2867_v48 = vshrl.u32 %v2030_v60, 16 }
 0x1c9   : >> { %4715 = vmatmul.msk.bf16.gmra.mxu0 %vm1806_vm2, %v2759_v22  ;;  %v2870_v17 = vshll.u32 %v2030_v60, 16  ;;  %v1340_v26 = vrot.slane %v1293_v6, 5  ;;  %v2110_v49 = vsel %vm1806_vm2, %v4978_v24, %v1697_v59  ;;  %v2112_v27 = vsel %vm1806_vm2, %v1521_v61, %v1697_v59  ;;  %v1077_v47 = vpop.permute.xlu2 %1076 }
 0x1ca   : >> { %v854_v39 = vpack.c.b16 %v838_v13, %v838_v13  ;;  %v6563_v54 = vrot.slane %v2874_v11, 3  ;;  %v6565_v4 = vrot.slane %v2877_v57, 4  ;;  %v6567_v1 = vrot.slane %v2867_v48, 3 }
 0x1cb   : >> { %v6569_v52 = vrot.slane %v2870_v17, 4  ;;  %v7425_v3 = vrot.slane %v6414_v53, 5  ;;  %v2882_v20 = vshrl.u32 %v2110_v49, 16  ;;  %v2885_v22 = vshll.u32 %v2110_v49, 16 }
 0x1cc   : >> { %v2889_v6 = vshrl.u32 %v2112_v27, 16  ;;  %v2880_v59 = vor.u32 %v6565_v4, %v6563_v54  ;;  %v2892_v13 = vshll.u32 %v2112_v27, 16  ;;  %v890_v32 = vrot.slane %v854_v39, 5 }
 0x1cd   : >> { %v1341_v23 = vsel %vm861_vm1, %v7425_v3, %v1340_v26  ;;  %v2873_v61 = vor.u32 %v6569_v52, %v6567_v1  ;;  %v6579_v60 = vrot.slane %v2882_v20, 3  ;;  %v6581_v24 = vrot.slane %v2885_v22, 4  ;;  %v6589_v1 = vpop.permute.xlu0 %1382  ;;  %v3976_v20 = vpop.f32.mrf.mxu2  ;;  %v6615_v22 = vld [vmem:[%s6120_s9] ss:$0 sm:$0xff] }
 0x1ce   : >> { %1404 = vrot.lane.b32.xlu2 %v1341_v23, %s5068_s25  ;;  %v6583_v11 = vrot.slane %v2889_v6, 3  ;;  %v1943_v57 = vsel %vm1806_vm2, %v889_v18, %v1075_v46  ;;  %v6586_v48 = vrot.slane %v2892_v13, 4  ;;  %v891_v17 = vsel %vm861_vm1, %v889_v18, %v890_v32  ;;  %v4062_v18 = vpop.f32.mrf.mxu3 }
 0x1cf   : >> { %v2852_v26 = vshrl.u32 %v1943_v57, 16  ;;  %v2855_v49 = vshll.u32 %v1943_v57, 16  ;;  %v1946_v39 = vsel %vm1806_vm2, %v891_v17, %v1077_v47  ;;  %v7426_v52 = vor.u32 %v6509_v30, %v6507_v16  ;;  %v1385_v4 = vpop.permute.xlu1 %1384 }
 0x1d0   : >> { %v7427_v3 = vor.u32 %v6505_v37, %v6499_v5  ;;  %v1750_v23 = vpack.c.b16 %v1734_v9, %v1734_v9  ;;  %v2859_v6 = vshrl.u32 %v1946_v39, 16  ;;  %v2862_v13 = vshll.u32 %v1946_v39, 16  ;;  %v3889_v5 = vpop.f32.mrf.mxu1  ;;  %v6605_v37 = vpop.f32.mrf.mxu0 }
 0x1d1   : >> { %v2854_v32 = vrot.slane %v2852_v26, 3  ;;  %v2857_v57 = vrot.slane %v2855_v49, 4  ;;  %v1782_v47 = vrot.slane %v5866_v19, 5  ;;  %v3974_v16 = vadd.f32 %v3973_v21, %v6543_v56 }
 0x1d2   : >> { %v2819_v46 = vsel %vm2143_vm3, %v7427_v3, %v7426_v52  ;;  %v1783_v17 = vrot.slane %v1750_v23, 5  ;;  %v2861_v30 = vrot.slane %v2859_v6, 3  ;;  %v2864_v9 = vrot.slane %v2862_v13, 4 }
 0x1d3   : >> { %4099 = vmatmul.bf16.gmra.mxu3 %v2819_v46  ;;  %v4061_v52 = vadd.f32 %v6548_v25, %v6540_v28  ;;  %v7428_v3 = vunpack.c.h.b16 %v6414_v53  ;;  %v2858_v39 = vor.u32 %v2857_v57, %v2854_v32  ;;  %v2821_v19 = vshrl.u32 %v1782_v47, 16 }
 0x1d4   : >> { %v1784_v49 = vsel %vm861_vm1, %v1782_v47, %v1783_v17  ;;  %v2824_v46 = vshll.u32 %v1782_v47, 16  ;;  %v2865_v23 = vor.u32 %v2864_v9, %v2861_v30  ;;  %v3888_v25 = vadd.f32 %v6557_v38, %v6284_v43 }
 0x1d5   : >> { %v1037_v26 = vpack.c.b16 %v7428_v3, %v7428_v3  ;;  %v2829_v27 = vshrl.u32 %v1784_v49, 16  ;;  %v2832_v56 = vshll.u32 %v1784_v49, 16  ;;  %v4150_v21 = vadd.f32 %v6522_v8, %v4061_v52  ;;  %v4981_v52 = vld [vmem:[#allocation2 + $0xc0] sm:$0x8] }
 0x1d6   : >> { %v2823_v6 = vrot.slane %v2821_v19, 3  ;;  %v2826_v28 = vrot.slane %v2824_v46, 4  ;;  %v1199_v13 = vshrl.u32 %v5982_v34, 16  ;;  %v1202_v3 = vshll.u32 %v5982_v34, 16  ;;  %v374_v19 = vld [vmem:[#allocation2 + $0xac] sm:$0x1] }
 0x1d7   : >> { %1100 = vrot.lane.b32.xlu2 %v1037_v26, %s5068_s25  ;;  %v2831_v32 = vrot.slane %v2829_v27, 3  ;;  %v2834_v57 = vrot.slane %v2832_v56, 4  ;;  %v4229_v17 = vmax.f32 %v4150_v21, 0.0  ;;  %v4263_v47 = vmin.f32 %v4150_v21, 0.0  ;;  %v1079_v27 = vpop.permute.xlu0 %1078  ;;  %v6634_v21 = vpop.f32.mrf.mxu3 }
 0x1d8   : >> { %v2827_v30 = vor.u32 %v2826_v28, %v2823_v6  ;;  %v1201_v9 = vrot.slane %v1199_v13, 4  ;;  %v2866_v8 = vsel %vm2143_vm3, %v2858_v39, %v2865_v23  ;;  %v2881_v43 = vsel %vm2143_vm3, %v2873_v61, %v2880_v59  ;;  %v3978_v23 = vpop.f32.mrf.mxu2  ;;  %v3892_v28 = vpop.f32.mrf.mxu1 }
 0x1d9   : >> { %v2835_v49 = vor.u32 %v2834_v57, %v2831_v32  ;;  %v4298_v26 = vmul.f32 %v6615_v22, %v4263_v47  ;;  %3926 = vmatmul.bf16.gmra.mxu1 %v2866_v8  ;;  %v6628_v38 = vadd.f32 %v3976_v20, %v3888_v25  ;;  %v1204_v46 = vrot.slane %v1202_v3, 5  ;;  %4015 = vmatmul.bf16.gmra.mxu2 %v2881_v43  ;;  %v1699_v20 = vpop.permute.xlu2 %1698  ;;  %v6645_v25 = vpop.f32.mrf.mxu0 }
 0x1da   : >> { %v4063_v56 = vadd.f32 %v4062_v18, %v3974_v16  ;;  %v6631_v34 = vadd.f32 %v3889_v5, %v6359_v50  ;;  %v892_v39 = vrot.slane %v5302_v31, 5  ;;  %v7429_v59 = vunpack.c.h.b16 %v6097_v41 }
 0x1db   : >> { %v2836_v6 = vsel %vm2143_vm3, %v2827_v30, %v2835_v49  ;;  %v4330_v54 = vadd.f32 %v4298_v26, %v4229_v17  ;;  %v1205_v18 = vor.u32 %v1204_v46, %v1201_v9  ;;  %v839_v5 = vunpack.c.l.b16 %v374_v19 }
 0x1dc   : >> { %v1523_v61 = vpack.c.b16 %v7429_v59, %v7429_v59  ;;  %4716 = vmatmul.msk.bf16.gmra.mxu0 %vm1806_vm2, %v2836_v6  ;;  %v4152_v50 = vadd.f32 %v6559_v36, %v4063_v56  ;;  %v1949_v16 = vsel %vm1806_vm2, %v892_v39, %v1079_v27  ;;  %v4982_v17 = vor.u32 %v6099_v42, %v4981_v52 }
 0x1dd   : >> { %v4362_v13 = vpack.c.bf16 %v4330_v54, %v4330_v54  ;;  %v2929_v32 = vshrl.u32 %v1949_v16, 16  ;;  %v2932_v57 = vshll.u32 %v1949_v16, 16  ;;  %v2035_v47 = vsel %vm1806_vm2, %v1205_v18, %v6589_v1 }
 0x1de   : >> { %v2037_v30 = vsel %vm1806_vm2, %v1205_v18, %v1385_v4  ;;  %v4230_v9 = vmax.f32 %v4152_v50, 0.0  ;;  %v4264_v36 = vmin.f32 %v4152_v50, 0.0  ;;  %v2944_v3 = vshrl.u32 %v2035_v47, 16  ;;  %v502_v18 = vld [vmem:[#allocation2 + $0xbc] sm:$0x1] }
 0x1df   : >> { %4394 = vst.msk [vmem:[#allocation2 + $0x14] sm:$0xf] %vm199_vm0, %v4362_v13  ;;  %v2947_v8 = vshll.u32 %v2035_v47, 16  ;;  %v2951_v49 = vshrl.u32 %v2037_v30, 16  ;;  %v2954_v26 = vshll.u32 %v2037_v30, 16  ;;  %v6653_v27 = vrot.slane %v2929_v32, 3 }
 0x1e0   : >> { %v4299_v43 = vmul.f32 %v6615_v22, %v4264_v36  ;;  %v6655_v19 = vrot.slane %v2932_v57, 4  ;;  %v2115_v42 = vsel %vm1806_vm2, %v4982_v17, %v1699_v20  ;;  %v6658_v52 = vrot.slane %v2944_v3, 3  ;;  %v3981_v36 = vpop.f32.mrf.mxu2  ;;  %v4067_v3 = vpop.f32.mrf.mxu3 }
 0x1e1   : >> { %v2949_v1 = vrot.slane %v2947_v8, 4  ;;  %v2953_v46 = vrot.slane %v2951_v49, 3  ;;  %v2956_v56 = vrot.slane %v2954_v26, 4  ;;  %v2117_v4 = vsel %vm1806_vm2, %v1523_v61, %v1699_v20  ;;  %v1081_v49 = vpop.permute.xlu1 %1080 }
 0x1e2   : >> { %v4331_v6 = vadd.f32 %v4299_v43, %v4230_v9  ;;  %v2935_v54 = vor.u32 %v6655_v19, %v6653_v27  ;;  %v2959_v59 = vshrl.u32 %v2115_v42, 16  ;;  %v2962_v13 = vshll.u32 %v2115_v42, 16  ;;  %v6677_v42 = vpop.permute.xlu2 %1386 }
 0x1e3   : >> { %v2950_v50 = vor.u32 %v2949_v1, %v6658_v52  ;;  %v2957_v16 = vor.u32 %v2956_v56, %v2953_v46  ;;  %v2966_v32 = vshrl.u32 %v2117_v4, 16  ;;  %v2969_v47 = vshll.u32 %v2117_v4, 16  ;;  %v3894_v56 = vpop.f32.mrf.mxu1 }
 0x1e4   : >> { %v4363_v57 = vpack.c.bf16 %v4331_v6, %v4331_v6  ;;  %v6664_v17 = vrot.slane %v2959_v59, 3  ;;  %v855_v30 = vpack.c.b16 %v839_v5, %v839_v5  ;;  %v6666_v9 = vrot.slane %v2962_v13, 4 }
 0x1e5   : >> { %v6668_v8 = vrot.slane %v2966_v32, 3  ;;  %v7430_v61 = vor.u32 %v6586_v48, %v6583_v11  ;;  %v7431_v20 = vor.u32 %v6581_v24, %v6579_v60  ;;  %v1735_v43 = vunpack.c.l.b16 %v502_v18  ;;  %v6684_v11 = vpop.f32.mrf.mxu0 }
 0x1e6   : >> { %4395 = vst.msk [vmem:[#allocation2 + $0x18] sm:$0xf] %vm199_vm0, %v4363_v57  ;;  %v6680_v5 = vrot.slane %v2969_v47, 4  ;;  %v893_v52 = vrot.slane %v855_v30, 5  ;;  %v1785_v1 = vrot.slane %v5936_v45, 5  ;;  %v3979_v46 = vadd.f32 %v3978_v23, %v6631_v34 }
 0x1e7   : >> { %v2896_v26 = vsel %vm2143_vm3, %v7431_v20, %v7430_v61  ;;  %v2965_v60 = vor.u32 %v6666_v9, %v6664_v17  ;;  %v1751_v24 = vpack.c.b16 %v1735_v43, %v1735_v43  ;;  %v4066_v48 = vadd.f32 %v6634_v21, %v6628_v38  ;;  %v1389_v61 = vpop.permute.xlu0 %1388 }
 0x1e8   : >> { %4104 = vmatmul.bf16.gmra.mxu3 %v2896_v26  ;;  %v3893_v6 = vadd.f32 %v3892_v28, %v6371_v15  ;;  %v2972_v4 = vor.u32 %v6680_v5, %v6668_v8  ;;  %v894_v45 = vsel %vm861_vm1, %v892_v39, %v893_v52  ;;  %v2898_v34 = vshrl.u32 %v1785_v1, 16 }
 0x1e9   : >> { %v2901_v23 = vshll.u32 %v1785_v1, 16  ;;  %v1952_v59 = vsel %vm1806_vm2, %v894_v45, %v1081_v49  ;;  %v1786_v18 = vrot.slane %v1751_v24, 5  ;;  %v4155_v13 = vadd.f32 %v6605_v37, %v4066_v48  ;;  %v375_v48 = vld [vmem:[#allocation2 + $0xbc] sm:$0x1] }
 0x1ea   : >> { %v1207_v32 = vshrl.u32 %v6027_v0, 16  ;;  %v2936_v57 = vshrl.u32 %v1952_v59, 16  ;;  %v2939_v38 = vshll.u32 %v1952_v59, 16  ;;  %v2900_v21 = vrot.slane %v2898_v34, 3  ;;  %v4985_v59 = vld [vmem:[#allocation2 + $0xd0] sm:$0x8] }
 0x1eb   : >> { %v2903_v15 = vrot.slane %v2901_v23, 4  ;;  %v1787_v28 = vsel %vm861_vm1, %v1785_v1, %v1786_v18  ;;  %v4231_v47 = vmax.f32 %v4155_v13, 0.0  ;;  %v4265_v30 = vmin.f32 %v4155_v13, 0.0  ;;  %v6705_v18 = vpop.f32.mrf.mxu2  ;;  %v6707_v13 = vpop.f32.mrf.mxu3 }
 0x1ec   : >> { %v1209_v31 = vrot.slane %v1207_v32, 4  ;;  %v2938_v39 = vrot.slane %v2936_v57, 3  ;;  %v2941_v20 = vrot.slane %v2939_v38, 4  ;;  %v2906_v43 = vshrl.u32 %v1787_v28, 16 }
 0x1ed   : >> { %v2904_v26 = vor.u32 %v2903_v15, %v2900_v21  ;;  %v2909_v49 = vshll.u32 %v1787_v28, 16  ;;  %v4300_v52 = vmul.f32 %v6615_v22, %v4265_v30  ;;  %v1210_v37 = vshll.u32 %v6027_v0, 16  ;;  %v1083_v0 = vpop.permute.xlu2 %1082 }
 0x1ee   : >> { %v2958_v24 = vsel %vm2143_vm3, %v2950_v50, %v2957_v16  ;;  %v2942_v45 = vor.u32 %v2941_v20, %v2938_v39  ;;  %v2908_v34 = vrot.slane %v2906_v43, 3  ;;  %v6703_v1 = vadd.f32 %v3981_v36, %v3893_v6  ;;  %v6720_v6 = vpop.f32.mrf.mxu0 }
 0x1ef   : >> { %4020 = vmatmul.bf16.gmra.mxu2 %v2958_v24  ;;  %v4068_v23 = vadd.f32 %v4067_v3, %v3979_v46  ;;  %v2911_v32 = vrot.slane %v2909_v49, 4  ;;  %v4332_v57 = vadd.f32 %v4300_v52, %v4231_v47  ;;  %v1212_v38 = vrot.slane %v1210_v37, 5  ;;  %v6718_v46 = vpop.f32.mrf.mxu1  ;;  %v1085_v37 = vpop.permute.xlu0 %1084 }
 0x1f0   : >> { %v6710_v21 = vadd.f32 %v3894_v56, %v6452_v58  ;;  %v2943_v50 = vsel %vm2143_vm3, %v2935_v54, %v2942_v45  ;;  %v840_v36 = vunpack.c.l.b16 %v375_v48  ;;  %v895_v3 = vrot.slane %v5298_v29, 5 }
 0x1f1   : >> { %v4157_v16 = vadd.f32 %v6645_v25, %v4068_v23  ;;  %v2912_v15 = vor.u32 %v2911_v32, %v2908_v34  ;;  %v4364_v28 = vpack.c.bf16 %v4332_v57, %v4332_v57  ;;  %v1213_v47 = vor.u32 %v1212_v38, %v1209_v31  ;;  %3931 = vmatmul.bf16.gmra.mxu1 %v2943_v50  ;;  %v1701_v38 = vpop.permute.xlu1 %1700 }
 0x1f2   : >> { %v856_v30 = vpack.c.b16 %v840_v36, %v840_v36  ;;  %v1955_v27 = vsel %vm1806_vm2, %v895_v3, %v1083_v0  ;;  %v4986_v57 = vor.u32 %v6057_v55, %v4985_v59  ;;  %v503_v0 = vld [vmem:[#allocation2 + $0xcc] sm:$0x1]  ;;  %v2973_v59 = vsel %vm2143_vm3, %v2965_v60, %v2972_v4 }
 0x1f3   : >> { %v4232_v58 = vmax.f32 %v4157_v16, 0.0  ;;  %v4266_v56 = vmin.f32 %v4157_v16, 0.0  ;;  %v2913_v19 = vsel %vm2143_vm3, %v2904_v26, %v2912_v15  ;;  %4396 = vst.msk [vmem:[#allocation2 + $0x24] sm:$0xf] %vm199_vm0, %v4364_v28  ;;  %v2042_v25 = vsel %vm1806_vm2, %v1213_v47, %v1389_v61  ;;  %v7432_v15 = vld [vmem:[#allocation13_spill] sm:$0xff] }
 0x1f4   : >> { %v2040_v29 = vsel %vm1806_vm2, %v1213_v47, %v6677_v42  ;;  %v3006_v54 = vshrl.u32 %v1955_v27, 16  ;;  %4717 = vmatmul.msk.bf16.gmra.mxu0 %vm1806_vm2, %v2913_v19  ;;  %v3028_v39 = vshrl.u32 %v2042_v25, 16  ;;  %v3031_v31 = vshll.u32 %v2042_v25, 16 }
 0x1f5   : >> { %v3021_v20 = vshrl.u32 %v2040_v29, 16  ;;  %v3024_v43 = vshll.u32 %v2040_v29, 16  ;;  %v4301_v49 = vmul.f32 %v6615_v22, %v4266_v56  ;;  %v896_v52 = vrot.slane %v856_v30, 5  ;;  %v3986_v56 = vpop.f32.mrf.mxu2  ;;  %v4072_v30 = vpop.f32.mrf.mxu3 }
 0x1f6   : >> { %v6730_v24 = vrot.slane %v3006_v54, 3  ;;  %v3009_v26 = vshll.u32 %v1955_v27, 16  ;;  %v3030_v48 = vrot.slane %v3028_v39, 3  ;;  %v3033_v45 = vrot.slane %v3031_v31, 4  ;;  %v6748_v39 = vpop.f32.mrf.mxu0 }
 0x1f7   : >> { %v3023_v61 = vrot.slane %v3021_v20, 3  ;;  %v3026_v34 = vrot.slane %v3024_v43, 4  ;;  %v4333_v23 = vadd.f32 %v4301_v49, %v4232_v58  ;;  %v897_v42 = vsel %vm861_vm1, %v895_v3, %v896_v52  ;;  %v3899_v54 = vpop.f32.mrf.mxu1 }
 0x1f8   : >> { %v3011_v32 = vrot.slane %v3009_v26, 4  ;;  %v3034_v50 = vor.u32 %v3033_v45, %v3030_v48  ;;  %v1958_v36 = vsel %vm1806_vm2, %v897_v42, %v1085_v37  ;;  %v7433_v28 = vunpack.c.h.b16 %v7432_v15  ;;  %4109 = vmatmul.bf16.gmra.mxu3 %v2973_v59 }
 0x1f9   : >> { %v3027_v16 = vor.u32 %v3026_v34, %v3023_v61  ;;  %v4365_v27 = vpack.c.bf16 %v4333_v23, %v4333_v23  ;;  %v3013_v19 = vshrl.u32 %v1958_v36, 16  ;;  %v3016_v58 = vshll.u32 %v1958_v36, 16 }
 0x1fa   : >> { %v1525_v47 = vpack.c.b16 %v7433_v28, %v7433_v28  ;;  %v3012_v3 = vor.u32 %v3011_v32, %v6730_v24  ;;  %v2120_v25 = vsel %vm1806_vm2, %v4986_v57, %v1701_v38  ;;  %v1736_v29 = vunpack.c.l.b16 %v503_v0  ;;  %v1391_v28 = vpop.permute.xlu1 %1390 }
 0x1fb   : >> { %4397 = vst.msk [vmem:[#allocation2 + $0x28] sm:$0xf] %vm199_vm0, %v4365_v27  ;;  %v3015_v31 = vrot.slane %v3013_v19, 3  ;;  %v3018_v20 = vrot.slane %v3016_v58, 4  ;;  %v3036_v43 = vshrl.u32 %v2120_v25, 16  ;;  %v3039_v49 = vshll.u32 %v2120_v25, 16 }
 0x1fc   : >> { %v2122_v55 = vsel %vm1806_vm2, %v1525_v47, %v1701_v38  ;;  %v1752_v24 = vpack.c.b16 %v1736_v29, %v1736_v29  ;;  %v1788_v8 = vrot.slane %v6097_v41, 5  ;;  %v3984_v60 = vadd.f32 %v6705_v18, %v6710_v21 }
 0x1fd   : >> { %v3043_v52 = vshrl.u32 %v2122_v55, 16  ;;  %v3046_v37 = vshll.u32 %v2122_v55, 16  ;;  %v3019_v5 = vor.u32 %v3018_v20, %v3015_v31  ;;  %v6752_v17 = vrot.slane %v3036_v43, 3  ;;  %v6776_v27 = vpop.f32.mrf.mxu2  ;;  %v6778_v19 = vpop.f32.mrf.mxu3 }
 0x1fe   : >> { %v6754_v9 = vrot.slane %v3039_v49, 4  ;;  %v1789_v48 = vrot.slane %v1752_v24, 5  ;;  %v2975_v45 = vshrl.u32 %v1788_v8, 16  ;;  %v2978_v34 = vshll.u32 %v1788_v8, 16  ;;  %v1393_v43 = vpop.permute.xlu2 %1392 }
 0x1ff   : >> { %v6758_v4 = vrot.slane %v3043_v52, 3  ;;  %v6760_v26 = vrot.slane %v3046_v37, 4  ;;  %v4071_v41 = vadd.f32 %v6707_v13, %v6703_v1  ;;  %v3898_v23 = vadd.f32 %v6718_v46, %v6477_v7  ;;  %v4989_v46 = vld [vmem:[#allocation2 + $0xe0] sm:$0x8]  ;;  %v7434_v52 = vld [vmem:[#allocation14_spill] sm:$0xff] }
 0x200   : >> { %v3042_v61 = vor.u32 %v6754_v9, %v6752_v17  ;;  %v1790_v18 = vsel %vm861_vm1, %v1788_v8, %v1789_v48  ;;  %v2977_v21 = vrot.slane %v2975_v45, 3  ;;  %v1215_v32 = vshrl.u32 %v6112_v40, 16  ;;  %v1703_v8 = vpop.permute.xlu0 %1702  ;;  %v7436_v45 = vld [vmem:[#allocation15_spill] sm:$0xff] }
 0x201   : >> { %v3049_v42 = vor.u32 %v6760_v26, %v6758_v4  ;;  %v2980_v57 = vrot.slane %v2978_v34, 4  ;;  %v2983_v38 = vshrl.u32 %v1790_v18, 16  ;;  %v2986_v0 = vshll.u32 %v1790_v18, 16 }
 0x202   : >> { %v4160_v36 = vadd.f32 %v6684_v11, %v4071_v41  ;;  %v1217_v47 = vrot.slane %v1215_v32, 4  ;;  %v1218_v1 = vshll.u32 %v6112_v40, 16  ;;  %v3020_v13 = vsel %vm2143_vm3, %v3012_v3, %v3019_v5  ;;  %v376_v11 = vld [vmem:[#allocation2 + $0xcc] sm:$0x1]  ;;  %v6782_v3 = vpop.f32.mrf.mxu1 }
 0x203   : >> { %v3035_v7 = vsel %vm2143_vm3, %v3027_v16, %v3034_v50  ;;  %v2981_v58 = vor.u32 %v2980_v57, %v2977_v21  ;;  %v2985_v25 = vrot.slane %v2983_v38, 3  ;;  %v2988_v55 = vrot.slane %v2986_v0, 4  ;;  %3936 = vmatmul.bf16.gmra.mxu1 %v3020_v13  ;;  %v6784_v50 = vpop.f32.mrf.mxu0 }
 0x204   : >> { %v4233_v59 = vmax.f32 %v4160_v36, 0.0  ;;  %4025 = vmatmul.bf16.gmra.mxu2 %v3035_v7  ;;  %v4267_v29 = vmin.f32 %v4160_v36, 0.0  ;;  %v1220_v31 = vrot.slane %v1218_v1, 5  ;;  %v6780_v20 = vadd.f32 %v3986_v56, %v3898_v23  ;;  %v7437_v23 = vld [vmem:[#allocation5_spill] sm:$0xff] }
 0x205   : >> { %v4073_v40 = vadd.f32 %v4072_v30, %v3984_v60  ;;  %v2989_v16 = vor.u32 %v2988_v55, %v2985_v25  ;;  %v6787_v49 = vadd.f32 %v3899_v54, %v6538_v51  ;;  %v7435_v37 = vunpack.c.h.b16 %v7434_v52  ;;  %v1087_v55 = vpop.permute.xlu1 %1086 }
 0x206   : >> { %v4302_v5 = vmul.f32 %v6615_v22, %v4267_v29  ;;  %v1221_v48 = vor.u32 %v1220_v31, %v1217_v47  ;;  %v841_v30 = vunpack.c.l.b16 %v376_v11  ;;  %v4990_v34 = vor.u32 %v7436_v45, %v4989_v46  ;;  %v6814_v31 = vpop.f32.mrf.mxu2 }
 0x207   : >> { %v1527_v24 = vpack.c.b16 %v7435_v37, %v7435_v37  ;;  %v4162_v56 = vadd.f32 %v6720_v6, %v4073_v40  ;;  %v2990_v60 = vsel %vm2143_vm3, %v2981_v58, %v2989_v16  ;;  %v898_v51 = vrot.slane %v7437_v23, 5  ;;  %v6816_v40 = vpop.f32.mrf.mxu3 }
 0x208   : >> { %4718 = vmatmul.msk.bf16.gmra.mxu0 %vm1806_vm2, %v2990_v60  ;;  %v4334_v54 = vadd.f32 %v4302_v5, %v4233_v59  ;;  %v2047_v18 = vsel %vm1806_vm2, %v1221_v48, %v1393_v43  ;;  %v2045_v21 = vsel %vm1806_vm2, %v1221_v48, %v1391_v28  ;;  %v2125_v1 = vsel %vm1806_vm2, %v4990_v34, %v1703_v8 }
 0x209   : >> { %v2127_v41 = vsel %vm1806_vm2, %v1527_v24, %v1703_v8  ;;  %v4234_v32 = vmax.f32 %v4162_v56, 0.0  ;;  %v3105_v57 = vshrl.u32 %v2047_v18, 16  ;;  %v3108_v38 = vshll.u32 %v2047_v18, 16  ;;  %v504_v8 = vld [vmem:[#allocation2 + $0xdc] sm:$0x1]  ;;  %v1089_v18 = vpop.permute.xlu2 %1088 }
 0x20a   : >> { %v3098_v6 = vshrl.u32 %v2045_v21, 16  ;;  %v3101_v0 = vshll.u32 %v2045_v21, 16  ;;  %v4366_v36 = vpack.c.bf16 %v4334_v54, %v4334_v54  ;;  %v4268_v47 = vmin.f32 %v4162_v56, 0.0  ;;  %v6827_v45 = vpop.f32.mrf.mxu1 }
 0x20b   : >> { %v3120_v13 = vshrl.u32 %v2127_v41, 16  ;;  %v6802_v7 = vrot.slane %v3105_v57, 3  ;;  %v6804_v46 = vrot.slane %v3108_v38, 4  ;;  %v3113_v59 = vshrl.u32 %v2125_v1, 16  ;;  %v6829_v34 = vpop.f32.mrf.mxu0 }
 0x20c   : >> { %v6806_v58 = vrot.slane %v3098_v6, 3  ;;  %v6808_v25 = vrot.slane %v3101_v0, 4  ;;  %4398 = vst.msk [vmem:[#allocation2 + $0x34] sm:$0xf] %vm199_vm0, %v4366_v36  ;;  %v4303_v28 = vmul.f32 %v6615_v22, %v4268_v47  ;;  %v3116_v11 = vshll.u32 %v2125_v1, 16 }
 0x20d   : >> { %v6812_v29 = vrot.slane %v3120_v13, 3  ;;  %v3111_v16 = vor.u32 %v6804_v46, %v6802_v7  ;;  %v3123_v37 = vshll.u32 %v2127_v41, 16  ;;  %v857_v24 = vpack.c.b16 %v841_v30, %v841_v30  ;;  %v1395_v41 = vpop.permute.xlu0 %1394  ;;  %v7440_v46 = vld [vmem:[#allocation18_spill] sm:$0xff] }
 0x20e   : >> { %v3104_v43 = vor.u32 %v6808_v25, %v6806_v58  ;;  %v4335_v5 = vadd.f32 %v4303_v28, %v4234_v32  ;;  %v6822_v48 = vrot.slane %v3113_v59, 3  ;;  %v6824_v56 = vrot.slane %v3116_v11, 4 }
 0x20f   : >> { %v1961_v60 = vsel %vm1806_vm2, %v898_v51, %v1087_v55  ;;  %v6831_v23 = vrot.slane %v3123_v37, 4  ;;  %v899_v54 = vrot.slane %v857_v24, 5  ;;  %v3050_v38 = vsel %vm2143_vm3, %v3042_v61, %v3049_v42 }
 0x210   : >> { %v3083_v21 = vshrl.u32 %v1961_v60, 16  ;;  %v3086_v57 = vshll.u32 %v1961_v60, 16  ;;  %v4367_v30 = vpack.c.bf16 %v4335_v5, %v4335_v5  ;;  %v3119_v32 = vor.u32 %v6824_v56, %v6822_v48  ;;  %4114 = vmatmul.bf16.gmra.mxu3 %v3050_v38 }
 0x211   : >> { %v1737_v6 = vunpack.c.l.b16 %v504_v8  ;;  %v3126_v0 = vor.u32 %v6831_v23, %v6812_v29  ;;  %v900_v36 = vsel %vm861_vm1, %v898_v51, %v899_v54  ;;  %v1791_v4 = vrot.slane %v7432_v15, 5  ;;  %v7438_v15 = vld [vmem:[#allocation6_spill] sm:$0xff] }
 0x212   : >> { %v3085_v47 = vrot.slane %v3083_v21, 3  ;;  %v3088_v1 = vrot.slane %v3086_v57, 4  ;;  %4399 = vst.msk [vmem:[#allocation2 + $0x38] sm:$0xf] %vm199_vm0, %v4367_v30  ;;  %v1964_v13 = vsel %vm1806_vm2, %v900_v36, %v1089_v18  ;;  %v3989_v17 = vadd.f32 %v6776_v27, %v6787_v49  ;;  %v6858_v18 = vpop.f32.mrf.mxu2  ;;  %v6862_v36 = vpop.f32.mrf.mxu1 }
 0x213   : >> { %v1753_v55 = vpack.c.b16 %v1737_v6, %v1737_v6  ;;  %v3090_v9 = vshrl.u32 %v1964_v13, 16  ;;  %v3093_v26 = vshll.u32 %v1964_v13, 16  ;;  %v4076_v42 = vadd.f32 %v6778_v19, %v6780_v20  ;;  %v6860_v19 = vpop.f32.mrf.mxu3  ;;  %v4993_v6 = vld [vmem:[#allocation2 + $0xf0] sm:$0x8] }
 0x214   : >> { %v3089_v61 = vor.u32 %v3088_v1, %v3085_v47  ;;  %v3052_v28 = vshrl.u32 %v1791_v4, 16  ;;  %v3055_v59 = vshll.u32 %v1791_v4, 16  ;;  %v3903_v11 = vadd.f32 %v6782_v3, %v6243_v2  ;;  %v6864_v47 = vpop.f32.mrf.mxu0 }
 0x215   : >> { %v1792_v51 = vrot.slane %v1753_v55, 5  ;;  %v3092_v37 = vrot.slane %v3090_v9, 3  ;;  %v3095_v24 = vrot.slane %v3093_v26, 4  ;;  %v4165_v8 = vadd.f32 %v6748_v39, %v4076_v42  ;;  %v1091_v9 = vpop.permute.xlu0 %1090 }
 0x216   : >> { %v1223_v5 = vshrl.u32 %v7438_v15, 16  ;;  %v3054_v49 = vrot.slane %v3052_v28, 3  ;;  %v3057_v60 = vrot.slane %v3055_v59, 4  ;;  %v1226_v54 = vshll.u32 %v7438_v15, 16  ;;  %v7439_v28 = vld [vmem:[#allocation11_spill] sm:$0xff] }
 0x217   : >> { %v1793_v27 = vsel %vm861_vm1, %v1791_v4, %v1792_v51  ;;  %v3096_v20 = vor.u32 %v3095_v24, %v3092_v37  ;;  %v4235_v2 = vmax.f32 %v4165_v8, 0.0  ;;  %v4269_v30 = vmin.f32 %v4165_v8, 0.0  ;;  %v1397_v37 = vpop.permute.xlu1 %1396 }
 0x218   : >> { %v3060_v21 = vshrl.u32 %v1793_v27, 16  ;;  %v3063_v57 = vshll.u32 %v1793_v27, 16  ;;  %v3058_v3 = vor.u32 %v3057_v60, %v3054_v49  ;;  %v1225_v38 = vrot.slane %v1223_v5, 4 }
 0x219   : >> { %v1228_v39 = vrot.slane %v1226_v54, 5  ;;  %v3097_v55 = vsel %vm2143_vm3, %v3089_v61, %v3096_v20  ;;  %v3112_v4 = vsel %vm2143_vm3, %v3104_v43, %v3111_v16  ;;  %v4304_v26 = vmul.f32 %v6615_v22, %v4269_v30 }
 0x21a   : >> { %v3062_v1 = vrot.slane %v3060_v21, 3  ;;  %v3065_v13 = vrot.slane %v3063_v57, 4  ;;  %3941 = vmatmul.bf16.gmra.mxu1 %v3097_v55  ;;  %4030 = vmatmul.bf16.gmra.mxu2 %v3112_v4  ;;  %v6876_v51 = vadd.f32 %v6814_v31, %v3903_v11  ;;  %v901_v59 = vrot.slane %v7439_v28, 5  ;;  %v1705_v11 = vpop.permute.xlu2 %1704  ;;  %v377_v21 = vld [vmem:[#allocation2 + $0xdc] sm:$0x1]  ;;  %v7442_v4 = vld [vmem:[#allocation31_spill] sm:$0xff] }
 0x21b   : >> { %v1229_v42 = vor.u32 %v1228_v39, %v1225_v38  ;;  %v4078_v7 = vadd.f32 %v6816_v40, %v3989_v17  ;;  %v6882_v58 = vadd.f32 %v6827_v45, %v7440_v46  ;;  %v4336_v25 = vadd.f32 %v4304_v26, %v4235_v2  ;;  %v6903_v38 = vpop.f32.mrf.mxu2  ;;  %v6925_v46 = vpop.f32.mrf.mxu1 }
 0x21c   : >> { %v3066_v61 = vor.u32 %v3065_v13, %v3062_v1  ;;  %v1967_v31 = vsel %vm1806_vm2, %v901_v59, %v1091_v9  ;;  %v7441_v13 = vld [vmem:[#allocation32_spill] sm:$0xff]  ;;  %v7443_v9 = vunpack.c.h.b16 %v7442_v4 }
 0x21d   : >> { %v2050_v16 = vsel %vm1806_vm2, %v1229_v42, %v1395_v41  ;;  %v2052_v43 = vsel %vm1806_vm2, %v1229_v42, %v1397_v37  ;;  %v4368_v40 = vpack.c.bf16 %v4336_v25, %v4336_v25  ;;  %v4167_v17 = vadd.f32 %v6784_v50, %v4078_v7  ;;  %v505_v41 = vld [vmem:[#allocation2 + $0xec] sm:$0x1]  ;;  %v6905_v50 = vpop.f32.mrf.mxu3 }
 0x21e   : >> { %v3067_v24 = vsel %vm2143_vm3, %v3058_v3, %v3066_v61  ;;  %v3175_v8 = vshrl.u32 %v2050_v16, 16  ;;  %v3178_v15 = vshll.u32 %v2050_v16, 16  ;;  %v3182_v5 = vshrl.u32 %v2052_v43, 16 }
 0x21f   : >> { %4719 = vmatmul.msk.bf16.gmra.mxu0 %vm1806_vm2, %v3067_v24  ;;  %v3185_v45 = vshll.u32 %v2052_v43, 16  ;;  %v3160_v27 = vshrl.u32 %v1967_v31, 16  ;;  %v3163_v20 = vshll.u32 %v1967_v31, 16  ;;  %4400 = vst.msk [vmem:[#allocation2 + $0x44] sm:$0xf] %vm199_vm0, %v4368_v40  ;;  %v4236_v2 = vmax.f32 %v4167_v17, 0.0 }
 0x220   : >> { %v6892_v49 = vrot.slane %v3175_v8, 3  ;;  %v6894_v60 = vrot.slane %v3178_v15, 4  ;;  %v6896_v54 = vrot.slane %v3182_v5, 3  ;;  %v4270_v3 = vmin.f32 %v4167_v17, 0.0 }
 0x221   : >> { %v6899_v57 = vrot.slane %v3185_v45, 4  ;;  %v6901_v30 = vrot.slane %v3160_v27, 3  ;;  %v6909_v1 = vrot.slane %v3163_v20, 4  ;;  %v4994_v55 = vor.u32 %v7441_v13, %v4993_v6  ;;  %v6927_v6 = vpop.f32.mrf.mxu0 }
 0x222   : >> { %v3181_v39 = vor.u32 %v6894_v60, %v6892_v49  ;;  %v1529_v26 = vpack.c.b16 %v7443_v9, %v7443_v9  ;;  %v4305_v61 = vmul.f32 %v6615_v22, %v4270_v3  ;;  %v842_v37 = vunpack.c.l.b16 %v377_v21  ;;  %v6940_v17 = vpop.permute.xlu2 %1398 }
 0x223   : >> { %v3188_v42 = vor.u32 %v6899_v57, %v6896_v54  ;;  %v3127_v7 = vsel %vm2143_vm3, %v3119_v32, %v3126_v0  ;;  %v3166_v25 = vor.u32 %v6909_v1, %v6901_v30  ;;  %v2130_v16 = vsel %vm1806_vm2, %v4994_v55, %v1705_v11 }
 0x224   : >> { %v2132_v43 = vsel %vm1806_vm2, %v1529_v26, %v1705_v11  ;;  %4119 = vmatmul.bf16.gmra.mxu3 %v3127_v7  ;;  %v1738_v31 = vunpack.c.l.b16 %v505_v41  ;;  %v4337_v24 = vadd.f32 %v4305_v61, %v4236_v2  ;;  %v3190_v29 = vshrl.u32 %v2130_v16, 16  ;;  %v1093_v41 = vpop.permute.xlu1 %1092 }
 0x225   : >> { %v3193_v23 = vshll.u32 %v2130_v16, 16  ;;  %v3197_v8 = vshrl.u32 %v2132_v43, 16  ;;  %v3200_v48 = vshll.u32 %v2132_v43, 16  ;;  %v858_v56 = vpack.c.b16 %v842_v37, %v842_v37 }
 0x226   : >> { %v1754_v32 = vpack.c.b16 %v1738_v31, %v1738_v31  ;;  %v1794_v0 = vrot.slane %v7434_v52, 5  ;;  %v4369_v15 = vpack.c.bf16 %v4337_v24, %v4337_v24  ;;  %v6934_v5 = vrot.slane %v3190_v29, 3  ;;  %v6958_v31 = vpop.f32.mrf.mxu2  ;;  %v7444_v24 = vld [vmem:[#allocation17_spill] sm:$0xff] }
 0x227   : >> { %v6936_v40 = vrot.slane %v3193_v23, 4  ;;  %v6938_v45 = vrot.slane %v3197_v8, 3  ;;  %v6942_v11 = vrot.slane %v3200_v48, 4  ;;  %v902_v27 = vrot.slane %v858_v56, 5  ;;  %v6966_v56 = vpop.f32.mrf.mxu1 }
 0x228   : >> { %v1795_v20 = vrot.slane %v1754_v32, 5  ;;  %v3129_v21 = vshrl.u32 %v1794_v0, 16  ;;  %4401 = vst.msk [vmem:[#allocation2 + $0x48] sm:$0xf] %vm199_vm0, %v4369_v15  ;;  %v3132_v2 = vshll.u32 %v1794_v0, 16  ;;  %v3994_v3 = vadd.f32 %v6858_v18, %v6882_v58  ;;  %v6960_v18 = vpop.f32.mrf.mxu3 }
 0x229   : >> { %v3196_v52 = vor.u32 %v6936_v40, %v6934_v5  ;;  %v4081_v13 = vadd.f32 %v6860_v19, %v6876_v51  ;;  %v3203_v55 = vor.u32 %v6942_v11, %v6938_v45  ;;  %v903_v9 = vsel %vm861_vm1, %v901_v59, %v902_v27  ;;  %v1401_v59 = vpop.permute.xlu0 %1400  ;;  %v6968_v32 = vpop.f32.mrf.mxu0 }
 0x22a   : >> { %v1796_v26 = vsel %vm861_vm1, %v1794_v0, %v1795_v20  ;;  %v3131_v61 = vrot.slane %v3129_v21, 3  ;;  %v1970_v37 = vsel %vm1806_vm2, %v903_v9, %v1093_v41  ;;  %v3134_v7 = vrot.slane %v3132_v2, 4  ;;  %v378_v20 = vld [vmem:[#allocation2 + $0xec] sm:$0x1]  ;;  %v1095_v60 = vpop.permute.xlu2 %1094 }
 0x22b   : >> { %v3137_v16 = vshrl.u32 %v1796_v26, 16  ;;  %v3140_v43 = vshll.u32 %v1796_v26, 16  ;;  %v3167_v19 = vshrl.u32 %v1970_v37, 16  ;;  %v3170_v51 = vshll.u32 %v1970_v37, 16  ;;  %v4997_v37 = vld [vmem:[#allocation2 + $0x100] sm:$0x8] }
 0x22c   : >> { %v4170_v58 = vadd.f32 %v6829_v34, %v4081_v13  ;;  %v3908_v28 = vadd.f32 %v6862_v36, %v7444_v24  ;;  %v3135_v29 = vor.u32 %v3134_v7, %v3131_v61  ;;  %v1231_v48 = vshrl.u32 %v6291_v62, 16 }
 0x22d   : >> { %v3139_v23 = vrot.slane %v3137_v16, 3  ;;  %v3142_v8 = vrot.slane %v3140_v43, 4  ;;  %v3169_v0 = vrot.slane %v3167_v19, 3  ;;  %v3172_v15 = vrot.slane %v3170_v51, 4  ;;  %v7445_v16 = vld [vmem:[#allocation26_spill] sm:$0xff]  ;;  %v7447_v19 = vld [vmem:[#allocation4_spill] sm:$0xff] }
 0x22e   : >> { %v4237_v27 = vmax.f32 %v4170_v58, 0.0  ;;  %v4271_v41 = vmin.f32 %v4170_v58, 0.0  ;;  %v1233_v34 = vrot.slane %v1231_v48, 4  ;;  %v1234_v2 = vshll.u32 %v6291_v62, 16  ;;  %v6998_v58 = vpop.f32.mrf.mxu2  ;;  %v1707_v48 = vpop.permute.xlu1 %1706 }
 0x22f   : >> { %v3143_v21 = vor.u32 %v3142_v8, %v3139_v23  ;;  %v3189_v36 = vsel %vm2143_vm3, %v3181_v39, %v3188_v42  ;;  %v3173_v13 = vor.u32 %v3172_v15, %v3169_v0  ;;  %v6980_v26 = vadd.f32 %v6903_v38, %v3908_v28  ;;  %v7446_v39 = vld [vmem:[#allocation10_spill] sm:$0xff]  ;;  %v7006_v0 = vpop.f32.mrf.mxu1 }
 0x230   : >> { %v4306_v9 = vmul.f32 %v6615_v22, %v4271_v41  ;;  %4035 = vmatmul.bf16.gmra.mxu2 %v3189_v36  ;;  %v4083_v61 = vadd.f32 %v6905_v50, %v3994_v3  ;;  %v1236_v7 = vrot.slane %v1234_v2, 5  ;;  %v6986_v54 = vadd.f32 %v6925_v46, %v7445_v16  ;;  %v7000_v24 = vpop.f32.mrf.mxu3 }
 0x231   : >> { %v3144_v62 = vsel %vm2143_vm3, %v3135_v29, %v3143_v21  ;;  %v843_v49 = vunpack.c.l.b16 %v378_v20  ;;  %v3174_v38 = vsel %vm2143_vm3, %v3166_v25, %v3173_v13  ;;  %v904_v42 = vrot.slane %v7446_v39, 5  ;;  %v1097_v21 = vpop.permute.xlu0 %1096 }
 0x232   : >> { %4720 = vmatmul.msk.bf16.gmra.mxu0 %vm1806_vm2, %v3144_v62  ;;  %v4338_v57 = vadd.f32 %v4306_v9, %v4237_v27  ;;  %v4172_v50 = vadd.f32 %v6864_v47, %v4083_v61  ;;  %v1237_v3 = vor.u32 %v1236_v7, %v1233_v34  ;;  %3946 = vmatmul.bf16.gmra.mxu1 %v3174_v38  ;;  %v7448_v46 = vunpack.c.h.b16 %v7447_v19  ;;  %v7009_v34 = vpop.f32.mrf.mxu0 }
 0x233   : >> { %v859_v43 = vpack.c.b16 %v843_v49, %v843_v49  ;;  %v1973_v1 = vsel %vm1806_vm2, %v904_v42, %v1095_v60  ;;  %v7449_v60 = vld [vmem:[#allocation7_spill] sm:$0xff] }
 0x234   : >> { %v1531_v51 = vpack.c.b16 %v7448_v46, %v7448_v46  ;;  %v4370_v28 = vpack.c.bf16 %v4338_v57, %v4338_v57  ;;  %v4238_v29 = vmax.f32 %v4172_v50, 0.0  ;;  %v4272_v30 = vmin.f32 %v4172_v50, 0.0 }
 0x235   : >> { %v2057_v47 = vsel %vm1806_vm2, %v1237_v3, %v1401_v59  ;;  %v2055_v25 = vsel %vm1806_vm2, %v1237_v3, %v6940_v17  ;;  %v905_v23 = vrot.slane %v859_v43, 5  ;;  %v3237_v8 = vshrl.u32 %v1973_v1, 16  ;;  %v506_v43 = vld [vmem:[#allocation2 + $0xfc] sm:$0x1] }
 0x236   : >> { %4402 = vst.msk [vmem:[#allocation2 + $0x54] sm:$0xf] %vm199_vm0, %v4370_v28  ;;  %v3259_v15 = vshrl.u32 %v2057_v47, 16  ;;  %v3262_v27 = vshll.u32 %v2057_v47, 16  ;;  %v3252_v41 = vshrl.u32 %v2055_v25, 16  ;;  %v3255_v20 = vshll.u32 %v2055_v25, 16 }
 0x237   : >> { %v4307_v2 = vmul.f32 %v6615_v22, %v4272_v30  ;;  %v906_v59 = vsel %vm861_vm1, %v904_v42, %v905_v23  ;;  %v3239_v36 = vrot.slane %v3237_v8, 3  ;;  %v3240_v17 = vshll.u32 %v1973_v1, 16  ;;  %v7017_v30 = vpop.f32.mrf.mxu2  ;;  %v7032_v45 = vpop.f32.mrf.mxu1 }
 0x238   : >> { %v3261_v13 = vrot.slane %v3259_v15, 3  ;;  %v3264_v9 = vrot.slane %v3262_v27, 4  ;;  %v3254_v61 = vrot.slane %v3252_v41, 3  ;;  %v3257_v62 = vrot.slane %v3255_v20, 4  ;;  %v7019_v1 = vpop.f32.mrf.mxu3 }
 0x239   : >> { %v4339_v7 = vadd.f32 %v4307_v2, %v4238_v29  ;;  %v1976_v16 = vsel %vm1806_vm2, %v906_v59, %v1097_v21  ;;  %v3242_v49 = vrot.slane %v3240_v17, 4  ;;  %v4998_v57 = vor.u32 %v7449_v60, %v4997_v37  ;;  %v1403_v17 = vpop.permute.xlu1 %1402 }
 0x23a   : >> { %v3265_v38 = vor.u32 %v3264_v9, %v3261_v13  ;;  %v3258_v50 = vor.u32 %v3257_v62, %v3254_v61  ;;  %v3244_v39 = vshrl.u32 %v1976_v16, 16  ;;  %v3247_v3 = vshll.u32 %v1976_v16, 16  ;;  %v7036_v13 = vpop.f32.mrf.mxu0  ;;  %v7450_v61 = vld [vmem:[#allocation27_spill] sm:$0xff] }
 0x23b   : >> { %v4371_v22 = vpack.c.bf16 %v4339_v7, %v4339_v7  ;;  %v3243_v46 = vor.u32 %v3242_v49, %v3239_v36  ;;  %v2135_v42 = vsel %vm1806_vm2, %v4998_v57, %v1707_v48  ;;  %v2137_v28 = vsel %vm1806_vm2, %v1531_v51, %v1707_v48 }
 0x23c   : >> { %v3246_v29 = vrot.slane %v3244_v39, 3  ;;  %v3249_v47 = vrot.slane %v3247_v3, 4  ;;  %v3267_v25 = vshrl.u32 %v2135_v42, 16  ;;  %v3270_v23 = vshll.u32 %v2135_v42, 16  ;;  %v379_v39 = vld [vmem:[#allocation2 + $0xfc] sm:$0x1] }
 0x23d   : >> { %4403 = vst.msk [vmem:[#allocation2 + $0x58] sm:$0xf] %vm199_vm0, %v4371_v22  ;;  %v3274_v37 = vshrl.u32 %v2137_v28, 16  ;;  %v3277_v8 = vshll.u32 %v2137_v28, 16  ;;  %v3204_v51 = vsel %vm2143_vm3, %v3196_v52, %v3203_v55  ;;  %v1739_v48 = vunpack.c.l.b16 %v506_v43  ;;  %v1405_v55 = vpop.permute.xlu2 %1404 }
 0x23e   : >> { %v3250_v15 = vor.u32 %v3249_v47, %v3246_v29  ;;  %v3269_v27 = vrot.slane %v3267_v25, 3  ;;  %v3272_v41 = vrot.slane %v3270_v23, 4  ;;  %4124 = vmatmul.bf16.gmra.mxu3 %v3204_v51  ;;  %v1797_v20 = vrot.slane %v7442_v4, 5  ;;  %v7451_v25 = vld [vmem:[#allocation30_spill] sm:$0xff] }
 0x23f   : >> { %v3276_v21 = vrot.slane %v3274_v37, 3  ;;  %v3279_v2 = vrot.slane %v3277_v8, 4  ;;  %v1755_v59 = vpack.c.b16 %v1739_v48, %v1739_v48  ;;  %v3999_v36 = vadd.f32 %v6958_v31, %v6986_v54  ;;  %v7046_v3 = vpop.f32.mrf.mxu2  ;;  %v7057_v8 = vld [vmem:[%s6120_s9] ss:$0 sm:$0xff] }
 0x240   : >> { %v3273_v11 = vor.u32 %v3272_v41, %v3269_v27  ;;  %v3206_v5 = vshrl.u32 %v1797_v20, 16  ;;  %v3209_v40 = vshll.u32 %v1797_v20, 16  ;;  %v4086_v52 = vadd.f32 %v6960_v18, %v6980_v26  ;;  %v7048_v43 = vpop.f32.mrf.mxu3  ;;  %v7452_v27 = vld [vmem:[#allocation12_spill] sm:$0xff] }
 0x241   : >> { %v3280_v9 = vor.u32 %v3279_v2, %v3276_v21  ;;  %v1798_v4 = vrot.slane %v1755_v59, 5  ;;  %v3913_v62 = vadd.f32 %v6966_v56, %v7450_v61  ;;  %v1239_v7 = vshrl.u32 %v6414_v53, 16 }
 0x242   : >> { %v3208_v31 = vrot.slane %v3206_v5, 3  ;;  %v3211_v54 = vrot.slane %v3209_v40, 4  ;;  %v4175_v16 = vadd.f32 %v6927_v6, %v4086_v52  ;;  %v1242_v49 = vshll.u32 %v6414_v53, 16  ;;  %v1099_v40 = vpop.permute.xlu1 %1098 }
 0x243   : >> { %v1799_v60 = vsel %vm861_vm1, %v1797_v20, %v1798_v4  ;;  %v1241_v57 = vrot.slane %v1239_v7, 4  ;;  %v3251_v18 = vsel %vm2143_vm3, %v3243_v46, %v3250_v15  ;;  %v3266_v26 = vsel %vm2143_vm3, %v3258_v50, %v3265_v38  ;;  %v507_v38 = vld [vmem:[#allocation2 + $0x10c] sm:$0x1] }
 0x244   : >> { %v3212_v56 = vor.u32 %v3211_v54, %v3208_v31  ;;  %v3214_v22 = vshrl.u32 %v1799_v60, 16  ;;  %v3217_v42 = vshll.u32 %v1799_v60, 16  ;;  %v4239_v28 = vmax.f32 %v4175_v16, 0.0  ;;  %3951 = vmatmul.bf16.gmra.mxu1 %v3251_v18  ;;  %4040 = vmatmul.bf16.gmra.mxu2 %v3266_v26 }
 0x245   : >> { %v4273_v53 = vmin.f32 %v4175_v16, 0.0  ;;  %v1244_v6 = vrot.slane %v1242_v49, 5  ;;  %v7051_v29 = vadd.f32 %v6998_v58, %v3913_v62  ;;  %v4088_v46 = vadd.f32 %v7000_v24, %v3999_v36  ;;  %v7062_v58 = vpop.f32.mrf.mxu1  ;;  %v1101_v62 = vpop.permute.xlu2 %1100 }
 0x246   : >> { %v3216_v50 = vrot.slane %v3214_v22, 3  ;;  %v3219_v47 = vrot.slane %v3217_v42, 4  ;;  %v3915_v23 = vadd.f32 %v7006_v0, %v7451_v25  ;;  %v844_v37 = vunpack.c.l.b16 %v379_v39  ;;  %v7068_v7 = vpop.f32.mrf.mxu0 }
 0x247   : >> { %v4308_v51 = vmul.f32 %v7057_v8, %v4273_v53  ;;  %v1245_v48 = vor.u32 %v1244_v6, %v1241_v57  ;;  %v4177_v15 = vadd.f32 %v6968_v32, %v4088_v46  ;;  %v907_v41 = vrot.slane %v7452_v27, 5  ;;  %v7071_v16 = vpop.f32.mrf.mxu2 }
 0x248   : >> { %v3220_v20 = vor.u32 %v3219_v47, %v3216_v50  ;;  %v860_v24 = vpack.c.b16 %v844_v37, %v844_v37  ;;  %v3281_v21 = vsel %vm2143_vm3, %v3273_v11, %v3280_v9  ;;  %v1740_v2 = vunpack.c.l.b16 %v507_v38 }
 0x249   : >> { %v4340_v59 = vadd.f32 %v4308_v51, %v4239_v28  ;;  %v2062_v0 = vsel %vm1806_vm2, %v1245_v48, %v1405_v55  ;;  %v2060_v36 = vsel %vm1806_vm2, %v1245_v48, %v1403_v17  ;;  %v4240_v5 = vmax.f32 %v4177_v15, 0.0  ;;  %v7073_v55 = vpop.f32.mrf.mxu3 }
 0x24a   : >> { %v3221_v52 = vsel %vm2143_vm3, %v3212_v56, %v3220_v20  ;;  %v3336_v4 = vshrl.u32 %v2062_v0, 16  ;;  %v3339_v32 = vshll.u32 %v2062_v0, 16  ;;  %v3329_v61 = vshrl.u32 %v2060_v36, 16 }
 0x24b   : >> { %4721 = vmatmul.msk.bf16.gmra.mxu0 %vm1806_vm2, %v3221_v52  ;;  %v4372_v31 = vpack.c.bf16 %v4340_v59, %v4340_v59  ;;  %v3332_v11 = vshll.u32 %v2060_v36, 16  ;;  %v4274_v9 = vmin.f32 %v4177_v15, 0.0  ;;  %v908_v54 = vrot.slane %v860_v24, 5  ;;  %v5001_v24 = vld [vmem:[#allocation2 + $0x110] sm:$0x8] }
 0x24c   : >> { %v3338_v17 = vrot.slane %v3336_v4, 3  ;;  %v3341_v49 = vrot.slane %v3339_v32, 4  ;;  %v3331_v60 = vrot.slane %v3329_v61, 3  ;;  %v1979_v57 = vsel %vm1806_vm2, %v907_v41, %v1099_v40  ;;  %v1709_v61 = vpop.permute.xlu0 %1708 }
 0x24d   : >> { %4404 = vst.msk [vmem:[#allocation2 + $0x64] sm:$0xf] %vm199_vm0, %v4372_v31  ;;  %v3334_v18 = vrot.slane %v3332_v11, 4  ;;  %v4309_v26 = vmul.f32 %v7057_v8, %v4274_v9  ;;  %v909_v39 = vsel %vm861_vm1, %v907_v41, %v908_v54  ;;  %v3314_v56 = vshrl.u32 %v1979_v57, 16  ;;  %v7081_v48 = vpop.f32.mrf.mxu1 }
 0x24e   : >> { %v3342_v22 = vor.u32 %v3341_v49, %v3338_v17  ;;  %v1982_v42 = vsel %vm1806_vm2, %v909_v39, %v1101_v62  ;;  %v3317_v28 = vshll.u32 %v1979_v57, 16  ;;  %4129 = vmatmul.bf16.gmra.mxu3 %v3281_v21  ;;  %v1756_v53 = vpack.c.b16 %v1740_v2, %v1740_v2  ;;  %v7094_v62 = vpop.f32.mrf.mxu0 }
 0x24f   : >> { %v3335_v6 = vor.u32 %v3334_v18, %v3331_v60  ;;  %v4341_v46 = vadd.f32 %v4309_v26, %v4240_v5  ;;  %v3321_v38 = vshrl.u32 %v1982_v42, 16  ;;  %v3324_v50 = vshll.u32 %v1982_v42, 16  ;;  %v7088_v52 = vpop.f32.mrf.mxu2  ;;  %v508_v42 = vld [vmem:[#allocation2 + $0x11c] sm:$0x1] }
 0x250   : >> { %v3316_v47 = vrot.slane %v3314_v56, 3  ;;  %v3319_v25 = vrot.slane %v3317_v28, 4  ;;  %v1800_v37 = vrot.slane %v7447_v19, 5  ;;  %v1801_v51 = vrot.slane %v1756_v53, 5 }
 0x251   : >> { %v4373_v15 = vpack.c.bf16 %v4341_v46, %v4341_v46  ;;  %v3323_v27 = vrot.slane %v3321_v38, 3  ;;  %v3326_v41 = vrot.slane %v3324_v50, 4  ;;  %v4004_v20 = vadd.f32 %v7017_v30, %v3915_v23  ;;  %v7090_v4 = vpop.f32.mrf.mxu3 }
 0x252   : >> { %v3320_v59 = vor.u32 %v3319_v25, %v3316_v47  ;;  %v1802_v21 = vsel %vm861_vm1, %v1800_v37, %v1801_v51  ;;  %v3283_v2 = vshrl.u32 %v1800_v37, 16  ;;  %v3286_v0 = vshll.u32 %v1800_v37, 16 }
 0x253   : >> { %4405 = vst.msk [vmem:[#allocation2 + $0x68] sm:$0xf] %vm199_vm0, %v4373_v15  ;;  %v3327_v36 = vor.u32 %v3326_v41, %v3323_v27  ;;  %v3291_v5 = vshrl.u32 %v1802_v21, 16  ;;  %v3294_v40 = vshll.u32 %v1802_v21, 16  ;;  %v4091_v19 = vadd.f32 %v7019_v1, %v7051_v29 }
 0x254   : >> { %v3285_v32 = vrot.slane %v3283_v2, 3  ;;  %v3288_v30 = vrot.slane %v3286_v0, 4  ;;  %v3918_v23 = vadd.f32 %v7032_v45, %v6457_v10  ;;  %v7453_v54 = vunpack.c.h.b16 %v6501_v14 }
 0x255   : >> { %v3293_v31 = vrot.slane %v3291_v5, 3  ;;  %v3296_v11 = vrot.slane %v3294_v40, 4  ;;  %v4180_v9 = vadd.f32 %v7009_v34, %v4091_v19  ;;  %v5002_v17 = vor.u32 %v6503_v12, %v5001_v24  ;;  %v3924_v47 = vpop.f32.mrf.mxu1 }
 0x256   : >> { %v1533_v1 = vpack.c.b16 %v7453_v54, %v7453_v54  ;;  %v3289_v29 = vor.u32 %v3288_v30, %v3285_v32  ;;  %v3328_v49 = vsel %vm2143_vm3, %v3320_v59, %v3327_v36  ;;  %v3343_v60 = vsel %vm2143_vm3, %v3335_v6, %v3342_v22 }
 0x257   : >> { %v3297_v57 = vor.u32 %v3296_v11, %v3293_v31  ;;  %v4241_v10 = vmax.f32 %v4180_v9, 0.0  ;;  %v4275_v45 = vmin.f32 %v4180_v9, 0.0  ;;  %3956 = vmatmul.bf16.gmra.mxu1 %v3328_v49  ;;  %4045 = vmatmul.bf16.gmra.mxu2 %v3343_v60  ;;  %v2140_v34 = vsel %vm1806_vm2, %v5002_v17, %v1709_v61  ;;  %v4013_v21 = vpop.f32.mrf.mxu2  ;;  %v7124_v31 = vld [vmem:[%s5719_s6] ss:$0 sm:$0xff]  ;;  %v7455_v11 = vld [vmem:[#allocation16_spill] sm:$0xff] }
 0x258   : >> { %v2142_v18 = vsel %vm1806_vm2, %v1533_v1, %v1709_v61  ;;  %v4007_v56 = vadd.f32 %v7046_v3, %v3918_v23  ;;  %v3344_v53 = vshrl.u32 %v2140_v34, 16  ;;  %v3347_v22 = vshll.u32 %v2140_v34, 16 }
 0x259   : >> { %v3351_v26 = vshrl.u32 %v2142_v18, 16  ;;  %v3354_v39 = vshll.u32 %v2142_v18, 16  ;;  %v3298_v12 = vsel %vm2143_vm3, %v3289_v29, %v3297_v57  ;;  %v4310_v28 = vmul.f32 %v7057_v8, %v4275_v45  ;;  %v4100_v15 = vpop.f32.mrf.mxu3  ;;  %v4189_v40 = vpop.f32.mrf.mxu0 }
 0x25a   : >> { %v4093_v38 = vadd.f32 %v7048_v43, %v4004_v20  ;;  %v3920_v50 = vadd.f32 %v7062_v58, %v6480_v44  ;;  %v3346_v37 = vrot.slane %v3344_v53, 3  ;;  %v3349_v3 = vrot.slane %v3347_v22, 4 }
 0x25b   : >> { %v3353_v6 = vrot.slane %v3351_v26, 3  ;;  %v3356_v46 = vrot.slane %v3354_v39, 4  ;;  %4722 = vmatmul.msk.bf16.gmra.mxu0 %vm1806_vm2, %v3298_v12  ;;  %v4342_v25 = vadd.f32 %v4310_v28, %v4241_v10  ;;  %v1741_v51 = vunpack.c.l.b16 %v508_v42 }
 0x25c   : >> { %v4182_v41 = vadd.f32 %v7036_v13, %v4093_v38  ;;  %v1803_v24 = vrot.slane %v6501_v14, 5  ;;  %v4009_v59 = vadd.f32 %v7071_v16, %v3920_v50  ;;  %v3350_v20 = vor.u32 %v3349_v3, %v3346_v37  ;;  %v7454_v16 = vld [vmem:[#allocation21_spill] sm:$0xff]  ;;  %v7456_v37 = vld [vmem:[#allocation20_spill] sm:$0xff] }
 0x25d   : >> { %v3357_v27 = vor.u32 %v3356_v46, %v3353_v6  ;;  %v4374_v43 = vpack.c.bf16 %v4342_v25, %v4342_v25  ;;  %v1757_v2 = vpack.c.b16 %v1741_v51, %v1741_v51  ;;  %v4096_v44 = vadd.f32 %v7073_v55, %v4007_v56  ;;  %v3927_v56 = vpop.f32.mrf.mxu1 }
 0x25e   : >> { %v4242_v58 = vmax.f32 %v4182_v41, 0.0  ;;  %v4276_v0 = vmin.f32 %v4182_v41, 0.0  ;;  %v3360_v36 = vshrl.u32 %v1803_v24, 16  ;;  %v3363_v5 = vshll.u32 %v1803_v24, 16 }
 0x25f   : >> { %4406 = vst.msk [vmem:[#allocation2 + $0x74] sm:$0xf] %vm199_vm0, %v4374_v43  ;;  %v3358_v13 = vsel %vm2143_vm3, %v3350_v20, %v3357_v27  ;;  %v1804_v19 = vrot.slane %v1757_v2, 5  ;;  %v4185_v14 = vadd.f32 %v7068_v7, %v4096_v44  ;;  %v3923_v32 = vadd.f32 %v7081_v48, %v7454_v16  ;;  %v4016_v22 = vpop.f32.mrf.mxu2 }
 0x260   : >> { %v4311_v30 = vmul.f32 %v7057_v8, %v4276_v0  ;;  %4134 = vmatmul.bf16.gmra.mxu3 %v3358_v13  ;;  %v3362_v55 = vrot.slane %v3360_v36, 3  ;;  %v3365_v23 = vrot.slane %v3363_v5, 4  ;;  %v4098_v61 = vadd.f32 %v7090_v4, %v4009_v59 }
 0x261   : >> { %v3836_v9 = vadd.f32 %v7124_v31, %v7455_v11  ;;  %v1805_v54 = vsel %vm861_vm1, %v1803_v24, %v1804_v19  ;;  %v4277_v1 = vmin.f32 %v4185_v14, 0.0  ;;  %v4012_v7 = vadd.f32 %v7088_v52, %v3923_v32  ;;  %v4102_v45 = vpop.f32.mrf.mxu3  ;;  %v4191_v25 = vpop.f32.mrf.mxu0  ;;  %v7457_v19 = vld [vmem:[#allocation22_spill] sm:$0xff] }
 0x262   : >> { %v4343_v29 = vadd.f32 %v4311_v30, %v4242_v58  ;;  %v3368_v17 = vshrl.u32 %v1805_v54, 16  ;;  %v3371_v48 = vshll.u32 %v1805_v54, 16  ;;  %v4243_v49 = vmax.f32 %v4185_v14, 0.0 }
 0x263   : >> { %v4312_v60 = vmul.f32 %v7057_v8, %v4277_v1  ;;  %v4187_v57 = vadd.f32 %v7094_v62, %v4098_v61  ;;  %v3925_v10 = vadd.f32 %v3924_v47, %v3836_v9  ;;  %v4101_v4 = vadd.f32 %v4100_v15, %v4012_v7 }
 0x264   : >> { %v4375_v18 = vpack.c.bf16 %v4343_v29, %v4343_v29  ;;  %v3366_v34 = vor.u32 %v3365_v23, %v3362_v55  ;;  %v3370_v26 = vrot.slane %v3368_v17, 3  ;;  %v3373_v39 = vrot.slane %v3371_v48, 4 }
 0x265   : >> { %v4344_v42 = vadd.f32 %v4312_v60, %v4243_v49  ;;  %v4278_v12 = vmin.f32 %v4187_v57, 0.0  ;;  %v4014_v28 = vadd.f32 %v4013_v21, %v3925_v10  ;;  %v4190_v53 = vadd.f32 %v4189_v40, %v4101_v4  ;;  %v3929_v36 = vpop.f32.mrf.mxu1 }
 0x266   : >> { %4407 = vst.msk [vmem:[#allocation2 + $0x78] sm:$0xf] %vm199_vm0, %v4375_v18  ;;  %v3374_v52 = vor.u32 %v3373_v39, %v3370_v26  ;;  %v4244_v46 = vmax.f32 %v4187_v57, 0.0  ;;  %v3839_v3 = vadd.f32 %v7124_v31, %v7456_v37  ;;  %v3841_v14 = vadd.f32 %v7124_v31, %v7457_v19  ;;  %v7458_v57 = vld [vmem:[#allocation24_spill] sm:$0xff] }
 0x267   : >> { %v4376_v6 = vpack.c.bf16 %v4344_v42, %v4344_v42  ;;  %v4313_v62 = vmul.f32 %v7057_v8, %v4278_v12  ;;  %v4103_v38 = vadd.f32 %v4102_v45, %v4014_v28  ;;  %v4279_v47 = vmin.f32 %v4190_v53, 0.0  ;;  %v4018_v13 = vpop.f32.mrf.mxu2 }
 0x268   : >> { %v3375_v50 = vsel %vm2143_vm3, %v3366_v34, %v3374_v52  ;;  %v4245_v27 = vmax.f32 %v4190_v53, 0.0  ;;  %v3928_v59 = vadd.f32 %v3927_v56, %v3839_v3  ;;  %v3930_v30 = vadd.f32 %v3929_v36, %v3841_v14  ;;  %v7459_v53 = vld [vmem:[#allocation28_spill] sm:$0xff] }
 0x269   : >> { %4408 = vst.msk [vmem:[#allocation2 + $0x84] sm:$0xf] %vm199_vm0, %v4376_v6  ;;  %v4345_v51 = vadd.f32 %v4313_v62, %v4244_v46  ;;  %v4192_v15 = vadd.f32 %v4191_v25, %v4103_v38  ;;  %v4314_v41 = vmul.f32 %v7057_v8, %v4279_v47  ;;  %v3844_v10 = vadd.f32 %v7124_v31, %v7458_v57  ;;  %v7461_v57 = vld [vmem:[#allocation8_spill] sm:$0xff] }
 0x26a   : >> { %v4017_v2 = vadd.f32 %v4016_v22, %v3928_v59  ;;  %v4019_v61 = vadd.f32 %v4018_v13, %v3930_v30  ;;  %v3846_v22 = vadd.f32 %v7124_v31, %v7459_v53 }
 0x26b   : >> { %4723 = vmatmul.msk.bf16.gmra.mxu0 %vm1806_vm2, %v3375_v50  ;;  %v4377_v24 = vpack.c.bf16 %v4345_v51, %v4345_v51  ;;  %v4280_v21 = vmin.f32 %v4192_v15, 0.0  ;;  %v4105_v43 = vpop.f32.mrf.mxu3  ;;  %v4346_v20 = vadd.f32 %v4314_v41, %v4245_v27  ;;  %v4246_v44 = vmax.f32 %v4192_v15, 0.0 }
 0x26c   : >> { %v4106_v40 = vadd.f32 %v4105_v43, %v4017_v2  ;;  %v7460_v43 = vld [vmem:[#allocation33_spill] sm:$0xff] }
 0x26d   : >> { %4409 = vst.msk [vmem:[#allocation2 + $0x88] sm:$0xf] %vm199_vm0, %v4377_v24  ;;  %v4315_v58 = vmul.f32 %v7057_v8, %v4280_v21  ;;  %v4378_v0 = vpack.c.bf16 %v4346_v20, %v4346_v20  ;;  %v3849_v20 = vadd.f32 %v7124_v31, %v7460_v43 }
 0x26e   : >> { %v3932_v7 = vpop.f32.mrf.mxu1 }
 0x26f   : >> { %v4347_v5 = vadd.f32 %v4315_v58, %v4246_v44  ;;  %4410 = vst.msk [vmem:[#allocation2 + $0x94] sm:$0xf] %vm199_vm0, %v4378_v0  ;;  %v3933_v45 = vadd.f32 %v3932_v7, %v3844_v10  ;;  %v3854_v10 = vadd.f32 %v7124_v31, %v7461_v57 }
 0x271   : >> { %v4379_v16 = vpack.c.bf16 %v4347_v5, %v4347_v5  ;;  %v4194_v32 = vpop.f32.mrf.mxu0 }
 0x272   : >> { %v4195_v55 = vadd.f32 %v4194_v32, %v4106_v40  ;;  %v4021_v48 = vpop.f32.mrf.mxu2 }
 0x273   : >> { %4411 = vst.msk [vmem:[#allocation2 + $0x98] sm:$0xf] %vm199_vm0, %v4379_v16  ;;  %v4107_v23 = vpop.f32.mrf.mxu3  ;;  %v4022_v39 = vadd.f32 %v4021_v48, %v3933_v45  ;;  %v3851_v16 = vadd.f32 %v7124_v31, %v6466_v35 }
 0x274   : >> { %v4281_v11 = vmin.f32 %v4195_v55, 0.0  ;;  %v4247_v9 = vmax.f32 %v4195_v55, 0.0  ;;  %v4108_v1 = vadd.f32 %v4107_v23, %v4019_v61 }
 0x276   : >> { %v4316_v54 = vmul.f32 %v7057_v8, %v4281_v11  ;;  %v3934_v42 = vpop.f32.mrf.mxu1 }
 0x277   : >> { %v3935_v46 = vadd.f32 %v3934_v42, %v3846_v22 }
 0x278   : >> { %v4348_v29 = vadd.f32 %v4316_v54, %v4247_v9 }
 0x279   : >> { %v4196_v17 = vpop.f32.mrf.mxu0 }
 0x27a   : >> { %v4380_v49 = vpack.c.bf16 %v4348_v29, %v4348_v29  ;;  %v4197_v60 = vadd.f32 %v4196_v17, %v4108_v1  ;;  %v4023_v52 = vpop.f32.mrf.mxu2 }
 0x27b   : >> { %v4110_v26 = vpop.f32.mrf.mxu3  ;;  %v4024_v50 = vadd.f32 %v4023_v52, %v3935_v46  ;;  %v7462_v52 = vld [vmem:[#allocation19_spill] sm:$0xff] }
 0x27c   : >> { %4412 = vst.msk [vmem:[#allocation2 + $0xa4] sm:$0xf] %vm199_vm0, %v4380_v49  ;;  %v4282_v4 = vmin.f32 %v4197_v60, 0.0  ;;  %v4248_v18 = vmax.f32 %v4197_v60, 0.0  ;;  %v4111_v28 = vadd.f32 %v4110_v26, %v4022_v39  ;;  %v3856_v53 = vadd.f32 %v7124_v31, %v7462_v52 }
 0x27e   : >> { %v4317_v34 = vmul.f32 %v7057_v8, %v4282_v4 }
 0x280   : >> { %v4349_v56 = vadd.f32 %v4317_v34, %v4248_v18  ;;  %v3937_v51 = vpop.f32.mrf.mxu1 }
 0x281   : >> { %v3938_v58 = vadd.f32 %v3937_v51, %v3849_v20 }
 0x282   : >> { %v4381_v12 = vpack.c.bf16 %v4349_v56, %v4349_v56 }
 0x283   : >> { %v4112_v38 = vpop.f32.mrf.mxu3 }
 0x284   : >> { %4413 = vst.msk [vmem:[#allocation2 + $0xa8] sm:$0xf] %vm199_vm0, %v4381_v12  ;;  %v4113_v3 = vadd.f32 %v4112_v38, %v4024_v50 }
 0x285   : >> { %v4199_v6 = vpop.f32.mrf.mxu0 }
 0x286   : >> { %v4200_v62 = vadd.f32 %v4199_v6, %v4111_v28 }
 0x287   : >> { %v4026_v41 = vpop.f32.mrf.mxu2 }
 0x288   : >> { %v4283_v47 = vmin.f32 %v4200_v62, 0.0  ;;  %v4249_v25 = vmax.f32 %v4200_v62, 0.0  ;;  %v3939_v5 = vpop.f32.mrf.mxu1  ;;  %v4027_v40 = vadd.f32 %v4026_v41, %v3938_v58 }
 0x289   : >> { %v3940_v30 = vadd.f32 %v3939_v5, %v3851_v16 }
 0x28a   : >> { %v4318_v37 = vmul.f32 %v7057_v8, %v4283_v47 }
 0x28c   : >> { %v4350_v15 = vadd.f32 %v4318_v37, %v4249_v25 }
 0x28d   : >> { %v4201_v27 = vpop.f32.mrf.mxu0 }
 0x28e   : >> { %v4382_v24 = vpack.c.bf16 %v4350_v15, %v4350_v15  ;;  %v4202_v59 = vadd.f32 %v4201_v27, %v4113_v3 }
 0x28f   : >> { %v4028_v19 = vpop.f32.mrf.mxu2 }
 0x290   : >> { %4414 = vst.msk [vmem:[#allocation2 + $0xb4] sm:$0xf] %vm199_vm0, %v4382_v24  ;;  %v4284_v21 = vmin.f32 %v4202_v59, 0.0  ;;  %v4250_v2 = vmax.f32 %v4202_v59, 0.0  ;;  %v4029_v61 = vadd.f32 %v4028_v19, %v3940_v30 }
 0x292   : >> { %v4319_v44 = vmul.f32 %v7057_v8, %v4284_v21 }
 0x293   : >> { %v4115_v36 = vpop.f32.mrf.mxu3 }
 0x294   : >> { %v4351_v0 = vadd.f32 %v4319_v44, %v4250_v2  ;;  %v4116_v14 = vadd.f32 %v4115_v36, %v4027_v40  ;;  %v7463_v44 = vld [vmem:[#allocation23_spill] sm:$0xff] }
 0x295   : >> { %v3859_v58 = vadd.f32 %v7124_v31, %v7463_v44 }
 0x296   : >> { %v4383_v13 = vpack.c.bf16 %v4351_v0, %v4351_v0 }
 0x297   : >> { %v3942_v9 = vpop.f32.mrf.mxu1 }
 0x298   : >> { %4415 = vst.msk [vmem:[#allocation2 + $0xb8] sm:$0xf] %vm199_vm0, %v4383_v13  ;;  %v3943_v45 = vadd.f32 %v3942_v9, %v3854_v10 }
 0x29b   : >> { %v4117_v23 = vpop.f32.mrf.mxu3 }
 0x29c   : >> { %v4204_v32 = vpop.f32.mrf.mxu0  ;;  %v4118_v7 = vadd.f32 %v4117_v23, %v4029_v61 }
 0x29d   : >> { %v4205_v55 = vadd.f32 %v4204_v32, %v4116_v14  ;;  %v4031_v29 = vpop.f32.mrf.mxu2  ;;  %v7464_v14 = vld [vmem:[#allocation25_spill] sm:$0xff] }
 0x29e   : >> { %v4032_v26 = vadd.f32 %v4031_v29, %v3943_v45  ;;  %v3861_v16 = vadd.f32 %v7124_v31, %v7464_v14 }
 0x29f   : >> { %v4285_v11 = vmin.f32 %v4205_v55, 0.0  ;;  %v4251_v54 = vmax.f32 %v4205_v55, 0.0  ;;  %v3944_v39 = vpop.f32.mrf.mxu1 }
 0x2a0   : >> { %v3945_v6 = vadd.f32 %v3944_v39, %v3856_v53 }
 0x2a1   : >> { %v4320_v1 = vmul.f32 %v7057_v8, %v4285_v11 }
 0x2a3   : >> { %v4352_v17 = vadd.f32 %v4320_v1, %v4251_v54 }
 0x2a4   : >> { %v4206_v48 = vpop.f32.mrf.mxu0 }
 0x2a5   : >> { %v4384_v49 = vpack.c.bf16 %v4352_v17, %v4352_v17  ;;  %v4207_v60 = vadd.f32 %v4206_v48, %v4118_v7  ;;  %v4033_v42 = vpop.f32.mrf.mxu2  ;;  %v7465_v17 = vld [vmem:[#allocation29_spill] sm:$0xff] }
 0x2a6   : >> { %v4034_v38 = vadd.f32 %v4033_v42, %v3945_v6  ;;  %v3864_v48 = vadd.f32 %v7124_v31, %v7465_v17 }
 0x2a7   : >> { %4416 = vst.msk [vmem:[#allocation2 + $0xc4] sm:$0xf] %vm199_vm0, %v4384_v49  ;;  %v4286_v35 = vmin.f32 %v4207_v60, 0.0  ;;  %v4120_v4 = vpop.f32.mrf.mxu3  ;;  %v4252_v18 = vmax.f32 %v4207_v60, 0.0 }
 0x2a8   : >> { %v4121_v12 = vadd.f32 %v4120_v4, %v4032_v26 }
 0x2a9   : >> { %v4321_v34 = vmul.f32 %v7057_v8, %v4286_v35 }
 0x2ab   : >> { %v4353_v56 = vadd.f32 %v4321_v34, %v4252_v18 }
 0x2ad   : >> { %v4385_v28 = vpack.c.bf16 %v4353_v56, %v4353_v56 }
 0x2af   : >> { %4417 = vst.msk [vmem:[#allocation2 + $0xc8] sm:$0xf] %vm199_vm0, %v4385_v28  ;;  %v4209_v22 = vpop.f32.mrf.mxu0  ;;  %v4122_v62 = vpop.f32.mrf.mxu3 }
 0x2b0   : >> { %v4210_v46 = vadd.f32 %v4209_v22, %v4121_v12  ;;  %v3947_v37 = vpop.f32.mrf.mxu1  ;;  %v4123_v3 = vadd.f32 %v4122_v62, %v4034_v38  ;;  %v7466_v12 = vld [vmem:[#allocation34_spill] sm:$0xff] }
 0x2b1   : >> { %v3948_v5 = vadd.f32 %v3947_v37, %v3859_v58  ;;  %v3866_v28 = vadd.f32 %v7124_v31, %v7466_v12  ;;  %v4440_v12 = vld [vmem:[#allocation2 + $0x84] sm:$0xf] (%p312_p4) }
 0x2b2   : >> { %v4287_v50 = vmin.f32 %v4210_v46, 0.0  ;;  %v4253_v47 = vmax.f32 %v4210_v46, 0.0  ;;  %4472 = vst.msk [vmem:[%s5115_s20 + $0x38] sm:$0xf] (%p312_p4), %vm199_vm0, %v4440_v12 }
 0x2b3   : >> { %v4036_v15 = vpop.f32.mrf.mxu2 }
 0x2b4   : >> { %v4322_v25 = vmul.f32 %v7057_v8, %v4287_v50  ;;  %v4037_v13 = vadd.f32 %v4036_v15, %v3948_v5  ;;  %v3869_v15 = vadd.f32 %v7124_v31, %v6468_v33  ;;  %v3871_v5 = vadd.f32 %v7124_v31, %v6517_v63 }
 0x2b6   : >> { %v4354_v51 = vadd.f32 %v4322_v25, %v4253_v47 }
 0x2b7   : >> { %v4211_v27 = vpop.f32.mrf.mxu0 }
 0x2b8   : >> { %v4386_v41 = vpack.c.bf16 %v4354_v51, %v4354_v51  ;;  %v4212_v24 = vadd.f32 %v4211_v27, %v4123_v3  ;;  %v3949_v2 = vpop.f32.mrf.mxu1 }
 0x2b9   : >> { %v3950_v55 = vadd.f32 %v3949_v2, %v3861_v16 }
 0x2ba   : >> { %4418 = vst.msk [vmem:[#allocation2 + $0xd4] sm:$0xf] %vm199_vm0, %v4386_v41  ;;  %v4288_v59 = vmin.f32 %v4212_v24, 0.0  ;;  %v4254_v21 = vmax.f32 %v4212_v24, 0.0 }
 0x2bb   : >> { %v4038_v36 = vpop.f32.mrf.mxu2 }
 0x2bc   : >> { %v4323_v43 = vmul.f32 %v7057_v8, %v4288_v59  ;;  %v4039_v9 = vadd.f32 %v4038_v36, %v3950_v55 }
 0x2be   : >> { %v4355_v20 = vadd.f32 %v4323_v43, %v4254_v21 }
 0x2c0   : >> { %v4387_v0 = vpack.c.bf16 %v4355_v20, %v4355_v20 }
 0x2c1   : >> { %v4125_v40 = vpop.f32.mrf.mxu3  ;;  %v3952_v30 = vpop.f32.mrf.mxu1 }
 0x2c2   : >> { %4419 = vst.msk [vmem:[#allocation2 + $0xd8] sm:$0xf] %vm199_vm0, %v4387_v0  ;;  %v4126_v19 = vadd.f32 %v4125_v40, %v4037_v13  ;;  %v3953_v10 = vadd.f32 %v3952_v30, %v3864_v48 }
 0x2c7   : >> { %v4041_v11 = vpop.f32.mrf.mxu2 }
 0x2c8   : >> { %v4214_v32 = vpop.f32.mrf.mxu0  ;;  %v4042_v18 = vadd.f32 %v4041_v11, %v3953_v10  ;;  %v4430_v10 = vld [vmem:[#allocation2 + $0x34] sm:$0xf] (%p312_p4) }
 0x2c9   : >> { %v4215_v23 = vadd.f32 %v4214_v32, %v4126_v19  ;;  %v4127_v61 = vpop.f32.mrf.mxu3  ;;  %v3954_v45 = vpop.f32.mrf.mxu1  ;;  %4462 = vst.msk [vmem:[%s5115_s20 + $0x10] sm:$0xf] (%p312_p4), %vm199_vm0, %v4430_v10 }
 0x2ca   : >> { %v4128_v29 = vadd.f32 %v4127_v61, %v4039_v9  ;;  %v3955_v6 = vadd.f32 %v3954_v45, %v3866_v28  ;;  %v4433_v45 = vld [vmem:[#allocation2 + $0x48] sm:$0xf] (%p312_p4) }
 0x2cb   : >> { %v4289_v54 = vmin.f32 %v4215_v23, 0.0  ;;  %v4255_v1 = vmax.f32 %v4215_v23, 0.0  ;;  %4465 = vst.msk [vmem:[%s5115_s20 + $0x1c] sm:$0xf] (%p312_p4), %vm199_vm0, %v4433_v45  ;;  %v4441_v28 = vld [vmem:[#allocation2 + $0x88] sm:$0xf] (%p312_p4) }
 0x2cc   : > { %4473 = vst.msk [vmem:[%s5115_s20 + $0x3c] sm:$0xf] (%p312_p4), %vm199_vm0, %v4441_v28 }
 0x2cd   : >> { %v4324_v7 = vmul.f32 %v7057_v8, %v4289_v54 }
 0x2cf   : >> { %v4356_v49 = vadd.f32 %v4324_v7, %v4255_v1  ;;  %v4043_v26 = vpop.f32.mrf.mxu2 }
 0x2d0   : >> { %v4216_v60 = vpop.f32.mrf.mxu0  ;;  %v4044_v38 = vadd.f32 %v4043_v26, %v3955_v6  ;;  %v4436_v26 = vld [vmem:[#allocation2 + $0x64] sm:$0xf] (%p312_p4)  ;;  %v4445_v6 = vld [vmem:[#allocation2 + $0xa8] sm:$0xf] (%p312_p4) }
 0x2d1   : >> { %v4388_v57 = vpack.c.bf16 %v4356_v49, %v4356_v49  ;;  %v4217_v35 = vadd.f32 %v4216_v60, %v4128_v29  ;;  %v4130_v4 = vpop.f32.mrf.mxu3  ;;  %v4426_v49 = vld [vmem:[#allocation2 + $0x14] sm:$0xf] (%p312_p4)  ;;  %v4427_v60 = vld [vmem:[#allocation2 + $0x18] sm:$0xf] (%p312_p4)  ;;  %4468 = vst.msk [vmem:[%s5115_s20 + $0x28] sm:$0xf] (%p312_p4), %vm199_vm0, %v4436_v26 }
 0x2d2   : >> { %v4131_v42 = vadd.f32 %v4130_v4, %v4042_v18  ;;  %4458 = vst.msk [vmem:[%s5115_s20] sm:$0xf] (%p312_p4), %vm199_vm0, %v4426_v49  ;;  %v4432_v4 = vld [vmem:[#allocation2 + $0x44] sm:$0xf] (%p312_p4)  ;;  %v4434_v18 = vld [vmem:[#allocation2 + $0x54] sm:$0xf] (%p312_p4) }
 0x2d3   : >> { %4420 = vst.msk [vmem:[#allocation2 + $0xe4] sm:$0xf] %vm199_vm0, %v4388_v57  ;;  %v4290_v34 = vmin.f32 %v4217_v35, 0.0  ;;  %v4256_v39 = vmax.f32 %v4217_v35, 0.0  ;;  %v4429_v57 = vld [vmem:[#allocation2 + $0x28] sm:$0xf] (%p312_p4) }
 0x2d4   : >> { %v3957_v47 = vpop.f32.mrf.mxu1  ;;  %4459 = vst.msk [vmem:[%s5115_s20 + $0x4] sm:$0xf] (%p312_p4), %vm199_vm0, %v4427_v60  ;;  %v4431_v35 = vld [vmem:[#allocation2 + $0x38] sm:$0xf] (%p312_p4) }
 0x2d5   : >> { %v4325_v56 = vmul.f32 %v7057_v8, %v4290_v34  ;;  %v3958_v59 = vadd.f32 %v3957_v47, %v3869_v15  ;;  %4461 = vst.msk [vmem:[%s5115_s20 + $0xc] sm:$0xf] (%p312_p4), %vm199_vm0, %v4429_v57  ;;  %v4435_v34 = vld [vmem:[#allocation2 + $0x58] sm:$0xf] (%p312_p4)  ;;  %v4450_v47 = vld [vmem:[#allocation2 + $0xd4] sm:$0xf] (%p312_p4) }
 0x2d6   : > { %4463 = vst.msk [vmem:[%s5115_s20 + $0x14] sm:$0xf] (%p312_p4), %vm199_vm0, %v4431_v35 }
 0x2d7   : >> { %v4357_v52 = vadd.f32 %v4325_v56, %v4256_v39  ;;  %4464 = vst.msk [vmem:[%s5115_s20 + $0x18] sm:$0xf] (%p312_p4), %vm199_vm0, %v4432_v4  ;;  %v4437_v39 = vld [vmem:[#allocation2 + $0x68] sm:$0xf] (%p312_p4)  ;;  %v4438_v56 = vld [vmem:[#allocation2 + $0x74] sm:$0xf] (%p312_p4) }
 0x2d8   : >> { %v4219_v53 = vpop.f32.mrf.mxu0  ;;  %4466 = vst.msk [vmem:[%s5115_s20 + $0x20] sm:$0xf] (%p312_p4), %vm199_vm0, %v4434_v18 }
 0x2d9   : >> { %v4389_v22 = vpack.c.bf16 %v4357_v52, %v4357_v52  ;;  %v4220_v46 = vadd.f32 %v4219_v53, %v4131_v42  ;;  %v4132_v62 = vpop.f32.mrf.mxu3  ;;  %4467 = vst.msk [vmem:[%s5115_s20 + $0x24] sm:$0xf] (%p312_p4), %vm199_vm0, %v4435_v34  ;;  %v4439_v42 = vld [vmem:[#allocation2 + $0x78] sm:$0xf] (%p312_p4)  ;;  %v4442_v52 = vld [vmem:[#allocation2 + $0x94] sm:$0xf] (%p312_p4) }
 0x2da   : >> { %v4133_v3 = vadd.f32 %v4132_v62, %v4044_v38  ;;  %v4046_v51 = vpop.f32.mrf.mxu2  ;;  %4469 = vst.msk [vmem:[%s5115_s20 + $0x2c] sm:$0xf] (%p312_p4), %vm199_vm0, %v4437_v39  ;;  %v4443_v53 = vld [vmem:[#allocation2 + $0x98] sm:$0xf] (%p312_p4)  ;;  %v4448_v38 = vld [vmem:[#allocation2 + $0xc4] sm:$0xf] (%p312_p4) }
 0x2db   : >> { %4421 = vst.msk [vmem:[#allocation2 + $0xe8] sm:$0xf] %vm199_vm0, %v4389_v22  ;;  %v4291_v50 = vmin.f32 %v4220_v46, 0.0  ;;  %v4257_v25 = vmax.f32 %v4220_v46, 0.0  ;;  %v4047_v43 = vadd.f32 %v4046_v51, %v3958_v59  ;;  %v4444_v22 = vld [vmem:[#allocation2 + $0xa4] sm:$0xf] (%p312_p4) }
 0x2dc   : >> { %v3959_v36 = vpop.f32.mrf.mxu1  ;;  %4470 = vst.msk [vmem:[%s5115_s20 + $0x30] sm:$0xf] (%p312_p4), %vm199_vm0, %v4438_v56  ;;  %v4446_v46 = vld [vmem:[#allocation2 + $0xb4] sm:$0xf] (%p312_p4)  ;;  %v4447_v62 = vld [vmem:[#allocation2 + $0xb8] sm:$0xf] (%p312_p4) }
 0x2dd   : >> { %v4326_v37 = vmul.f32 %v7057_v8, %v4291_v50  ;;  %v3960_v14 = vadd.f32 %v3959_v36, %v3871_v5  ;;  %4471 = vst.msk [vmem:[%s5115_s20 + $0x34] sm:$0xf] (%p312_p4), %vm199_vm0, %v4439_v42  ;;  %v4449_v50 = vld [vmem:[#allocation2 + $0xc8] sm:$0xf] (%p312_p4) }
 0x2de   : > { %4474 = vst.msk [vmem:[%s5115_s20 + $0x40] sm:$0xf] (%p312_p4), %vm199_vm0, %v4442_v52 }
 0x2df   : >> { %v4358_v27 = vadd.f32 %v4326_v37, %v4257_v25  ;;  %4475 = vst.msk [vmem:[%s5115_s20 + $0x44] sm:$0xf] (%p312_p4), %vm199_vm0, %v4443_v53  ;;  %v4451_v25 = vld [vmem:[#allocation2 + $0xd8] sm:$0xf] (%p312_p4)  ;;  %v4452_v37 = vld [vmem:[#allocation2 + $0xe4] sm:$0xf] (%p312_p4) }
 0x2e0   : >> { %v4221_v41 = vpop.f32.mrf.mxu0  ;;  %4476 = vst.msk [vmem:[%s5115_s20 + $0x48] sm:$0xf] (%p312_p4), %vm199_vm0, %v4444_v22 }
 0x2e1   : >> { %v4390_v24 = vpack.c.bf16 %v4358_v27, %v4358_v27  ;;  %v4222_v21 = vadd.f32 %v4221_v41, %v4133_v3  ;;  %4477 = vst.msk [vmem:[%s5115_s20 + $0x4c] sm:$0xf] (%p312_p4), %vm199_vm0, %v4445_v6 }
 0x2e2   : >> { %v4048_v13 = vpop.f32.mrf.mxu2  ;;  %4478 = vst.msk [vmem:[%s5115_s20 + $0x50] sm:$0xf] (%p312_p4), %vm199_vm0, %v4446_v46  ;;  %v4453_v3 = vld [vmem:[#allocation2 + $0xe8] sm:$0xf] (%p312_p4) }
 0x2e3   : >> { %4422 = vst.msk [vmem:[#allocation2 + $0xf4] sm:$0xf] %vm199_vm0, %v4390_v24  ;;  %v4292_v20 = vmin.f32 %v4222_v21, 0.0  ;;  %v4135_v2 = vpop.f32.mrf.mxu3  ;;  %v4258_v44 = vmax.f32 %v4222_v21, 0.0  ;;  %v4049_v32 = vadd.f32 %v4048_v13, %v3960_v14 }
 0x2e4   : >> { %v4136_v0 = vadd.f32 %v4135_v2, %v4047_v43  ;;  %4479 = vst.msk [vmem:[%s5115_s20 + $0x54] sm:$0xf] (%p312_p4), %vm199_vm0, %v4447_v62 }
 0x2e5   : >> { %v4327_v58 = vmul.f32 %v7057_v8, %v4292_v20  ;;  %4480 = vst.msk [vmem:[%s5115_s20 + $0x58] sm:$0xf] (%p312_p4), %vm199_vm0, %v4448_v38 }
 0x2e6   : > { %4481 = vst.msk [vmem:[%s5115_s20 + $0x5c] sm:$0xf] (%p312_p4), %vm199_vm0, %v4449_v50 }
 0x2e7   : >> { %v4359_v40 = vadd.f32 %v4327_v58, %v4258_v44  ;;  %4482 = vst.msk [vmem:[%s5115_s20 + $0x60] sm:$0xf] (%p312_p4), %vm199_vm0, %v4450_v47 }
 0x2e8   : >> { %v4224_v33 = vpop.f32.mrf.mxu0  ;;  %4483 = vst.msk [vmem:[%s5115_s20 + $0x64] sm:$0xf] (%p312_p4), %vm199_vm0, %v4451_v25 }
 0x2e9   : >> { %v4391_v19 = vpack.c.bf16 %v4359_v40, %v4359_v40  ;;  %v4225_v16 = vadd.f32 %v4224_v33, %v4136_v0  ;;  %4484 = vst.msk [vmem:[%s5115_s20 + $0x68] sm:$0xf] (%p312_p4), %vm199_vm0, %v4452_v37 }
 0x2ea   : > { %v4454_v51 = vld [vmem:[#allocation2 + $0xf4] sm:$0xf] (%p312_p4)  ;;  %4485 = vst.msk [vmem:[%s5115_s20 + $0x6c] sm:$0xf] (%p312_p4), %vm199_vm0, %v4453_v3 }
 0x2eb   : >> { %4423 = vst.msk [vmem:[#allocation2 + $0xf8] sm:$0xf] %vm199_vm0, %v4391_v19  ;;  %v4293_v30 = vmin.f32 %v4225_v16, 0.0  ;;  %v4137_v55 = vpop.f32.mrf.mxu3  ;;  %v4259_v23 = vmax.f32 %v4225_v16, 0.0 }
 0x2ec   : >> { %v4138_v11 = vadd.f32 %v4137_v55, %v4049_v32  ;;  %4486 = vst.msk [vmem:[%s5115_s20 + $0x70] sm:$0xf] (%p312_p4), %vm199_vm0, %v4454_v51 }
 0x2ed   : >> { %v4328_v61 = vmul.f32 %v7057_v8, %v4293_v30 }
 0x2ef   : >> { %v4360_v9 = vadd.f32 %v4328_v61, %v4259_v23 }
 0x2f0   : >> { %v4226_v54 = vpop.f32.mrf.mxu0 }
 0x2f1   : >> { %v4392_v1 = vpack.c.bf16 %v4360_v9, %v4360_v9  ;;  %v4227_v7 = vadd.f32 %v4226_v54, %v4138_v11 }
 0x2f2   : > { %v4455_v15 = vld [vmem:[#allocation2 + $0xf8] sm:$0xf] (%p312_p4) }
 0x2f3   : >> { %4424 = vst.msk [vmem:[#allocation2 + $0x104] sm:$0xf] %vm199_vm0, %v4392_v1  ;;  %v4294_v63 = vmin.f32 %v4227_v7, 0.0  ;;  %v4260_v31 = vmax.f32 %v4227_v7, 0.0 }
 0x2f4   : > { %4487 = vst.msk [vmem:[%s5115_s20 + $0x74] sm:$0xf] (%p312_p4), %vm199_vm0, %v4455_v15 }
 0x2f5   : >> { %v4329_v29 = vmul.f32 %v7057_v8, %v4294_v63  ;;  %v4428_v8 = vld [vmem:[#allocation2 + $0x24] sm:$0xf] (%p312_p4) }
 0x2f6   : > { %4460 = vst.msk [vmem:[%s5115_s20 + $0x8] sm:$0xf] (%p312_p4), %vm199_vm0, %v4428_v8 }
 0x2f7   : >> { %v4361_v17 = vadd.f32 %v4329_v29, %v4260_v31  ;;  %314 = sbr.rel (!%p312_p4) target bundleno = 88 (0x58), region = 79 }
 0x2f9   : >> { %v4393_v48 = vpack.c.bf16 %v4361_v17, %v4361_v17 }
 0x2fa   : > { %v4456_v27 = vld [vmem:[#allocation2 + $0x104] sm:$0xf] (%p312_p4) }
 0x2fb   : >> { %4425 = vst.msk [vmem:[#allocation2 + $0x108] sm:$0xf] %vm199_vm0, %v4393_v48 }
 0x2fc   : > { %4488 = vst.msk [vmem:[%s5115_s20 + $0x78] sm:$0xf] %vm199_vm0, %v4456_v27 }
 0x302   : > { %v4457_v41 = vld [vmem:[#allocation2 + $0x108] sm:$0xf] }
 0x303   : > { %4489 = vst.msk [vmem:[%s5115_s20 + $0x7c] sm:$0xf] %vm199_vm0, %v4457_v41 }
 0x304 PF: > { %s14_s15 = sadd.s32 1, %s5061_s15  }
 0x305   : > { %p11_p5 = scmp.ge.s32.totalorder %s14_s15, 4  }
 0x307   :  { %13 = sbr.rel (!%p11_p5) target bundleno = 1 (0x1), region = 90 }

</bundles_post_ra>
